<compile_context>
chip_gen: v7x
topology: tpu7x:2x2x1
jax: 0.10.0
libtpu: 0.0.40
codegen_flags: <defaults>
</compile_context>

<pallas_src>
import functools

import jax
import jax.numpy as jnp
from jax.experimental import pallas as pl
from jax.experimental.pallas import tpu as pltpu


# ----------------------------- Pallas kernels ------------------------------

def _matmul_bias_act_kernel(x_ref, w_ref, b_ref, o_ref, *, relu):
    # x: (tm, K), w: (K, Cout), b: (1, Cout), o: (tm, Cout)
    x = x_ref[...].astype(jnp.bfloat16)                 # bf16 MXU operands
    w = w_ref[...].astype(jnp.bfloat16)
    acc = jnp.dot(x, w, preferred_element_type=jnp.float32)   # single K-deep MXU dot
    acc = acc + b_ref[...]                              # f32 epilogue (v5e-safe)
    if relu:
        acc = jnp.maximum(acc, 0.0)
    o_ref[...] = acc.astype(o_ref.dtype)


def _conv1x1_cf_kernel(x_ref, w_ref, b_ref, o_ref, *, imgs_per_block):
    # Channels-first 1x1 conv: x: (bn, Cin, HW), w: (Cout, Cin), b: (Cout, 1),
    # o: (bn, Cout, HW). HW (=1024) sits on the lane axis -> lane-dense stores.
    w = w_ref[...].astype(jnp.bfloat16)
    b = b_ref[...]
    for i in range(imgs_per_block):                     # static unroll
        x = x_ref[i].astype(jnp.bfloat16)               # (Cin, HW)
        acc = jnp.dot(w, x, preferred_element_type=jnp.float32) + b
        o_ref[i] = acc.astype(o_ref.dtype)


# ----------------------------- Kernel wrappers ------------------------------

def _pick_tile_m(m):
    """Largest M tile in {1024,512,256,128} dividing m with >=2 blocks, else m."""
    for tm in (1024, 512, 256, 128):
        if m % tm == 0 and m // tm >= 2:
            return tm
    return m


def matmul_bias_act(x, w, b, *, relu):
    """(M, K) @ (K, Cout) + b, optional ReLU. M tiled across a parallel grid."""
    M, K = x.shape
    Cout = w.shape[1]
    tm = _pick_tile_m(M)
    kernel = functools.partial(_matmul_bias_act_kernel, relu=relu)
    return pl.pallas_call(
        kernel,
        out_shape=jax.ShapeDtypeStruct((M, Cout), x.dtype),
        grid=(M // tm,),
        in_specs=[
            pl.BlockSpec((tm, K), lambda i: (i, 0)),
            pl.BlockSpec((K, Cout), lambda i: (0, 0)),   # constant block -> no re-DMA
            pl.BlockSpec((1, Cout), lambda i: (0, 0)),
        ],
        out_specs=pl.BlockSpec((tm, Cout), lambda i: (i, 0)),
        compiler_params=pltpu.CompilerParams(dimension_semantics=("parallel",)),
    )(x, w, b.reshape(1, Cout))


def _im2col_flat(x, ksize):
    """NHWC 'same' im2col -> (N*H*W, ksize*ksize*Cin), taps concatenated on channels.

    Pure data movement (XLA glue); produces a single contiguous lane-dense slab.
    """
    N, H, W, Cin = x.shape
    pad = (ksize - 1) // 2
    xp = jnp.pad(x, ((0, 0), (pad, pad), (pad, pad), (0, 0)))
    cols = [xp[:, dy:dy + H, dx:dx + W, :]
            for dy in range(ksize) for dx in range(ksize)]
    patches = jnp.concatenate(cols, axis=-1)            # (N, H, W, ksize*ksize*Cin)
    return patches.reshape(N * H * W, ksize * ksize * Cin)


def conv3x3_relu(x_nhwc, w, b):
    """NHWC 3x3 conv, stride 1, 'same' padding, fused bias+ReLU.

    x: (N, H, W, Cin); w: (9*Cin, Cout); b: (Cout,) -> (N, H, W, Cout)
    """
    N, H, W, Cin = x_nhwc.shape
    Cout = w.shape[1]
    xm = _im2col_flat(x_nhwc, 3)                        # (N*H*W, 288)
    out = matmul_bias_act(xm, w, b, relu=True)
    return out.reshape(N, H, W, Cout)


def conv1x1_channels_first(x_cf, w, b):
    """1x1 conv in channels-first layout. x: (N, Cin, HW); w: (Cout, Cin); b: (Cout,)."""
    N, Cin, HW = x_cf.shape
    Cout = w.shape[0]
    bn = 1
    for cand in (4, 2):                                 # >=2 parallel blocks for v7x
        if N % cand == 0:
            bn = cand
            break
    kernel = functools.partial(_conv1x1_cf_kernel, imgs_per_block=bn)
    return pl.pallas_call(
        kernel,
        out_shape=jax.ShapeDtypeStruct((N, Cout, HW), x_cf.dtype),
        grid=(N // bn,),
        in_specs=[
            pl.BlockSpec((bn, Cin, HW), lambda i: (i, 0, 0)),
            pl.BlockSpec((Cout, Cin), lambda i: (0, 0)),
            pl.BlockSpec((Cout, 1), lambda i: (0, 0)),
        ],
        out_specs=pl.BlockSpec((bn, Cout, HW), lambda i: (i, 0, 0)),
        compiler_params=pltpu.CompilerParams(dimension_semantics=("parallel",)),
    )(x_cf, w, b.reshape(Cout, 1))


# ------------------------------ Glue (JAX) ---------------------------------

def pixel_shuffle_nhwc(x, r):
    """NHWC PixelShuffle matching torch.nn.PixelShuffle semantics on NCHW.

    out[n, h*r+i, w*r+j, c] = in[n, h, w, c*r*r + i*r + j]
    """
    N, H, W, Crr = x.shape
    C = Crr // (r * r)
    x = x.reshape(N, H, W, C, r, r)
    x = x.transpose(0, 1, 4, 2, 5, 3)                   # (N, H, r, W, r, C)
    return x.reshape(N, H * r, W * r, C)


def pixel_shuffle_to_nchw(x, r):
    """NHWC input -> channels-FIRST (NCHW) PixelShuffle output.

    out[n, c, h*r+i, w*r+j] = in[n, h, w, c*r*r + i*r + j]
    Same data movement cost as the NHWC variant, but feeds the channels-first
    1x1 conv so no extra transpose is needed anywhere downstream.
    """
    N, H, W, Crr = x.shape
    C = Crr // (r * r)
    x = x.reshape(N, H, W, C, r, r)
    x = x.transpose(0, 3, 1, 4, 2, 5)                   # (N, C, H, r, W, r)
    return x.reshape(N, C, H * r, W * r)


def image_decoder_forward(x, params, *, img_size, channels):
    """Matches ImageDecoder.forward: x (B, T, D) -> (B, T, ch, img_size, img_size)."""
    B, T, D = x.shape
    N = B * T
    # Linear; its weight columns are pre-permuted so the output is already in
    # HWC order -> pure reshape to NHWC (no runtime transpose).
    h = matmul_bias_act(x.reshape(N, D), params["lin_w"], params["lin_b"], relu=False)
    h = h.reshape(N, 4, 4, 32)                          # NHWC (4, 4, 32)
    # Conv3x3+ReLU (Pallas) + PixelShuffle (glue), twice in NHWC.
    for i in range(2):
        h = conv3x3_relu(h, params[f"conv{i}_w"], params[f"conv{i}_b"])
        h = pixel_shuffle_nhwc(h, 2)
    # Last 3x3 stage shuffles straight into channels-first layout.
    h = conv3x3_relu(h, params["conv2_w"], params["conv2_b"])
    h = pixel_shuffle_to_nchw(h, 2)                     # (N, 32, img, img)  == NCHW
    # Final 1x1 conv: lane-dense output, already NCHW -> pure reshape at the end.
    h = conv1x1_channels_first(h.reshape(N, 32, img_size * img_size),
                               params["conv3_w"], params["conv3_b"])
    return h.reshape(B, T, channels, img_size, img_size)


# --------------------------- Parameter creation -----------------------------

def make_params(key, in_dim, channels):
    """Deterministic synthetic torch-layout weights, converted to kernel layouts."""
    ks = jax.random.split(key, 5)

    def uni(k, shape, fan_in):
        s = 1.0 / (float(fan_in) ** 0.5)
        return jax.random.uniform(k, shape, jnp.float32, -s, s)

    # torch-layout params
    kw, kb = jax.random.split(ks[0])
    lin_w_t = uni(kw, (512, in_dim), in_dim)            # torch (out, in)
    lin_b_t = uni(kb, (512,), in_dim)
    convs_t = []
    for i, (cin, cout, ksz) in enumerate([(32, 128, 3), (32, 128, 3),
                                          (32, 128, 3), (32, channels, 1)]):
        kw, kb = jax.random.split(ks[i + 1])
        fan = cin * ksz * ksz
        convs_t.append((uni(kw, (cout, cin, ksz, ksz), fan), uni(kb, (cout,), fan)))

    # Fold the torch view(BT,32,4,4) NCHW -> NHWC permutation into the linear
    # weight columns: new feature (y, x, c) <- old feature c*16 + y*4 + x.
    c = jnp.arange(32)
    y = jnp.arange(4)
    xg = jnp.arange(4)
    perm = (c[None, None, :] * 16 + y[:, None, None] * 4 + xg[None, :, None]).reshape(-1)

    params = {
        "lin_w": lin_w_t.T[:, perm],                    # (in_dim, 512), HWC-ordered cols
        "lin_b": lin_b_t[perm],
    }
    for i in range(3):
        w_t, b_t = convs_t[i]
        # OIHW -> (kh, kw, Cin, Cout) -> (kh*kw*Cin, Cout); row order (dy, dx, cin)
        # matches _im2col_flat's tap/channel concatenation order.
        params[f"conv{i}_w"] = w_t.transpose(2, 3, 1, 0).reshape(9 * 32, 128)
        params[f"conv{i}_b"] = b_t
    w_t, b_t = convs_t[3]
    params["conv3_w"] = w_t.reshape(channels, 32)       # (Cout, Cin) for 1x1 conv
    params["conv3_b"] = b_t
    return params


# --------------------------------- Main -------------------------------------

if __name__ == "__main__":
    B, T, in_dim = 2, 8, 32
    channels = 3
    img_size = 32   # fixed by the architecture: 4x4 upsampled 2x three times

    key = jax.random.PRNGKey(0)
    kx, kp = jax.random.split(key)
    x = jax.random.normal(kx, (B, T, in_dim), dtype=jnp.float32)
    params = make_params(kp, in_dim, channels)

    fwd = jax.jit(functools.partial(image_decoder_forward,
                                    img_size=img_size, channels=channels))
    out = jax.block_until_ready(fwd(x, params))

    assert out.shape == (B, T, channels, img_size, img_size), out.shape
    assert out.dtype == jnp.float32
    print("KERNEL_OK")
</pallas_src>

<mosaic_0001>
module attributes {stable_mosaic.version = 11 : i64} {
  func.func @_matmul_bias_act_kernel(%arg0: i32, %arg1: memref<16x32xf32, #tpu.memory_space<vmem>>, %arg2: memref<32x512xf32, #tpu.memory_space<vmem>>, %arg3: memref<1x512xf32, #tpu.memory_space<vmem>>, %arg4: memref<16x512xf32, #tpu.memory_space<vmem>>) attributes {dimension_semantics = [#tpu.dimension_semantics<parallel>], iteration_bounds = array<i64: 1>, scalar_prefetch = 0 : i64, scratch_operands = 0 : i64, tpu.core_type = #tpu.core_type<tc>, window_params = [{transform_indices = @transform_0, window_bounds = array<i64: 16, 32>}, {pipeline_mode = #tpu.pipeline_mode<synchronous>, transform_indices = @transform_1, window_bounds = array<i64: 32, 512>}, {pipeline_mode = #tpu.pipeline_mode<synchronous>, transform_indices = @transform_2, window_bounds = array<i64: 1, 512>}, {transform_indices = @transform_3, window_bounds = array<i64: 16, 512>}]} {
    %c0 = arith.constant 0 : index
    %c0_0 = arith.constant 0 : index
    %0 = vector.load %arg1[%c0, %c0_0] : memref<16x32xf32, #tpu.memory_space<vmem>>, vector<16x32xf32>
    %1 = arith.truncf %0 : vector<16x32xf32> to vector<16x32xbf16>
    %c0_1 = arith.constant 0 : index
    %c0_2 = arith.constant 0 : index
    %2 = vector.load %arg2[%c0_1, %c0_2] : memref<32x512xf32, #tpu.memory_space<vmem>>, vector<32x512xf32>
    %3 = arith.truncf %2 : vector<32x512xf32> to vector<32x512xbf16>
    %cst = arith.constant dense<0.000000e+00> : vector<16x512xf32>
    %4 = tpu.matmul %1, %3, %cst {dimension_numbers = #tpu.dot_dimension_numbers<[1], [0], [0], [1], [0, 0, 1, 1], [], []>} : vector<16x32xbf16>, vector<32x512xbf16>, vector<16x512xf32> -> vector<16x512xf32>
    %c0_3 = arith.constant 0 : index
    %c0_4 = arith.constant 0 : index
    %5 = vector.load %arg3[%c0_3, %c0_4] : memref<1x512xf32, #tpu.memory_space<vmem>>, vector<1x512xf32>
    %6 = vector.broadcast %5 : vector<1x512xf32> to vector<16x512xf32>
    %7 = arith.addf %4, %6 : vector<16x512xf32>
    %c0_5 = arith.constant 0 : index
    %c0_6 = arith.constant 0 : index
    %8 = vector.load %arg4[%c0_5, %c0_6] : memref<16x512xf32, #tpu.memory_space<vmem>>, vector<16x512xf32>
    tpu.vector_store %arg4[%c0_5, %c0_6], %7 {strides = array<i32>} : memref<16x512xf32, #tpu.memory_space<vmem>>, vector<16x512xf32>,
    return
  }
  func.func @transform_0(%arg0: i32) -> (i32, i32) {
    %c0_i32 = arith.constant 0 : i32
    %c0_i32_0 = arith.constant 0 : i32
    return %arg0, %c0_i32 : i32, i32
  }
  func.func @transform_1(%arg0: i32) -> (i32, i32) {
    %c0_i32 = arith.constant 0 : i32
    %c0_i32_0 = arith.constant 0 : i32
    %c0_i32_1 = arith.constant 0 : i32
    return %c0_i32, %c0_i32_0 : i32, i32
  }
  func.func @transform_2(%arg0: i32) -> (i32, i32) {
    %c0_i32 = arith.constant 0 : i32
    %c0_i32_0 = arith.constant 0 : i32
    %c0_i32_1 = arith.constant 0 : i32
    return %c0_i32, %c0_i32_0 : i32, i32
  }
  func.func @transform_3(%arg0: i32) -> (i32, i32) {
    %c0_i32 = arith.constant 0 : i32
    %c0_i32_0 = arith.constant 0 : i32
    return %arg0, %c0_i32 : i32, i32
  }
}

module attributes {stable_mosaic.version = 11 : i64} {
  func.func @_matmul_bias_act_kernel(%arg0: i32, %arg1: memref<128x288xf32, #tpu.memory_space<vmem>>, %arg2: memref<288x128xf32, #tpu.memory_space<vmem>>, %arg3: memref<1x128xf32, #tpu.memory_space<vmem>>, %arg4: memref<128x128xf32, #tpu.memory_space<vmem>>) attributes {dimension_semantics = [#tpu.dimension_semantics<parallel>], iteration_bounds = array<i64: 2>, scalar_prefetch = 0 : i64, scratch_operands = 0 : i64, tpu.core_type = #tpu.core_type<tc>, window_params = [{transform_indices = @transform_0, window_bounds = array<i64: 128, 288>}, {pipeline_mode = #tpu.pipeline_mode<synchronous>, transform_indices = @transform_1, window_bounds = array<i64: 288, 128>}, {pipeline_mode = #tpu.pipeline_mode<synchronous>, transform_indices = @transform_2, window_bounds = array<i64: 1, 128>}, {transform_indices = @transform_3, window_bounds = array<i64: 128, 128>}]} {
    %c0 = arith.constant 0 : index
    %c0_0 = arith.constant 0 : index
    %0 = vector.load %arg1[%c0, %c0_0] : memref<128x288xf32, #tpu.memory_space<vmem>>, vector<128x288xf32>
    %1 = arith.truncf %0 : vector<128x288xf32> to vector<128x288xbf16>
    %c0_1 = arith.constant 0 : index
    %c0_2 = arith.constant 0 : index
    %2 = vector.load %arg2[%c0_1, %c0_2] : memref<288x128xf32, #tpu.memory_space<vmem>>, vector<288x128xf32>
    %3 = arith.truncf %2 : vector<288x128xf32> to vector<288x128xbf16>
    %cst = arith.constant dense<0.000000e+00> : vector<128x128xf32>
    %4 = tpu.matmul %1, %3, %cst {dimension_numbers = #tpu.dot_dimension_numbers<[1], [0], [0], [1], [0, 0, 1, 1], [], []>} : vector<128x288xbf16>, vector<288x128xbf16>, vector<128x128xf32> -> vector<128x128xf32>
    %c0_3 = arith.constant 0 : index
    %c0_4 = arith.constant 0 : index
    %5 = vector.load %arg3[%c0_3, %c0_4] : memref<1x128xf32, #tpu.memory_space<vmem>>, vector<1x128xf32>
    %6 = vector.broadcast %5 : vector<1x128xf32> to vector<128x128xf32>
    %7 = arith.addf %4, %6 : vector<128x128xf32>
    %cst_5 = arith.constant 0.000000e+00 : f32
    %8 = vector.broadcast %cst_5 : f32 to vector<128x128xf32>
    %9 = arith.maximumf %7, %8 : vector<128x128xf32>
    %c0_6 = arith.constant 0 : index
    %c0_7 = arith.constant 0 : index
    %10 = vector.load %arg4[%c0_6, %c0_7] : memref<128x128xf32, #tpu.memory_space<vmem>>, vector<128x128xf32>
    tpu.vector_store %arg4[%c0_6, %c0_7], %9 {strides = array<i32>} : memref<128x128xf32, #tpu.memory_space<vmem>>, vector<128x128xf32>,
    return
  }
  func.func @transform_0(%arg0: i32) -> (i32, i32) {
    %c0_i32 = arith.constant 0 : i32
    %c0_i32_0 = arith.constant 0 : i32
    return %arg0, %c0_i32 : i32, i32
  }
  func.func @transform_1(%arg0: i32) -> (i32, i32) {
    %c0_i32 = arith.constant 0 : i32
    %c0_i32_0 = arith.constant 0 : i32
    %c0_i32_1 = arith.constant 0 : i32
    return %c0_i32, %c0_i32_0 : i32, i32
  }
  func.func @transform_2(%arg0: i32) -> (i32, i32) {
    %c0_i32 = arith.constant 0 : i32
    %c0_i32_0 = arith.constant 0 : i32
    %c0_i32_1 = arith.constant 0 : i32
    return %c0_i32, %c0_i32_0 : i32, i32
  }
  func.func @transform_3(%arg0: i32) -> (i32, i32) {
    %c0_i32 = arith.constant 0 : i32
    %c0_i32_0 = arith.constant 0 : i32
    return %arg0, %c0_i32 : i32, i32
  }
}

module attributes {stable_mosaic.version = 11 : i64} {
  func.func @_matmul_bias_act_kernel(%arg0: i32, %arg1: memref<512x288xf32, #tpu.memory_space<vmem>>, %arg2: memref<288x128xf32, #tpu.memory_space<vmem>>, %arg3: memref<1x128xf32, #tpu.memory_space<vmem>>, %arg4: memref<512x128xf32, #tpu.memory_space<vmem>>) attributes {dimension_semantics = [#tpu.dimension_semantics<parallel>], iteration_bounds = array<i64: 2>, scalar_prefetch = 0 : i64, scratch_operands = 0 : i64, tpu.core_type = #tpu.core_type<tc>, window_params = [{transform_indices = @transform_0, window_bounds = array<i64: 512, 288>}, {pipeline_mode = #tpu.pipeline_mode<synchronous>, transform_indices = @transform_1, window_bounds = array<i64: 288, 128>}, {pipeline_mode = #tpu.pipeline_mode<synchronous>, transform_indices = @transform_2, window_bounds = array<i64: 1, 128>}, {transform_indices = @transform_3, window_bounds = array<i64: 512, 128>}]} {
    %c0 = arith.constant 0 : index
    %c0_0 = arith.constant 0 : index
    %0 = vector.load %arg1[%c0, %c0_0] : memref<512x288xf32, #tpu.memory_space<vmem>>, vector<512x288xf32>
    %1 = arith.truncf %0 : vector<512x288xf32> to vector<512x288xbf16>
    %c0_1 = arith.constant 0 : index
    %c0_2 = arith.constant 0 : index
    %2 = vector.load %arg2[%c0_1, %c0_2] : memref<288x128xf32, #tpu.memory_space<vmem>>, vector<288x128xf32>
    %3 = arith.truncf %2 : vector<288x128xf32> to vector<288x128xbf16>
    %cst = arith.constant dense<0.000000e+00> : vector<512x128xf32>
    %4 = tpu.matmul %1, %3, %cst {dimension_numbers = #tpu.dot_dimension_numbers<[1], [0], [0], [1], [0, 0, 1, 1], [], []>} : vector<512x288xbf16>, vector<288x128xbf16>, vector<512x128xf32> -> vector<512x128xf32>
    %c0_3 = arith.constant 0 : index
    %c0_4 = arith.constant 0 : index
    %5 = vector.load %arg3[%c0_3, %c0_4] : memref<1x128xf32, #tpu.memory_space<vmem>>, vector<1x128xf32>
    %6 = vector.broadcast %5 : vector<1x128xf32> to vector<512x128xf32>
    %7 = arith.addf %4, %6 : vector<512x128xf32>
    %cst_5 = arith.constant 0.000000e+00 : f32
    %8 = vector.broadcast %cst_5 : f32 to vector<512x128xf32>
    %9 = arith.maximumf %7, %8 : vector<512x128xf32>
    %c0_6 = arith.constant 0 : index
    %c0_7 = arith.constant 0 : index
    %10 = vector.load %arg4[%c0_6, %c0_7] : memref<512x128xf32, #tpu.memory_space<vmem>>, vector<512x128xf32>
    tpu.vector_store %arg4[%c0_6, %c0_7], %9 {strides = array<i32>} : memref<512x128xf32, #tpu.memory_space<vmem>>, vector<512x128xf32>,
    return
  }
  func.func @transform_0(%arg0: i32) -> (i32, i32) {
    %c0_i32 = arith.constant 0 : i32
    %c0_i32_0 = arith.constant 0 : i32
    return %arg0, %c0_i32 : i32, i32
  }
  func.func @transform_1(%arg0: i32) -> (i32, i32) {
    %c0_i32 = arith.constant 0 : i32
    %c0_i32_0 = arith.constant 0 : i32
    %c0_i32_1 = arith.constant 0 : i32
    return %c0_i32, %c0_i32_0 : i32, i32
  }
  func.func @transform_2(%arg0: i32) -> (i32, i32) {
    %c0_i32 = arith.constant 0 : i32
    %c0_i32_0 = arith.constant 0 : i32
    %c0_i32_1 = arith.constant 0 : i32
    return %c0_i32, %c0_i32_0 : i32, i32
  }
  func.func @transform_3(%arg0: i32) -> (i32, i32) {
    %c0_i32 = arith.constant 0 : i32
    %c0_i32_0 = arith.constant 0 : i32
    return %arg0, %c0_i32 : i32, i32
  }
}

module attributes {stable_mosaic.version = 11 : i64} {
  func.func @_matmul_bias_act_kernel(%arg0: i32, %arg1: memref<1024x288xf32, #tpu.memory_space<vmem>>, %arg2: memref<288x128xf32, #tpu.memory_space<vmem>>, %arg3: memref<1x128xf32, #tpu.memory_space<vmem>>, %arg4: memref<1024x128xf32, #tpu.memory_space<vmem>>) attributes {dimension_semantics = [#tpu.dimension_semantics<parallel>], iteration_bounds = array<i64: 4>, scalar_prefetch = 0 : i64, scratch_operands = 0 : i64, tpu.core_type = #tpu.core_type<tc>, window_params = [{transform_indices = @transform_0, window_bounds = array<i64: 1024, 288>}, {pipeline_mode = #tpu.pipeline_mode<synchronous>, transform_indices = @transform_1, window_bounds = array<i64: 288, 128>}, {pipeline_mode = #tpu.pipeline_mode<synchronous>, transform_indices = @transform_2, window_bounds = array<i64: 1, 128>}, {transform_indices = @transform_3, window_bounds = array<i64: 1024, 128>}]} {
    %c0 = arith.constant 0 : index
    %c0_0 = arith.constant 0 : index
    %0 = vector.load %arg1[%c0, %c0_0] : memref<1024x288xf32, #tpu.memory_space<vmem>>, vector<1024x288xf32>
    %1 = arith.truncf %0 : vector<1024x288xf32> to vector<1024x288xbf16>
    %c0_1 = arith.constant 0 : index
    %c0_2 = arith.constant 0 : index
    %2 = vector.load %arg2[%c0_1, %c0_2] : memref<288x128xf32, #tpu.memory_space<vmem>>, vector<288x128xf32>
    %3 = arith.truncf %2 : vector<288x128xf32> to vector<288x128xbf16>
    %cst = arith.constant dense<0.000000e+00> : vector<1024x128xf32>
    %4 = tpu.matmul %1, %3, %cst {dimension_numbers = #tpu.dot_dimension_numbers<[1], [0], [0], [1], [0, 0, 1, 1], [], []>} : vector<1024x288xbf16>, vector<288x128xbf16>, vector<1024x128xf32> -> vector<1024x128xf32>
    %c0_3 = arith.constant 0 : index
    %c0_4 = arith.constant 0 : index
    %5 = vector.load %arg3[%c0_3, %c0_4] : memref<1x128xf32, #tpu.memory_space<vmem>>, vector<1x128xf32>
    %6 = vector.broadcast %5 : vector<1x128xf32> to vector<1024x128xf32>
    %7 = arith.addf %4, %6 : vector<1024x128xf32>
    %cst_5 = arith.constant 0.000000e+00 : f32
    %8 = vector.broadcast %cst_5 : f32 to vector<1024x128xf32>
    %9 = arith.maximumf %7, %8 : vector<1024x128xf32>
    %c0_6 = arith.constant 0 : index
    %c0_7 = arith.constant 0 : index
    %10 = vector.load %arg4[%c0_6, %c0_7] : memref<1024x128xf32, #tpu.memory_space<vmem>>, vector<1024x128xf32>
    tpu.vector_store %arg4[%c0_6, %c0_7], %9 {strides = array<i32>} : memref<1024x128xf32, #tpu.memory_space<vmem>>, vector<1024x128xf32>,
    return
  }
  func.func @transform_0(%arg0: i32) -> (i32, i32) {
    %c0_i32 = arith.constant 0 : i32
    %c0_i32_0 = arith.constant 0 : i32
    return %arg0, %c0_i32 : i32, i32
  }
  func.func @transform_1(%arg0: i32) -> (i32, i32) {
    %c0_i32 = arith.constant 0 : i32
    %c0_i32_0 = arith.constant 0 : i32
    %c0_i32_1 = arith.constant 0 : i32
    return %c0_i32, %c0_i32_0 : i32, i32
  }
  func.func @transform_2(%arg0: i32) -> (i32, i32) {
    %c0_i32 = arith.constant 0 : i32
    %c0_i32_0 = arith.constant 0 : i32
    %c0_i32_1 = arith.constant 0 : i32
    return %c0_i32, %c0_i32_0 : i32, i32
  }
  func.func @transform_3(%arg0: i32) -> (i32, i32) {
    %c0_i32 = arith.constant 0 : i32
    %c0_i32_0 = arith.constant 0 : i32
    return %arg0, %c0_i32 : i32, i32
  }
}

module attributes {stable_mosaic.version = 11 : i64} {
  func.func @_conv1x1_cf_kernel(%arg0: i32, %arg1: memref<4x32x1024xf32, #tpu.memory_space<vmem>>, %arg2: memref<3x32xf32, #tpu.memory_space<vmem>>, %arg3: memref<3x1xf32, #tpu.memory_space<vmem>>, %arg4: memref<4x3x1024xf32, #tpu.memory_space<vmem>>) attributes {dimension_semantics = [#tpu.dimension_semantics<parallel>], iteration_bounds = array<i64: 4>, scalar_prefetch = 0 : i64, scratch_operands = 0 : i64, tpu.core_type = #tpu.core_type<tc>, window_params = [{transform_indices = @transform_0, window_bounds = array<i64: 4, 32, 1024>}, {pipeline_mode = #tpu.pipeline_mode<synchronous>, transform_indices = @transform_1, window_bounds = array<i64: 3, 32>}, {pipeline_mode = #tpu.pipeline_mode<synchronous>, transform_indices = @transform_2, window_bounds = array<i64: 3, 1>}, {transform_indices = @transform_3, window_bounds = array<i64: 4, 3, 1024>}]} {
    %c0 = arith.constant 0 : index
    %c0_0 = arith.constant 0 : index
    %0 = vector.load %arg2[%c0, %c0_0] : memref<3x32xf32, #tpu.memory_space<vmem>>, vector<3x32xf32>
    %1 = arith.truncf %0 : vector<3x32xf32> to vector<3x32xbf16>
    %c0_1 = arith.constant 0 : index
    %c0_2 = arith.constant 0 : index
    %2 = vector.load %arg3[%c0_1, %c0_2] : memref<3x1xf32, #tpu.memory_space<vmem>>, vector<3x1xf32>
    %c0_3 = arith.constant 0 : index
    %c0_4 = arith.constant 0 : index
    %c0_5 = arith.constant 0 : index
    %3 = vector.load %arg1[%c0_3, %c0_4, %c0_5] : memref<4x32x1024xf32, #tpu.memory_space<vmem>>, vector<1x32x1024xf32>
    %4 = vector.shape_cast %3 : vector<1x32x1024xf32> to vector<32x1024xf32>
    %5 = arith.truncf %4 : vector<32x1024xf32> to vector<32x1024xbf16>
    %cst = arith.constant dense<0.000000e+00> : vector<3x1024xf32>
    %6 = tpu.matmul %1, %5, %cst {dimension_numbers = #tpu.dot_dimension_numbers<[1], [0], [0], [1], [0, 0, 1, 1], [], []>} : vector<3x32xbf16>, vector<32x1024xbf16>, vector<3x1024xf32> -> vector<3x1024xf32>
    %7 = vector.broadcast %2 : vector<3x1xf32> to vector<3x1024xf32>
    %8 = arith.addf %6, %7 : vector<3x1024xf32>
    %c0_6 = arith.constant 0 : index
    %c0_7 = arith.constant 0 : index
    %c0_8 = arith.constant 0 : index
    %9 = vector.load %arg4[%c0_6, %c0_7, %c0_8] : memref<4x3x1024xf32, #tpu.memory_space<vmem>>, vector<1x3x1024xf32>
    %10 = vector.shape_cast %9 : vector<1x3x1024xf32> to vector<3x1024xf32>
    %11 = vector.shape_cast %8 : vector<3x1024xf32> to vector<1x3x1024xf32>
    tpu.vector_store %arg4[%c0_6, %c0_7, %c0_8], %11 {strides = array<i32>} : memref<4x3x1024xf32, #tpu.memory_space<vmem>>, vector<1x3x1024xf32>,
    %c1 = arith.constant 1 : index
    %c0_9 = arith.constant 0 : index
    %c0_10 = arith.constant 0 : index
    %12 = vector.load %arg1[%c1, %c0_9, %c0_10] : memref<4x32x1024xf32, #tpu.memory_space<vmem>>, vector<1x32x1024xf32>
    %13 = vector.shape_cast %12 : vector<1x32x1024xf32> to vector<32x1024xf32>
    %14 = arith.truncf %13 : vector<32x1024xf32> to vector<32x1024xbf16>
    %cst_11 = arith.constant dense<0.000000e+00> : vector<3x1024xf32>
    %15 = tpu.matmul %1, %14, %cst_11 {dimension_numbers = #tpu.dot_dimension_numbers<[1], [0], [0], [1], [0, 0, 1, 1], [], []>} : vector<3x32xbf16>, vector<32x1024xbf16>, vector<3x1024xf32> -> vector<3x1024xf32>
    %16 = vector.broadcast %2 : vector<3x1xf32> to vector<3x1024xf32>
    %17 = arith.addf %15, %16 : vector<3x1024xf32>
    %c1_12 = arith.constant 1 : index
    %c0_13 = arith.constant 0 : index
    %c0_14 = arith.constant 0 : index
    %18 = vector.load %arg4[%c1_12, %c0_13, %c0_14] : memref<4x3x1024xf32, #tpu.memory_space<vmem>>, vector<1x3x1024xf32>
    %19 = vector.shape_cast %18 : vector<1x3x1024xf32> to vector<3x1024xf32>
    %20 = vector.shape_cast %17 : vector<3x1024xf32> to vector<1x3x1024xf32>
    tpu.vector_store %arg4[%c1_12, %c0_13, %c0_14], %20 {strides = array<i32>} : memref<4x3x1024xf32, #tpu.memory_space<vmem>>, vector<1x3x1024xf32>,
    %c2 = arith.constant 2 : index
    %c0_15 = arith.constant 0 : index
    %c0_16 = arith.constant 0 : index
    %21 = vector.load %arg1[%c2, %c0_15, %c0_16] : memref<4x32x1024xf32, #tpu.memory_space<vmem>>, vector<1x32x1024xf32>
    %22 = vector.shape_cast %21 : vector<1x32x1024xf32> to vector<32x1024xf32>
    %23 = arith.truncf %22 : vector<32x1024xf32> to vector<32x1024xbf16>
    %cst_17 = arith.constant dense<0.000000e+00> : vector<3x1024xf32>
    %24 = tpu.matmul %1, %23, %cst_17 {dimension_numbers = #tpu.dot_dimension_numbers<[1], [0], [0], [1], [0, 0, 1, 1], [], []>} : vector<3x32xbf16>, vector<32x1024xbf16>, vector<3x1024xf32> -> vector<3x1024xf32>
    %25 = vector.broadcast %2 : vector<3x1xf32> to vector<3x1024xf32>
    %26 = arith.addf %24, %25 : vector<3x1024xf32>
    %c2_18 = arith.constant 2 : index
    %c0_19 = arith.constant 0 : index
    %c0_20 = arith.constant 0 : index
    %27 = vector.load %arg4[%c2_18, %c0_19, %c0_20] : memref<4x3x1024xf32, #tpu.memory_space<vmem>>, vector<1x3x1024xf32>
    %28 = vector.shape_cast %27 : vector<1x3x1024xf32> to vector<3x1024xf32>
    %29 = vector.shape_cast %26 : vector<3x1024xf32> to vector<1x3x1024xf32>
    tpu.vector_store %arg4[%c2_18, %c0_19, %c0_20], %29 {strides = array<i32>} : memref<4x3x1024xf32, #tpu.memory_space<vmem>>, vector<1x3x1024xf32>,
    %c3 = arith.constant 3 : index
    %c0_21 = arith.constant 0 : index
    %c0_22 = arith.constant 0 : index
    %30 = vector.load %arg1[%c3, %c0_21, %c0_22] : memref<4x32x1024xf32, #tpu.memory_space<vmem>>, vector<1x32x1024xf32>
    %31 = vector.shape_cast %30 : vector<1x32x1024xf32> to vector<32x1024xf32>
    %32 = arith.truncf %31 : vector<32x1024xf32> to vector<32x1024xbf16>
    %cst_23 = arith.constant dense<0.000000e+00> : vector<3x1024xf32>
    %33 = tpu.matmul %1, %32, %cst_23 {dimension_numbers = #tpu.dot_dimension_numbers<[1], [0], [0], [1], [0, 0, 1, 1], [], []>} : vector<3x32xbf16>, vector<32x1024xbf16>, vector<3x1024xf32> -> vector<3x1024xf32>
    %34 = vector.broadcast %2 : vector<3x1xf32> to vector<3x1024xf32>
    %35 = arith.addf %33, %34 : vector<3x1024xf32>
    %c3_24 = arith.constant 3 : index
    %c0_25 = arith.constant 0 : index
    %c0_26 = arith.constant 0 : index
    %36 = vector.load %arg4[%c3_24, %c0_25, %c0_26] : memref<4x3x1024xf32, #tpu.memory_space<vmem>>, vector<1x3x1024xf32>
    %37 = vector.shape_cast %36 : vector<1x3x1024xf32> to vector<3x1024xf32>
    %38 = vector.shape_cast %35 : vector<3x1024xf32> to vector<1x3x1024xf32>
    tpu.vector_store %arg4[%c3_24, %c0_25, %c0_26], %38 {strides = array<i32>} : memref<4x3x1024xf32, #tpu.memory_space<vmem>>, vector<1x3x1024xf32>,
    return
  }
  func.func @transform_0(%arg0: i32) -> (i32, i32, i32) {
    %c0_i32 = arith.constant 0 : i32
    %c0_i32_0 = arith.constant 0 : i32
    %c0_i32_1 = arith.constant 0 : i32
    return %arg0, %c0_i32, %c0_i32_0 : i32, i32, i32
  }
  func.func @transform_1(%arg0: i32) -> (i32, i32) {
    %c0_i32 = arith.constant 0 : i32
    %c0_i32_0 = arith.constant 0 : i32
    %c0_i32_1 = arith.constant 0 : i32
    return %c0_i32, %c0_i32_0 : i32, i32
  }
  func.func @transform_2(%arg0: i32) -> (i32, i32) {
    %c0_i32 = arith.constant 0 : i32
    %c0_i32_0 = arith.constant 0 : i32
    %c0_i32_1 = arith.constant 0 : i32
    return %c0_i32, %c0_i32_0 : i32, i32
  }
  func.func @transform_3(%arg0: i32) -> (i32, i32, i32) {
    %c0_i32 = arith.constant 0 : i32
    %c0_i32_0 = arith.constant 0 : i32
    %c0_i32_1 = arith.constant 0 : i32
    return %arg0, %c0_i32, %c0_i32_0 : i32, i32, i32
  }
}

</mosaic_0001>

<bundles_post_ra>
// kernel: image_decoder_forward.5
= control target key start
LH: loop header
LB: loop body
LE: loop exit
PB: predicated region body
PF: predicated region fallthrough
CT: control target
= control target key end

     0   :  { %8 = vsyncpa [#allocation3], 0  ;;  %s375_s0 = inlined_call_operand.hbm [shape: f32[16,32], index: 0, kind: input, shape index: {}]   ;;  %s376_s1 = inlined_call_operand.hbm [shape: f32[32,512], index: 1, kind: input, shape index: {}]   ;;  %s377_s2 = inlined_call_operand.hbm [shape: f32[1,512], index: 2, kind: input, shape index: {}]   ;;  %s378_s3 = inlined_call_operand.vmem [shape: f32[16,512], index: 3, kind: output, shape index: {}]  }
   0x1   :  { %9 = vsyncpa [#allocation5], 0  ;;  %s287_s12 = smov [#allocation4]   ;;  %s217_s16 = scalar_lea.hbm %s376_s1, 2048 }
   0x2   :  { %s27_s13 = sshll.u32 %s287_s12, 4  ;;  %p218_p0 = scmp.ne.s32.totalorder %s376_s1, %s217_s16  ;;  %s28_s13 = int_to_ptr.vmem [resolvable:$true] %s27_s13 }
   0x3   :  { %p221_p1 = scmp.lt.u32.totalorder %s217_s16, %s376_s1 }
   0x5   :  { %p223_p2 = pnand %p221_p1, %p218_p0 }
   0x7   :  { %226 = shalt.err (!%p223_p2)
}
   0x8   :  { %s227_s21 = scalar_lea.vmem %s28_s13, 2048  ;;  %p232_p4 = scmp.lt.s32.totalorder %s28_s13, %s28_s13 }
   0x9   :  { %p228_p3 = scmp.ne.s32.totalorder %s28_s13, %s227_s21  ;;  %p233_p5 = scmp.lt.s32.totalorder %s227_s21, %s227_s21 }
   0xb   :  { %p234_p6 = por %p233_p5, %p232_p4 }
   0xd   :  { %p235_p7 = pnand %p234_p6, %p228_p3 }
   0xf   :  { %238 = shalt.err (!%p235_p7)
}
  0x10   :  { %s288_s22 = smov 512   ;;  %s289_s23 = smov 32  }
  0x11   :  { %33 = dma.hbm_to_vmem [thread:$0]  %s376_s1, 2048, %s28_s13, [#allocation5], %s288_s22, %s288_s22, %s289_s23  }
  0x12   :  { %s290_s26 = smov [#allocation2]   ;;  %s239_s30 = scalar_lea.hbm %s375_s0, 256 }
  0x13   :  { %s15_s27 = sshll.u32 %s290_s26, 4  ;;  %p240_p8 = scmp.ne.s32.totalorder %s375_s0, %s239_s30  ;;  %s16_s27 = int_to_ptr.vmem [resolvable:$true] %s15_s27 }
  0x14   :  { %p243_p9 = scmp.lt.u32.totalorder %s239_s30, %s375_s0 }
  0x16   :  { %p245_p10 = pnand %p243_p9, %p240_p8 }
  0x18   :  { %248 = shalt.err (!%p245_p10)
}
  0x19   :  { %s249_s8 = scalar_lea.vmem %s16_s27, 256  ;;  %p254_p12 = scmp.lt.s32.totalorder %s16_s27, %s16_s27 }
  0x1a   :  { %p250_p11 = scmp.ne.s32.totalorder %s16_s27, %s249_s8  ;;  %p255_p13 = scmp.lt.s32.totalorder %s249_s8, %s249_s8 }
  0x1c   :  { %p256_p0 = por %p255_p13, %p254_p12 }
  0x1e   :  { %p257_p1 = pnand %p256_p0, %p250_p11 }
  0x20   :  { %260 = shalt.err (!%p257_p1)
}
  0x21   :  { %s291_s1 = smov 128   ;;  %s292_s9 = smov 8  }
  0x22   :  { %21 = dma.hbm_to_vmem [thread:$0]  %s375_s0, 256, %s16_s27, [#allocation3], %s291_s1, %s291_s1, %s292_s9  }
  0x23   :  { %s293_s12 = smov [#allocation6]   ;;  %s261_s16 = scalar_lea.hbm %s377_s2, 64 }
  0x24   :  { %s40_s13 = sshll.u32 %s293_s12, 4  ;;  %p262_p2 = scmp.ne.s32.totalorder %s377_s2, %s261_s16  ;;  %s41_s13 = int_to_ptr.vmem [resolvable:$true] %s40_s13 }
  0x25   :  { %p265_p3 = scmp.lt.u32.totalorder %s261_s16, %s377_s2 }
  0x27   :  { %p267_p4 = pnand %p265_p3, %p262_p2 }
  0x29   :  { %270 = shalt.err (!%p267_p4)
}
  0x2a   :  { %s271_s21 = scalar_lea.vmem %s41_s13, 64  ;;  %p276_p6 = scmp.lt.s32.totalorder %s41_s13, %s41_s13 }
  0x2b   :  { %p272_p5 = scmp.ne.s32.totalorder %s41_s13, %s271_s21  ;;  %p277_p7 = scmp.lt.s32.totalorder %s271_s21, %s271_s21 }
  0x2d   :  { %p278_p8 = por %p277_p7, %p276_p6 }
  0x2f   :  { %p279_p9 = pnand %p278_p8, %p272_p5 }
  0x31   :  { %282 = shalt.err (!%p279_p9)
}
  0x32   :  { %43 = dma.hbm_to_vmem [thread:$0]  %s377_s2, 64, %s41_s13, [#allocation5]  }
  0x33   :  { %283 = dma.done.wait [#allocation3], 256  }
  0x34   :  { %284 = vsyncadd [#allocation3], 4294967040 }
  0x35   :  { %285 = dma.done.wait [#allocation5], 2112  }
  0x36   :  { %286 = vsyncadd [#allocation5], 4294965184  ;;  %v294_v0 = vmov 0   ;;  %v58_v1 = vld [vmem:[#allocation4 + $0x8] sm:$0xff]  ;;  %v60_v3 = vld [vmem:[#allocation4 + $0x18] sm:$0xff]  ;;  %vm103_vm0 = vcmask 261120   ;;  %v83_v28 = vlaneseq }
  0x37   :  { %139 = vmatprep.mubr.bf16.mxu0 %v294_v0  ;;  %182 = vmatprep.mubr.bf16.mxu1 %v294_v0  ;;  %v62_v2 = vld [vmem:[#allocation4 + $0x28] sm:$0xff]  ;;  %v64_v5 = vld [vmem:[#allocation4 + $0x38] sm:$0xff]  ;;  %v57_v6 = vld [vmem:[#allocation4] sm:$0xff] }
  0x38   :  { %v74_v4 = vpack.c.bf16 %v62_v2, %v58_v1  ;;  %v61_v7 = vld [vmem:[#allocation4 + $0x20] sm:$0xff]  ;;  %v76_v8 = vpack.c.bf16 %v64_v5, %v60_v3  ;;  %v59_v10 = vld [vmem:[#allocation4 + $0x10] sm:$0xff]  ;;  %v66_v12 = vld [vmem:[#allocation4 + $0x48] sm:$0xff]  ;;  %v84_v29 = vshrl.u32 %v83_v28, 7 }
  0x39   :  { %v73_v9 = vpack.c.bf16 %v61_v7, %v57_v6  ;;  %v63_v11 = vld [vmem:[#allocation4 + $0x30] sm:$0xff]  ;;  %v70_v14 = vld [vmem:[#allocation4 + $0x68] sm:$0xff]  ;;  %v68_v15 = vld [vmem:[#allocation4 + $0x58] sm:$0xff] }
  0x3a   :  { %107 = vmatprep.subr.bf16.mxu0 %v74_v4  ;;  %v75_v13 = vpack.c.bf16 %v63_v11, %v59_v10  ;;  %v72_v16 = vld [vmem:[#allocation4 + $0x78] sm:$0xff]  ;;  %150 = vmatprep.subr.bf16.mxu1 %v76_v8  ;;  %v78_v17 = vpack.c.bf16 %v70_v14, %v66_v12  ;;  %v65_v19 = vld [vmem:[#allocation4 + $0x40] sm:$0xff]  ;;  %v67_v21 = vld [vmem:[#allocation4 + $0x50] sm:$0xff]  ;;  %v85_v30 = vsub.s32 0, %v84_v29  ;;  %v93_v32 = vsub.s32 2, %v84_v29 }
  0x3b   :  { %108 = vmatpush1.bf16.msra.mxu0 %v73_v9  ;;  %v80_v18 = vpack.c.bf16 %v72_v16, %v68_v15  ;;  %v69_v20 = vld [vmem:[#allocation4 + $0x60] sm:$0xff]  ;;  %v71_v23 = vld [vmem:[#allocation4 + $0x70] sm:$0xff]  ;;  %v55_v25 = vld [vmem:[#allocation2 + $0x8] sm:$0xff]  ;;  %v89_v33 = vsub.s32 1, %v84_v29  ;;  %v97_v34 = vsub.s32 3, %v84_v29 }
  0x3c   :  { %151 = vmatpush1.bf16.msra.mxu1 %v75_v13  ;;  %v77_v22 = vpack.c.bf16 %v69_v20, %v65_v19  ;;  %v54_v24 = vld [vmem:[#allocation2] sm:$0xff]  ;;  %109 = vmatprep.subr.bf16.mxu0 %v78_v17  ;;  %v79_v26 = vpack.c.bf16 %v71_v23, %v67_v21  ;;  %v81_v31 = vld [vmem:[#allocation6] sm:$0xf] }
  0x3d   :  { %152 = vmatprep.subr.bf16.mxu1 %v80_v18  ;;  %v56_v27 = vpack.c.bf16 %v55_v25, %v54_v24  ;;  %v86_v35 = vrot.slane %v81_v31, %v85_v30  ;;  %v94_v36 = vrot.slane %v81_v31, %v93_v32  ;;  %v90_v37 = vrot.slane %v81_v31, %v89_v33 }
  0x3e   :  { %v98_v38 = vrot.slane %v81_v31, %v97_v34 }
  0x3f   :  { %110 = vmatpush1.bf16.msra.mxu0 %v77_v22 }
  0x40   :  { %153 = vmatpush1.bf16.msra.mxu1 %v79_v26 }
  0x42   :  { %207 = vmatmul.mubr.msk.bf16.vlgmr.msra.gmra.mrb[0].mxu0 %vm103_vm0, %v56_v27 }
  0x43   :  { %208 = vmatmul.mubr.msk.bf16.vlgmr.msra.gmra.mrb[0].mxu1 %vm103_vm0, %v56_v27 }
 0x115   :  { %v141_v39 = vpop.f32.mrb[0].mxu0 }
 0x116   :  { %v142_v40 = vadd.f32 %v141_v39, %v86_v35  ;;  %v184_v41 = vpop.f32.mrb[0].mxu1  ;;  %v143_v42 = vpop.f32.mrb[1].mxu0 }
 0x117   :  { %v185_v43 = vadd.f32 %v184_v41, %v94_v36  ;;  %v144_v44 = vadd.f32 %v143_v42, %v90_v37  ;;  %v186_v45 = vpop.f32.mrb[1].mxu1  ;;  %v145_v46 = vpop.f32.mrb[2].mxu0 }
 0x118   :  { %193 = vst [vmem:[%s378_s3] sm:$0xff] %v142_v40  ;;  %v187_v47 = vadd.f32 %v186_v45, %v98_v38  ;;  %v146_v48 = vadd.f32 %v145_v46, %v86_v35  ;;  %v188_v49 = vpop.f32.mrb[2].mxu1  ;;  %v147_v50 = vpop.f32.mrb[3].mxu0 }
 0x119   :  { %195 = vst [vmem:[%s378_s3 + $0x10] sm:$0xff] %v185_v43  ;;  %194 = vst [vmem:[%s378_s3 + $0x8] sm:$0xff] %v144_v44  ;;  %v189_v51 = vadd.f32 %v188_v49, %v94_v36  ;;  %v148_v52 = vadd.f32 %v147_v50, %v90_v37  ;;  %v190_v53 = vpop.f32.mrb[3].mxu1 }
 0x11a   :  { %196 = vst [vmem:[%s378_s3 + $0x18] sm:$0xff] %v187_v47  ;;  %197 = vst [vmem:[%s378_s3 + $0x20] sm:$0xff] %v146_v48  ;;  %v191_v54 = vadd.f32 %v190_v53, %v98_v38 }
 0x11b   :  { %199 = vst [vmem:[%s378_s3 + $0x30] sm:$0xff] %v189_v51  ;;  %198 = vst [vmem:[%s378_s3 + $0x28] sm:$0xff] %v148_v52 }
 0x11c   :  { %200 = vst [vmem:[%s378_s3 + $0x38] sm:$0xff] %v191_v54 }
 0x11d   :  { %205 = vsyncpa [#allocation3], 1 }
 0x11e   :  { %206 = vsyncpa [#allocation5], 1 }

// kernel: image_decoder_forward.6
= control target key start
LH: loop header
LB: loop body
LE: loop exit
PB: predicated region body
PF: predicated region fallthrough
CT: control target
= control target key end

     0   :  { %s785_s12 = smov 0   ;;  %s1023_s0 = inlined_call_operand.vmem [shape: f32[256,288], index: 0, kind: input, shape index: {}]   ;;  %s1024_s1 = inlined_call_operand.vmem [shape: f32[288,128], index: 1, kind: input, shape index: {}]   ;;  %s1025_s2 = inlined_call_operand.vmem [shape: f32[1,128], index: 2, kind: input, shape index: {}]   ;;  %s1026_s3 = inlined_call_operand.vmem [shape: f32[256,128], index: 3, kind: output, shape index: {}]  }
   0x1 LB: > { %s618_s13 = sadd.s32 4294967295, %s763_s12   ;;  %p622_p0 = scmp.ge.s32.totalorder %s763_s12, 1  ;;  %s763_s12 = sphi %s785_s12, %s13_s12  }
   0x2   : > { %p139_p1 = scmp.lt.s32.totalorder %s763_s12, 3 }
   0x4   : > { %p140_p2 = pnand %p622_p0, %p139_p1 }
   0x5   : > { %v266_v0 = vld [vmem:[%s1024_s1 + $0x80] sm:$0xff] (!%p140_p2)  ;;  %v267_v1 = vld [vmem:[%s1024_s1 + $0x88] sm:$0xff] (!%p140_p2)  ;;  %s623_s20 = sshll.u32 (!%p140_p2), %s618_s13, 4  ;;  %v268_v5 = vld [vmem:[%s1024_s1 + $0x90] sm:$0xff] (!%p140_p2)  ;;  %vm311_vm0 = vcmask (!%p140_p2), 261120  }
   0x6   : > { %143 = sbr.rel (%p140_p2) target bundleno = 304 (0x130), region = 32  ;;  %v250_v2 = vld [vmem:[%s1024_s1] sm:$0xff] (!%p140_p2)  ;;  %v294_v3 = vpack.c.bf16 (!%p140_p2), %v267_v1, %v266_v0  ;;  %v251_v4 = vld [vmem:[%s1024_s1 + $0x8] sm:$0xff] (!%p140_p2)  ;;  %v269_v6 = vld [vmem:[%s1024_s1 + $0x98] sm:$0xff] (!%p140_p2)  ;;  %p165_p3 = scmp.lt.s32.totalorder (!%p140_p2), %s623_s20, 31 }
   0x7   : > { %v286_v7 = vpack.c.bf16 (!%p140_p2), %v251_v4, %v250_v2  ;;  %v295_v8 = vpack.c.bf16 (!%p140_p2), %v269_v6, %v268_v5  ;;  %v252_v9 = vld [vmem:[%s1024_s1 + $0x10] sm:$0xff] (!%p140_p2)  ;;  %v253_v10 = vld [vmem:[%s1024_s1 + $0x18] sm:$0xff] (!%p140_p2)  ;;  %v270_v11 = vld [vmem:[%s1024_s1 + $0xa0] sm:$0xff] (!%p140_p2) }
   0x8   : > { %638 = vmatprep.subr.bf16.mxu0 (!%p140_p2), %v294_v3  ;;  %732 = vmatprep.subr.bf16.mxu1 (!%p140_p2), %v294_v3  ;;  %v271_v12 = vld [vmem:[%s1024_s1 + $0xa8] sm:$0xff] (!%p140_p2)  ;;  %v287_v13 = vpack.c.bf16 (!%p140_p2), %v253_v10, %v252_v9  ;;  %v254_v15 = vld [vmem:[%s1024_s1 + $0x20] sm:$0xff] (!%p140_p2)  ;;  %v272_v17 = vld [vmem:[%s1024_s1 + $0xb0] sm:$0xff] (!%p140_p2) }
   0x9   : > { %639 = vmatpush3.bf16.msra.mxu0 (!%p140_p2), %v286_v7  ;;  %740 = vmatpush3.bf16.msra.mxu1 (!%p140_p2), %v286_v7  ;;  %v296_v14 = vpack.c.bf16 (!%p140_p2), %v271_v12, %v270_v11  ;;  %v255_v16 = vld [vmem:[%s1024_s1 + $0x28] sm:$0xff] (!%p140_p2)  ;;  %v273_v18 = vld [vmem:[%s1024_s1 + $0xb8] sm:$0xff] (!%p140_p2)  ;;  %v256_v21 = vld [vmem:[%s1024_s1 + $0x30] sm:$0xff] (!%p140_p2) }
   0xa   : > { %640 = vmatprep.subr.bf16.mxu0 (!%p140_p2), %v295_v8  ;;  %733 = vmatprep.subr.bf16.mxu1 (!%p140_p2), %v295_v8  ;;  %v288_v19 = vpack.c.bf16 (!%p140_p2), %v255_v16, %v254_v15  ;;  %v297_v20 = vpack.c.bf16 (!%p140_p2), %v273_v18, %v272_v17  ;;  %v257_v22 = vld [vmem:[%s1024_s1 + $0x38] sm:$0xff] (!%p140_p2)  ;;  %v274_v23 = vld [vmem:[%s1024_s1 + $0xc0] sm:$0xff] (!%p140_p2)  ;;  %v275_v24 = vld [vmem:[%s1024_s1 + $0xc8] sm:$0xff] (!%p140_p2) }
   0xb   : > { %v289_v29 = vpack.c.bf16 (!%p140_p2), %v257_v22, %v256_v21  ;;  %v298_v32 = vpack.c.bf16 (!%p140_p2), %v275_v24, %v274_v23  ;;  %v258_v33 = vld [vmem:[%s1024_s1 + $0x40] sm:$0xff] (!%p140_p2)  ;;  %v259_v34 = vld [vmem:[%s1024_s1 + $0x48] sm:$0xff] (!%p140_p2)  ;;  %v276_v35 = vld [vmem:[%s1024_s1 + $0xd0] sm:$0xff] (!%p140_p2) }
   0xc   : > { %v277_v36 = vld [vmem:[%s1024_s1 + $0xd8] sm:$0xff] (!%p140_p2)  ;;  %v290_v37 = vpack.c.bf16 (!%p140_p2), %v259_v34, %v258_v33  ;;  %v260_v39 = vld [vmem:[%s1024_s1 + $0x50] sm:$0xff] (!%p140_p2)  ;;  %v278_v41 = vld [vmem:[%s1024_s1 + $0xe0] sm:$0xff] (!%p140_p2) }
   0xd   : > { %s1028_s20 = smov (!%p165_p3, %s623_s20), 31  ;;  %641 = vmatpush3.bf16.msra.mxu0 %v287_v13  ;;  %741 = vmatpush3.bf16.msra.mxu1 %v287_v13  ;;  %v299_v38 = vpack.c.bf16 %v277_v36, %v276_v35  ;;  %v261_v40 = vld [vmem:[%s1024_s1 + $0x58] sm:$0xff]  ;;  %v279_v42 = vld [vmem:[%s1024_s1 + $0xe8] sm:$0xff]  ;;  %v262_v45 = vld [vmem:[%s1024_s1 + $0x60] sm:$0xff] }
   0xe   : > { %s748_s13 = smul.u32 24, %s1028_s20  ;;  %642 = vmatprep.subr.bf16.mxu0 %v296_v14  ;;  %734 = vmatprep.subr.bf16.mxu1 %v296_v14  ;;  %v291_v43 = vpack.c.bf16 %v261_v40, %v260_v39  ;;  %v300_v44 = vpack.c.bf16 %v279_v42, %v278_v41  ;;  %v263_v46 = vld [vmem:[%s1024_s1 + $0x68] sm:$0xff]  ;;  %v280_v47 = vld [vmem:[%s1024_s1 + $0xf0] sm:$0xff]  ;;  %v281_v48 = vld [vmem:[%s1024_s1 + $0xf8] sm:$0xff]  ;;  %s626_s17 = sshll.u32 %s1028_s20, 3 }
   0xf   : > { %v292_v49 = vpack.c.bf16 %v263_v46, %v262_v45  ;;  %v301_v50 = vpack.c.bf16 %v281_v48, %v280_v47  ;;  %v264_v51 = vld [vmem:[%s1024_s1 + $0x70] sm:$0xff]  ;;  %v265_v52 = vld [vmem:[%s1024_s1 + $0x78] sm:$0xff]  ;;  %v282_v53 = vld [vmem:[%s1024_s1 + $0x100] sm:$0xff]  ;;  %s985_s22 = scalar_lea.vmem %s1026_s3, %s626_s17 }
  0x10   : > { %s841_s21 = scalar_lea.vmem %s1023_s0, %s748_s13  ;;  %v283_v54 = vld [vmem:[%s1024_s1 + $0x108] sm:$0xff]  ;;  %v293_v56 = vpack.c.bf16 %v265_v52, %v264_v51  ;;  %v284_v1 = vld [vmem:[%s1024_s1 + $0x110] sm:$0xff]  ;;  %v285_v2 = vld [vmem:[%s1024_s1 + $0x118] sm:$0xff] }
  0x11   : > { %v179_v25 = vld [vmem:[%s841_s21 + $0x8] sm:$0xff]  ;;  %v182_v26 = vld [vmem:[%s841_s21 + $0x20] sm:$0xff]  ;;  %643 = vmatpush3.bf16.msra.mxu0 %v288_v19  ;;  %742 = vmatpush3.bf16.msra.mxu1 %v288_v19  ;;  %v181_v57 = vld [vmem:[%s841_s21 + $0x18] sm:$0xff]  ;;  %v302_v60 = vpack.c.bf16 %v283_v54, %v282_v53  ;;  %v303_v7 = vpack.c.bf16 %v285_v2, %v284_v1 }
  0x12   : > { %v215_v27 = vld [vmem:[%s841_s21 + $0x128] sm:$0xff]  ;;  %v218_v28 = vld [vmem:[%s841_s21 + $0x140] sm:$0xff]  ;;  %v227_v30 = vpack.c.bf16 %v182_v26, %v179_v25  ;;  %644 = vmatprep.subr.bf16.mxu0 %v297_v20  ;;  %735 = vmatprep.subr.bf16.mxu1 %v297_v20  ;;  %v217_v59 = vld [vmem:[%s841_s21 + $0x138] sm:$0xff] }
  0x13   : > { %v245_v31 = vpack.c.bf16 %v218_v28, %v215_v27  ;;  %v178_v55 = vld [vmem:[%s841_s21] sm:$0xff]  ;;  %v185_v61 = vld [vmem:[%s841_s21 + $0x38] sm:$0xff]  ;;  %v188_v62 = vld [vmem:[%s841_s21 + $0x50] sm:$0xff] }
  0x14   : > { %368 = vmatprep.mubr.bf16.mxu0 %v227_v30  ;;  %v214_v58 = vld [vmem:[%s841_s21 + $0x120] sm:$0xff]  ;;  %v221_v63 = vld [vmem:[%s841_s21 + $0x158] sm:$0xff]  ;;  %v224_v0 = vld [vmem:[%s841_s21 + $0x170] sm:$0xff]  ;;  %v226_v3 = vpack.c.bf16 %v181_v57, %v178_v55  ;;  %v230_v5 = vpack.c.bf16 %v188_v62, %v185_v61 }
  0x15   : > { %416 = vmatprep.mubr.bf16.mxu1 %v245_v31  ;;  %645 = vmatpush3.bf16.msra.mxu0 %v289_v29  ;;  %v244_v4 = vpack.c.bf16 %v217_v59, %v214_v58  ;;  %v248_v6 = vpack.c.bf16 %v224_v0, %v221_v63  ;;  %v184_v8 = vld [vmem:[%s841_s21 + $0x30] sm:$0xff]  ;;  %v187_v9 = vld [vmem:[%s841_s21 + $0x48] sm:$0xff]  ;;  %v194_v13 = vld [vmem:[%s841_s21 + $0x80] sm:$0xff] }
  0x16   : > { %743 = vmatpush3.bf16.msra.mxu1 %v289_v29  ;;  %646 = vmatprep.subr.bf16.mxu0 %v298_v32  ;;  %v220_v10 = vld [vmem:[%s841_s21 + $0x150] sm:$0xff]  ;;  %v223_v11 = vld [vmem:[%s841_s21 + $0x168] sm:$0xff]  ;;  %v229_v16 = vpack.c.bf16 %v187_v9, %v184_v8  ;;  %v190_v20 = vld [vmem:[%s841_s21 + $0x60] sm:$0xff] }
  0x17   : > { %736 = vmatprep.subr.bf16.mxu1 %v298_v32  ;;  %v191_v12 = vld [vmem:[%s841_s21 + $0x68] sm:$0xff]  ;;  %v180_v14 = vld [vmem:[%s841_s21 + $0x10] sm:$0xff]  ;;  %v247_v17 = vpack.c.bf16 %v223_v11, %v220_v10  ;;  %v193_v21 = vld [vmem:[%s841_s21 + $0x78] sm:$0xff] }
  0x18   : > { %v183_v15 = vld [vmem:[%s841_s21 + $0x28] sm:$0xff]  ;;  %v233_v18 = vpack.c.bf16 %v194_v13, %v191_v12  ;;  %v186_v22 = vld [vmem:[%s841_s21 + $0x40] sm:$0xff]  ;;  %v189_v23 = vld [vmem:[%s841_s21 + $0x58] sm:$0xff]  ;;  %v232_v28 = vpack.c.bf16 %v193_v21, %v190_v20 }
  0x19   : > { %647 = vmatpush3.bf16.msra.mxu0 %v290_v37  ;;  %v228_v19 = vpack.c.bf16 %v183_v15, %v180_v14  ;;  %v197_v24 = vld [vmem:[%s841_s21 + $0x98] sm:$0xff]  ;;  %v200_v25 = vld [vmem:[%s841_s21 + $0xb0] sm:$0xff]  ;;  %v195_v27 = vld [vmem:[%s841_s21 + $0x88] sm:$0xff]  ;;  %v231_v29 = vpack.c.bf16 %v189_v23, %v186_v22 }
  0x1a   : > { %744 = vmatpush3.bf16.msra.mxu1 %v290_v37  ;;  %648 = vmatprep.subr.bf16.mxu0 %v299_v38  ;;  %v192_v26 = vld [vmem:[%s841_s21 + $0x70] sm:$0xff]  ;;  %v236_v30 = vpack.c.bf16 %v200_v25, %v197_v24  ;;  %v199_v33 = vld [vmem:[%s841_s21 + $0xa8] sm:$0xff]  ;;  %v198_v34 = vld [vmem:[%s841_s21 + $0xa0] sm:$0xff] }
  0x1b   : > { %737 = vmatprep.subr.bf16.mxu1 %v299_v38  ;;  %v234_v31 = vpack.c.bf16 %v195_v27, %v192_v26  ;;  %v196_v32 = vld [vmem:[%s841_s21 + $0x90] sm:$0xff]  ;;  %v201_v35 = vld [vmem:[%s841_s21 + $0xb8] sm:$0xff]  ;;  %v203_v36 = vld [vmem:[%s841_s21 + $0xc8] sm:$0xff] }
  0x1c   : > { %v206_v37 = vld [vmem:[%s841_s21 + $0xe0] sm:$0xff]  ;;  %v204_v38 = vld [vmem:[%s841_s21 + $0xd0] sm:$0xff]  ;;  %v207_v39 = vld [vmem:[%s841_s21 + $0xe8] sm:$0xff]  ;;  %v235_v40 = vpack.c.bf16 %v199_v33, %v196_v32  ;;  %v237_v41 = vpack.c.bf16 %v201_v35, %v198_v34 }
  0x1d   : > { %649 = vmatpush3.bf16.msra.mxu0 %v291_v43  ;;  %v239_v42 = vpack.c.bf16 %v206_v37, %v203_v36  ;;  %v205_v45 = vld [vmem:[%s841_s21 + $0xd8] sm:$0xff]  ;;  %v210_v46 = vld [vmem:[%s841_s21 + $0x100] sm:$0xff]  ;;  %v219_v51 = vld [vmem:[%s841_s21 + $0x148] sm:$0xff] }
  0x1e   : > { %745 = vmatpush3.bf16.msra.mxu1 %v291_v43  ;;  %650 = vmatprep.subr.bf16.mxu0 %v300_v44  ;;  %v240_v43 = vpack.c.bf16 %v207_v39, %v204_v38  ;;  %v213_v47 = vld [vmem:[%s841_s21 + $0x118] sm:$0xff]  ;;  %v211_v57 = vld [vmem:[%s841_s21 + $0x108] sm:$0xff]  ;;  %v222_v58 = vld [vmem:[%s841_s21 + $0x160] sm:$0xff] }
  0x1f   : > { %738 = vmatprep.subr.bf16.mxu1 %v300_v44  ;;  %v202_v44 = vld [vmem:[%s841_s21 + $0xc0] sm:$0xff]  ;;  %v209_v48 = vld [vmem:[%s841_s21 + $0xf8] sm:$0xff]  ;;  %v243_v53 = vpack.c.bf16 %v213_v47, %v210_v46 }
  0x20   : > { %v238_v52 = vpack.c.bf16 %v205_v45, %v202_v44  ;;  %v225_v59 = vld [vmem:[%s841_s21 + $0x178] sm:$0xff]  ;;  %v976_v22 = vld [vmem:[%s1025_s2] ss:$0 sm:$0xff] }
  0x21   : > { %651 = vmatpush3.bf16.msra.mxu0 %v292_v49  ;;  %v249_v61 = vpack.c.bf16 %v225_v59, %v222_v58 }
  0x22   : > { %746 = vmatpush3.bf16.msra.mxu1 %v292_v49  ;;  %652 = vmatprep.subr.bf16.mxu0 %v301_v50  ;;  %v212_v49 = vld [vmem:[%s841_s21 + $0x110] sm:$0xff] }
  0x23   : > { %739 = vmatprep.subr.bf16.mxu1 %v301_v50  ;;  %v216_v50 = vld [vmem:[%s841_s21 + $0x130] sm:$0xff]  ;;  %v242_v54 = vpack.c.bf16 %v212_v49, %v209_v48 }
  0x24   : > { %v246_v55 = vpack.c.bf16 %v219_v51, %v216_v50 }
  0x25   : > { %653 = vmatpush3.bf16.msra.mxu0 %v293_v56 }
  0x26   : > { %747 = vmatpush3.bf16.msra.mxu1 %v293_v56  ;;  %v208_v56 = vld [vmem:[%s841_s21 + $0xf0] sm:$0xff] }
  0x27   : > { %712 = vmatprep.subr.bf16.mxu1 %v302_v60 }
  0x28   : > { %369 = vmatmul.mubr.bf16.vlgmr.msra.gmra.mrb[0].mxu0 %v226_v3 }
  0x29   : > { %417 = vmatmul.mubr.bf16.vlgmr.msra.gmra.mrb[0].mxu1 %v244_v4  ;;  %376 = vmatprep.mubr.bf16.mxu0 %v230_v5 }
  0x2a   : > { %713 = vmatpush3.bf16.msra.mxu1 %v302_v60  ;;  %424 = vmatprep.mubr.bf16.mxu1 %v248_v6  ;;  %v241_v60 = vpack.c.bf16 %v211_v57, %v208_v56 }
  0x2b   : > { %714 = vmatprep.subr.bf16.mxu1 %v303_v7 }
  0x2e   : > { %715 = vmatpush3.bf16.msra.mxu1 %v303_v7 }
  0x30   : > { %377 = vmatmul.mubr.bf16.gmra.mrb[4].mxu0 %v229_v16 }
  0x31   : > { %425 = vmatmul.mubr.bf16.gmra.mrb[4].mxu1 %v247_v17  ;;  %384 = vmatprep.mubr.bf16.mxu0 %v233_v18 }
  0x32   : > { %716 = vmatprep.mubr.msk.bf16.mxu1 %vm311_vm0, %v228_v19 }
  0x38   : > { %385 = vmatmul.mubr.bf16.gmra.mrb[8].mxu0 %v232_v28 }
  0x39   : > { %717 = vmatmul.mubr.msk.bf16.vlgmr.msra.gmra.mrb[8].mxu1 %vm311_vm0, %v231_v29  ;;  %392 = vmatprep.mubr.bf16.mxu0 %v236_v30 }
  0x3a   : > { %720 = vmatprep.mubr.msk.bf16.mxu1 %vm311_vm0, %v234_v31 }
  0x40   : > { %393 = vmatmul.mubr.bf16.gmra.mrb[12].mxu0 %v235_v40 }
  0x41   : > { %721 = vmatmul.mubr.msk.bf16.gmra.mrb[12].mxu1 %vm311_vm0, %v237_v41  ;;  %400 = vmatprep.mubr.bf16.mxu0 %v239_v42 }
  0x42   : > { %724 = vmatprep.mubr.msk.bf16.mxu1 %vm311_vm0, %v240_v43 }
  0x48   : > { %401 = vmatmul.mubr.bf16.gmra.mrb[16].mxu0 %v238_v52 }
  0x49   : > { %725 = vmatmul.mubr.msk.bf16.gmra.mrb[16].mxu1 %vm311_vm0, %v243_v53  ;;  %408 = vmatprep.mubr.bf16.mxu0 %v242_v54 }
  0x4a   : > { %728 = vmatprep.mubr.msk.bf16.mxu1 %vm311_vm0, %v246_v55 }
  0x50   : > { %409 = vmatmul.mubr.bf16.gmra.mrb[20].mxu0 %v241_v60 }
  0x51   : > { %729 = vmatmul.mubr.msk.bf16.gmra.mrb[20].mxu1 %vm311_vm0, %v249_v61 }
  0xfb   : > { %v654_v62 = vpop.f32.mrb[0].mxu0 }
  0xfc   : > { %v690_v63 = vpop.f32.mrb[0].mxu1  ;;  %v655_v0 = vpop.f32.mrb[1].mxu0 }
  0xfd   : > { %v691_v1 = vpop.f32.mrb[1].mxu1  ;;  %v656_v2 = vadd.f32 %v655_v0, %v654_v62  ;;  %v657_v3 = vpop.f32.mrb[2].mxu0 }
  0xfe   : > { %v965_v4 = vadd.f32 %v691_v1, %v690_v63  ;;  %v693_v5 = vpop.f32.mrb[2].mxu1  ;;  %v658_v6 = vpop.f32.mrb[3].mxu0 }
  0xff   : > { %v694_v7 = vpop.f32.mrb[3].mxu1  ;;  %v659_v8 = vadd.f32 %v658_v6, %v657_v3  ;;  %v371_v26 = vadd.f32 %v656_v2, %v976_v22 }
 0x100   : > { %v967_v9 = vadd.f32 %v694_v7, %v693_v5 }
 0x101   : > { %v374_v35 = vadd.f32 %v659_v8, %v976_v22 }
 0x103   : > { %v660_v10 = vpop.f32.mrb[4].mxu0 }
 0x104   : > { %v696_v11 = vpop.f32.mrb[4].mxu1  ;;  %v661_v12 = vpop.f32.mrb[5].mxu0 }
 0x105   : > { %v697_v13 = vpop.f32.mrb[5].mxu1  ;;  %v662_v14 = vadd.f32 %v661_v12, %v660_v10  ;;  %v663_v15 = vpop.f32.mrb[6].mxu0 }
 0x106   : > { %v969_v16 = vadd.f32 %v697_v13, %v696_v11  ;;  %v699_v17 = vpop.f32.mrb[6].mxu1  ;;  %v664_v18 = vpop.f32.mrb[7].mxu0 }
 0x107   : > { %v700_v19 = vpop.f32.mrb[7].mxu1  ;;  %v665_v20 = vadd.f32 %v664_v18, %v663_v15  ;;  %v379_v23 = vadd.f32 %v662_v14, %v976_v22 }
 0x108   : > { %v971_v21 = vadd.f32 %v700_v19, %v699_v17  ;;  %v427_v19 = vadd.f32 %v969_v16, %v976_v22 }
 0x109   : > { %v382_v30 = vadd.f32 %v665_v20, %v976_v22 }
 0x10b   : > { %v666_v24 = vpop.f32.mrb[8].mxu0 }
 0x10c   : > { %v718_v25 = vpop.f32.mrb[8].mxu1  ;;  %v667_v28 = vpop.f32.mrb[9].mxu0 }
 0x10d   : > { %v476_v27 = vadd.f32 %v718_v25, %v379_v23  ;;  %v467_v29 = vpop.f32.mrb[9].mxu1  ;;  %v668_v31 = vadd.f32 %v667_v28, %v666_v24  ;;  %v669_v33 = vpop.f32.mrb[10].mxu0 }
 0x10e   : > { %v468_v32 = vadd.f32 %v467_v29, %v371_v26  ;;  %v719_v34 = vpop.f32.mrb[10].mxu1  ;;  %v670_v38 = vpop.f32.mrb[11].mxu0  ;;  %v419_v26 = vadd.f32 %v965_v4, %v976_v22 }
 0x10f   : > { %v532_v36 = vmax.f32 %v476_v27, 0.0  ;;  %v479_v37 = vadd.f32 %v719_v34, %v382_v30  ;;  %v470_v39 = vpop.f32.mrb[11].mxu1  ;;  %v671_v41 = vadd.f32 %v670_v38, %v669_v33  ;;  %v387_v47 = vadd.f32 %v668_v31, %v976_v22 }
 0x110   : > { %v530_v40 = vmax.f32 %v468_v32, 0.0  ;;  %v471_v42 = vadd.f32 %v470_v39, %v374_v35  ;;  %v430_v30 = vadd.f32 %v971_v21, %v976_v22  ;;  %v422_v35 = vadd.f32 %v967_v9, %v976_v22 }
 0x111   : > { %548 = vst [vmem:[%s985_s22 + $0x10] sm:$0xff] %v532_v36  ;;  %v533_v43 = vmax.f32 %v479_v37, 0.0  ;;  %v390_v54 = vadd.f32 %v671_v41, %v976_v22 }
 0x112   : > { %546 = vst [vmem:[%s985_s22] sm:$0xff] %v530_v40  ;;  %v531_v44 = vmax.f32 %v471_v42, 0.0 }
 0x113   : > { %549 = vst [vmem:[%s985_s22 + $0x18] sm:$0xff] %v533_v43  ;;  %v672_v45 = vpop.f32.mrb[12].mxu0 }
 0x114   : > { %547 = vst [vmem:[%s985_s22 + $0x8] sm:$0xff] %v531_v44  ;;  %v722_v46 = vpop.f32.mrb[12].mxu1  ;;  %v673_v48 = vpop.f32.mrb[13].mxu0 }
 0x115   : > { %v483_v49 = vpop.f32.mrb[13].mxu1  ;;  %v674_v50 = vadd.f32 %v673_v48, %v672_v45  ;;  %v675_v52 = vpop.f32.mrb[14].mxu0 }
 0x116   : > { %v484_v51 = vadd.f32 %v483_v49, %v387_v47  ;;  %v723_v53 = vpop.f32.mrb[14].mxu1  ;;  %v676_v55 = vpop.f32.mrb[15].mxu0 }
 0x117   : > { %v486_v56 = vpop.f32.mrb[15].mxu1  ;;  %v395_v57 = vadd.f32 %v674_v50, %v976_v22  ;;  %v677_v59 = vadd.f32 %v676_v55, %v675_v52 }
 0x118   : > { %v534_v58 = vmax.f32 %v484_v51, 0.0  ;;  %v487_v60 = vadd.f32 %v486_v56, %v390_v54 }
 0x119   : > { %v492_v61 = vadd.f32 %v722_v46, %v395_v57  ;;  %v398_v62 = vadd.f32 %v677_v59, %v976_v22 }
 0x11a   : > { %550 = vst [vmem:[%s985_s22 + $0x20] sm:$0xff] %v534_v58  ;;  %v535_v63 = vmax.f32 %v487_v60, 0.0 }
 0x11b   : > { %v536_v0 = vmax.f32 %v492_v61, 0.0  ;;  %v495_v1 = vadd.f32 %v723_v53, %v398_v62  ;;  %v678_v2 = vpop.f32.mrb[16].mxu0 }
 0x11c   : > { %551 = vst [vmem:[%s985_s22 + $0x28] sm:$0xff] %v535_v63  ;;  %v726_v3 = vpop.f32.mrb[16].mxu1  ;;  %v679_v5 = vpop.f32.mrb[17].mxu0 }
 0x11d   : > { %v499_v6 = vpop.f32.mrb[17].mxu1  ;;  %552 = vst [vmem:[%s985_s22 + $0x30] sm:$0xff] %v536_v0  ;;  %v537_v7 = vmax.f32 %v495_v1, 0.0  ;;  %v680_v8 = vadd.f32 %v679_v5, %v678_v2  ;;  %v681_v10 = vpop.f32.mrb[18].mxu0 }
 0x11e   : > { %v727_v11 = vpop.f32.mrb[18].mxu1  ;;  %v682_v12 = vpop.f32.mrb[19].mxu0 }
 0x11f   : > { %v502_v13 = vpop.f32.mrb[19].mxu1  ;;  %553 = vst [vmem:[%s985_s22 + $0x38] sm:$0xff] %v537_v7  ;;  %v403_v14 = vadd.f32 %v680_v8, %v976_v22  ;;  %v683_v15 = vadd.f32 %v682_v12, %v681_v10 }
 0x121   : > { %v500_v17 = vadd.f32 %v499_v6, %v403_v14  ;;  %v406_v18 = vadd.f32 %v683_v15, %v976_v22 }
 0x123   : > { %v538_v20 = vmax.f32 %v500_v17, 0.0  ;;  %v503_v23 = vadd.f32 %v502_v13, %v406_v18  ;;  %v684_v24 = vpop.f32.mrb[20].mxu0 }
 0x124   : > { %v730_v25 = vpop.f32.mrb[20].mxu1  ;;  %v685_v28 = vpop.f32.mrb[21].mxu0 }
 0x125   : > { %v524_v27 = vadd.f32 %v730_v25, %v427_v19  ;;  %v515_v29 = vpop.f32.mrb[21].mxu1  ;;  %554 = vst [vmem:[%s985_s22 + $0x40] sm:$0xff] %v538_v20  ;;  %v539_v31 = vmax.f32 %v503_v23, 0.0  ;;  %v686_v32 = vadd.f32 %v685_v28, %v684_v24  ;;  %v687_v16 = vpop.f32.mrb[22].mxu0 }
 0x126   : > { %v516_v33 = vadd.f32 %v515_v29, %v419_v26  ;;  %v731_v34 = vpop.f32.mrb[22].mxu1  ;;  %v688_v37 = vpop.f32.mrb[23].mxu0 }
 0x127   : > { %v544_v4 = vmax.f32 %v524_v27, 0.0  ;;  %v527_v36 = vadd.f32 %v731_v34, %v430_v30  ;;  %v518_v38 = vpop.f32.mrb[23].mxu1  ;;  %555 = vst [vmem:[%s985_s22 + $0x48] sm:$0xff] %v539_v31  ;;  %v411_v21 = vadd.f32 %v686_v32, %v976_v22  ;;  %v689_v40 = vadd.f32 %v688_v37, %v687_v16 }
 0x128   : > { %v542_v39 = vmax.f32 %v516_v33, 0.0  ;;  %v519_v41 = vadd.f32 %v518_v38, %v422_v35 }
 0x129   : > { %560 = vst [vmem:[%s985_s22 + $0x70] sm:$0xff] %v544_v4  ;;  %v545_v42 = vmax.f32 %v527_v36, 0.0  ;;  %v508_v43 = vadd.f32 %v726_v3, %v411_v21  ;;  %v414_v9 = vadd.f32 %v689_v40, %v976_v22 }
 0x12a   : > { %558 = vst [vmem:[%s985_s22 + $0x60] sm:$0xff] %v542_v39  ;;  %v543_v44 = vmax.f32 %v519_v41, 0.0 }
 0x12b   : > { %561 = vst [vmem:[%s985_s22 + $0x78] sm:$0xff] %v545_v42  ;;  %v540_v45 = vmax.f32 %v508_v43, 0.0  ;;  %v511_v46 = vadd.f32 %v727_v11, %v414_v9 }
 0x12c   : > { %559 = vst [vmem:[%s985_s22 + $0x68] sm:$0xff] %v543_v44 }
 0x12d   : > { %556 = vst [vmem:[%s985_s22 + $0x50] sm:$0xff] %v540_v45  ;;  %v541_v47 = vmax.f32 %v511_v46, 0.0 }
 0x12f   : > { %557 = vst [vmem:[%s985_s22 + $0x58] sm:$0xff] %v541_v47 }
 0x130 PF: > { %s13_s12 = sadd.s32 1, %s763_s12  }
 0x131   : > { %p10_p4 = scmp.ge.s32.totalorder %s13_s12, 4  }
 0x133   :  { %12 = sbr.rel (!%p10_p4) target bundleno = 1 (0x1), region = 62 }

// kernel: image_decoder_forward.7
= control target key start
LH: loop header
LB: loop body
LE: loop exit
PB: predicated region body
PF: predicated region fallthrough
CT: control target
= control target key end

     0   :  { %s1603_s12 = smov 0   ;;  %s2251_s0 = inlined_call_operand.vmem [shape: f32[1024,288], index: 0, kind: input, shape index: {}]   ;;  %s2252_s1 = inlined_call_operand.vmem [shape: f32[288,128], index: 1, kind: input, shape index: {}]   ;;  %s2253_s2 = inlined_call_operand.vmem [shape: f32[1,128], index: 2, kind: input, shape index: {}]   ;;  %s2254_s3 = inlined_call_operand.vmem [shape: f32[1024,128], index: 3, kind: output, shape index: {}]  }
   0x1 LB: > { %s1386_s13 = sadd.s32 4294967295, %s1580_s12   ;;  %p1390_p0 = scmp.ge.s32.totalorder %s1580_s12, 1  ;;  %s1580_s12 = sphi %s1603_s12, %s13_s12  }
   0x2   : > { %p139_p1 = scmp.lt.s32.totalorder %s1580_s12, 3 }
   0x4   : > { %p140_p2 = pnand %p1390_p0, %p139_p1 }
   0x5   : > { %v466_v0 = vld [vmem:[%s2252_s1] sm:$0xff] (!%p140_p2)  ;;  %v467_v1 = vld [vmem:[%s2252_s1 + $0x8] sm:$0xff] (!%p140_p2)  ;;  %v468_v2 = vld [vmem:[%s2252_s1 + $0x10] sm:$0xff] (!%p140_p2)  ;;  %s1391_s20 = sshll.u32 (!%p140_p2), %s1386_s13, 6  ;;  %v1582_v3 = vmov (!%p140_p2), 0   ;;  %vm527_vm0 = vcmask (!%p140_p2), 261120  }
   0x6   : > { %143 = sbr.rel (%p140_p2) target bundleno = 476 (0x1dc), region = 32  ;;  %624 = vmatprep.subr.bf16.mxu0 (!%p140_p2), %v1582_v3  ;;  %1532 = vmatprep.subr.bf16.mxu1 (!%p140_p2), %v1582_v3  ;;  %v502_v4 = vpack.c.bf16 (!%p140_p2), %v467_v1, %v466_v0  ;;  %v469_v5 = vld [vmem:[%s2252_s1 + $0x18] sm:$0xff] (!%p140_p2)  ;;  %p165_p3 = scmp.lt.s32.totalorder (!%p140_p2), %s1391_s20, 127  ;;  %v470_v7 = vld [vmem:[%s2252_s1 + $0x20] sm:$0xff] (!%p140_p2)  ;;  %v471_v8 = vld [vmem:[%s2252_s1 + $0x28] sm:$0xff] (!%p140_p2) }
   0x7   : > { %v503_v6 = vpack.c.bf16 (!%p140_p2), %v469_v5, %v468_v2  ;;  %v504_v9 = vpack.c.bf16 (!%p140_p2), %v471_v8, %v470_v7  ;;  %v472_v10 = vld [vmem:[%s2252_s1 + $0x30] sm:$0xff] (!%p140_p2)  ;;  %v473_v11 = vld [vmem:[%s2252_s1 + $0x38] sm:$0xff] (!%p140_p2)  ;;  %v474_v17 = vld [vmem:[%s2252_s1 + $0x40] sm:$0xff] (!%p140_p2) }
   0x8   : > { %625 = vmatpush1.bf16.msra.mxu0 (!%p140_p2), %v502_v4  ;;  %1548 = vmatpush1.bf16.msra.mxu1 (!%p140_p2), %v502_v4  ;;  %v505_v13 = vpack.c.bf16 (!%p140_p2), %v473_v11, %v472_v10  ;;  %v475_v18 = vld [vmem:[%s2252_s1 + $0x48] sm:$0xff] (!%p140_p2)  ;;  %v476_v22 = vld [vmem:[%s2252_s1 + $0x50] sm:$0xff] (!%p140_p2)  ;;  %v477_v23 = vld [vmem:[%s2252_s1 + $0x58] sm:$0xff] (!%p140_p2) }
   0x9   : > { %626 = vmatprep.subr.bf16.mxu0 (!%p140_p2), %v1582_v3  ;;  %1533 = vmatprep.subr.bf16.mxu1 (!%p140_p2), %v1582_v3  ;;  %v506_v21 = vpack.c.bf16 (!%p140_p2), %v475_v18, %v474_v17  ;;  %v507_v24 = vpack.c.bf16 (!%p140_p2), %v477_v23, %v476_v22  ;;  %v478_v25 = vld [vmem:[%s2252_s1 + $0x60] sm:$0xff] (!%p140_p2)  ;;  %v479_v26 = vld [vmem:[%s2252_s1 + $0x68] sm:$0xff] (!%p140_p2)  ;;  %v480_v28 = vld [vmem:[%s2252_s1 + $0x70] sm:$0xff] (!%p140_p2) }
   0xa   : > { %v508_v27 = vpack.c.bf16 (!%p140_p2), %v479_v26, %v478_v25  ;;  %v481_v29 = vld [vmem:[%s2252_s1 + $0x78] sm:$0xff] (!%p140_p2)  ;;  %v482_v31 = vld [vmem:[%s2252_s1 + $0x80] sm:$0xff] (!%p140_p2)  ;;  %v483_v32 = vld [vmem:[%s2252_s1 + $0x88] sm:$0xff] (!%p140_p2) }
   0xb   : > { %v509_v30 = vpack.c.bf16 (!%p140_p2), %v481_v29, %v480_v28  ;;  %v510_v33 = vpack.c.bf16 (!%p140_p2), %v483_v32, %v482_v31  ;;  %v484_v34 = vld [vmem:[%s2252_s1 + $0x90] sm:$0xff] (!%p140_p2)  ;;  %v485_v35 = vld [vmem:[%s2252_s1 + $0x98] sm:$0xff] (!%p140_p2)  ;;  %v486_v37 = vld [vmem:[%s2252_s1 + $0xa0] sm:$0xff] (!%p140_p2) }
   0xc   : > { %627 = vmatpush1.bf16.msra.mxu0 (!%p140_p2), %v503_v6  ;;  %1549 = vmatpush1.bf16.msra.mxu1 (!%p140_p2), %v503_v6  ;;  %v511_v36 = vpack.c.bf16 (!%p140_p2), %v485_v35, %v484_v34  ;;  %v487_v38 = vld [vmem:[%s2252_s1 + $0xa8] sm:$0xff] (!%p140_p2)  ;;  %v488_v40 = vld [vmem:[%s2252_s1 + $0xb0] sm:$0xff] (!%p140_p2)  ;;  %v489_v41 = vld [vmem:[%s2252_s1 + $0xb8] sm:$0xff] (!%p140_p2) }
   0xd   : > { %s2256_s20 = smov (!%p165_p3, %s1391_s20), 127  ;;  %628 = vmatprep.subr.bf16.mxu0 %v1582_v3  ;;  %1534 = vmatprep.subr.bf16.mxu1 %v1582_v3  ;;  %v512_v39 = vpack.c.bf16 %v487_v38, %v486_v37  ;;  %v513_v42 = vpack.c.bf16 %v489_v41, %v488_v40  ;;  %v490_v43 = vld [vmem:[%s2252_s1 + $0xc0] sm:$0xff]  ;;  %v491_v44 = vld [vmem:[%s2252_s1 + $0xc8] sm:$0xff]  ;;  %v492_v46 = vld [vmem:[%s2252_s1 + $0xd0] sm:$0xff] }
   0xe   : > { %s1564_s27 = smul.u32 24, %s2256_s20  ;;  %v514_v45 = vpack.c.bf16 %v491_v44, %v490_v43  ;;  %v493_v47 = vld [vmem:[%s2252_s1 + $0xd8] sm:$0xff]  ;;  %v494_v49 = vld [vmem:[%s2252_s1 + $0xe0] sm:$0xff]  ;;  %v495_v50 = vld [vmem:[%s2252_s1 + $0xe8] sm:$0xff]  ;;  %s1394_s18 = sshll.u32 %s2256_s20, 3 }
   0xf   : > { %v515_v48 = vpack.c.bf16 %v493_v47, %v492_v46  ;;  %v516_v51 = vpack.c.bf16 %v495_v50, %v494_v49  ;;  %v496_v52 = vld [vmem:[%s2252_s1 + $0xf0] sm:$0xff]  ;;  %v497_v53 = vld [vmem:[%s2252_s1 + $0xf8] sm:$0xff]  ;;  %v498_v54 = vld [vmem:[%s2252_s1 + $0x100] sm:$0xff]  ;;  %s2060_s22 = scalar_lea.vmem %s2254_s3, %s1394_s18 }
  0x10   : > { %s1639_s30 = scalar_lea.vmem %s2251_s0, %s1564_s27  ;;  %629 = vmatpush1.bf16.msra.mxu0 %v504_v9  ;;  %1550 = vmatpush1.bf16.msra.mxu1 %v504_v9  ;;  %v499_v55 = vld [vmem:[%s2252_s1 + $0x108] sm:$0xff]  ;;  %v517_v57 = vpack.c.bf16 %v497_v53, %v496_v52  ;;  %v500_v2 = vld [vmem:[%s2252_s1 + $0x110] sm:$0xff]  ;;  %v501_v4 = vld [vmem:[%s2252_s1 + $0x118] sm:$0xff] }
  0x11   : > { %v179_v12 = vld [vmem:[%s1639_s30 + $0x8] sm:$0xff]  ;;  %v182_v14 = vld [vmem:[%s1639_s30 + $0x20] sm:$0xff]  ;;  %630 = vmatprep.subr.bf16.mxu0 %v1582_v3  ;;  %1535 = vmatprep.subr.bf16.mxu1 %v1582_v3  ;;  %v181_v58 = vld [vmem:[%s1639_s30 + $0x18] sm:$0xff]  ;;  %v518_v61 = vpack.c.bf16 %v499_v55, %v498_v54  ;;  %v519_v8 = vpack.c.bf16 %v501_v4, %v500_v2 }
  0x12   : > { %v323_v15 = vld [vmem:[%s1639_s30 + $0x488] sm:$0xff]  ;;  %v326_v16 = vld [vmem:[%s1639_s30 + $0x4a0] sm:$0xff]  ;;  %v371_v19 = vpack.c.bf16 %v182_v14, %v179_v12  ;;  %v325_v60 = vld [vmem:[%s1639_s30 + $0x498] sm:$0xff] }
  0x13   : > { %v443_v20 = vpack.c.bf16 %v326_v16, %v323_v15  ;;  %v178_v56 = vld [vmem:[%s1639_s30] sm:$0xff]  ;;  %v185_v62 = vld [vmem:[%s1639_s30 + $0x38] sm:$0xff]  ;;  %v188_v63 = vld [vmem:[%s1639_s30 + $0x50] sm:$0xff] }
  0x14   : > { %656 = vmatprep.mubr.bf16.mxu0 %v371_v19  ;;  %631 = vmatpush1.bf16.msra.mxu0 %v505_v13  ;;  %v322_v59 = vld [vmem:[%s1639_s30 + $0x480] sm:$0xff]  ;;  %v329_v0 = vld [vmem:[%s1639_s30 + $0x4b8] sm:$0xff]  ;;  %v332_v1 = vld [vmem:[%s1639_s30 + $0x4d0] sm:$0xff]  ;;  %v370_v5 = vpack.c.bf16 %v181_v58, %v178_v56  ;;  %v374_v6 = vpack.c.bf16 %v188_v63, %v185_v62 }
  0x15   : > { %848 = vmatprep.mubr.bf16.mxu1 %v443_v20  ;;  %1551 = vmatpush1.bf16.msra.mxu1 %v505_v13  ;;  %v446_v7 = vpack.c.bf16 %v332_v1, %v329_v0  ;;  %v184_v9 = vld [vmem:[%s1639_s30 + $0x30] sm:$0xff]  ;;  %v187_v10 = vld [vmem:[%s1639_s30 + $0x48] sm:$0xff]  ;;  %v194_v14 = vld [vmem:[%s1639_s30 + $0x80] sm:$0xff] }
  0x16   : > { %632 = vmatprep.subr.bf16.mxu0 %v1582_v3  ;;  %1536 = vmatprep.subr.bf16.mxu1 %v1582_v3  ;;  %v328_v11 = vld [vmem:[%s1639_s30 + $0x4b0] sm:$0xff]  ;;  %v331_v12 = vld [vmem:[%s1639_s30 + $0x4c8] sm:$0xff]  ;;  %v338_v16 = vld [vmem:[%s1639_s30 + $0x500] sm:$0xff]  ;;  %v373_v17 = vpack.c.bf16 %v187_v10, %v184_v9 }
  0x17   : > { %v191_v13 = vld [vmem:[%s1639_s30 + $0x68] sm:$0xff]  ;;  %v445_v18 = vpack.c.bf16 %v331_v12, %v328_v11  ;;  %v193_v22 = vld [vmem:[%s1639_s30 + $0x78] sm:$0xff]  ;;  %v334_v23 = vld [vmem:[%s1639_s30 + $0x4e0] sm:$0xff] }
  0x18   : > { %633 = vmatpush1.bf16.msra.mxu0 %v506_v21  ;;  %v335_v15 = vld [vmem:[%s1639_s30 + $0x4e8] sm:$0xff]  ;;  %v377_v19 = vpack.c.bf16 %v194_v14, %v191_v13  ;;  %v197_v25 = vld [vmem:[%s1639_s30 + $0x98] sm:$0xff]  ;;  %v200_v26 = vld [vmem:[%s1639_s30 + $0xb0] sm:$0xff] }
  0x19   : > { %1552 = vmatpush1.bf16.msra.mxu1 %v506_v21  ;;  %634 = vmatprep.subr.bf16.mxu0 %v1582_v3  ;;  %v449_v20 = vpack.c.bf16 %v338_v16, %v335_v15  ;;  %v190_v21 = vld [vmem:[%s1639_s30 + $0x60] sm:$0xff]  ;;  %v344_v28 = vld [vmem:[%s1639_s30 + $0x530] sm:$0xff]  ;;  %v380_v31 = vpack.c.bf16 %v200_v26, %v197_v25  ;;  %v199_v34 = vld [vmem:[%s1639_s30 + $0xa8] sm:$0xff] }
  0x1a   : > { %1537 = vmatprep.subr.bf16.mxu1 %v1582_v3  ;;  %v376_v29 = vpack.c.bf16 %v193_v22, %v190_v21  ;;  %v340_v35 = vld [vmem:[%s1639_s30 + $0x510] sm:$0xff]  ;;  %v203_v37 = vld [vmem:[%s1639_s30 + $0xc8] sm:$0xff]  ;;  %v206_v38 = vld [vmem:[%s1639_s30 + $0xe0] sm:$0xff] }
  0x1b   : > { %v350_v40 = vld [vmem:[%s1639_s30 + $0x560] sm:$0xff]  ;;  %v383_v43 = vpack.c.bf16 %v206_v38, %v203_v37  ;;  %v205_v46 = vld [vmem:[%s1639_s30 + $0xd8] sm:$0xff]  ;;  %v212_v50 = vld [vmem:[%s1639_s30 + $0x110] sm:$0xff] }
  0x1c   : > { %635 = vmatpush1.bf16.msra.mxu0 %v507_v24  ;;  %v346_v47 = vld [vmem:[%s1639_s30 + $0x540] sm:$0xff]  ;;  %v209_v49 = vld [vmem:[%s1639_s30 + $0xf8] sm:$0xff]  ;;  %v356_v52 = vld [vmem:[%s1639_s30 + $0x590] sm:$0xff] }
  0x1d   : > { %1553 = vmatpush1.bf16.msra.mxu1 %v507_v24  ;;  %636 = vmatprep.subr.bf16.mxu0 %v1582_v3  ;;  %v337_v24 = vld [vmem:[%s1639_s30 + $0x4f8] sm:$0xff]  ;;  %v386_v55 = vpack.c.bf16 %v212_v50, %v209_v49  ;;  %v211_v58 = vld [vmem:[%s1639_s30 + $0x108] sm:$0xff]  ;;  %v218_v62 = vld [vmem:[%s1639_s30 + $0x140] sm:$0xff] }
  0x1e   : > { %1538 = vmatprep.subr.bf16.mxu1 %v1582_v3  ;;  %v359_v63 = vld [vmem:[%s1639_s30 + $0x5a8] sm:$0xff]  ;;  %v362_v0 = vld [vmem:[%s1639_s30 + $0x5c0] sm:$0xff]  ;;  %v221_v9 = vld [vmem:[%s1639_s30 + $0x158] sm:$0xff] }
  0x1f   : > { %v224_v10 = vld [vmem:[%s1639_s30 + $0x170] sm:$0xff]  ;;  %v365_v11 = vld [vmem:[%s1639_s30 + $0x5d8] sm:$0xff]  ;;  %v227_v21 = vld [vmem:[%s1639_s30 + $0x188] sm:$0xff] }
  0x20   : > { %637 = vmatpush1.bf16.msra.mxu0 %v508_v27  ;;  %v368_v12 = vld [vmem:[%s1639_s30 + $0x5f0] sm:$0xff]  ;;  %v392_v15 = vpack.c.bf16 %v224_v10, %v221_v9  ;;  %v230_v22 = vld [vmem:[%s1639_s30 + $0x1a0] sm:$0xff] }
  0x21   : > { %1554 = vmatpush1.bf16.msra.mxu1 %v508_v27  ;;  %638 = vmatprep.subr.bf16.mxu0 %v1582_v3  ;;  %v341_v27 = vld [vmem:[%s1639_s30 + $0x518] sm:$0xff]  ;;  %v464_v16 = vpack.c.bf16 %v368_v12, %v365_v11 }
  0x22   : > { %1539 = vmatprep.subr.bf16.mxu1 %v1582_v3  ;;  %v452_v32 = vpack.c.bf16 %v344_v28, %v341_v27  ;;  %v395_v27 = vpack.c.bf16 %v230_v22, %v227_v21 }
  0x24   : > { %639 = vmatpush1.bf16.msra.mxu0 %v509_v30 }
  0x25   : > { %1555 = vmatpush1.bf16.msra.mxu1 %v509_v30  ;;  %640 = vmatprep.subr.bf16.mxu0 %v1582_v3  ;;  %v448_v30 = vpack.c.bf16 %v337_v24, %v334_v23  ;;  %v180_v23 = vld [vmem:[%s1639_s30 + $0x10] sm:$0xff]  ;;  %v183_v24 = vld [vmem:[%s1639_s30 + $0x28] sm:$0xff] }
  0x26   : > { %1540 = vmatprep.subr.bf16.mxu1 %v1582_v3  ;;  %v372_v28 = vpack.c.bf16 %v183_v24, %v180_v23 }
  0x28   : > { %641 = vmatpush1.bf16.msra.mxu0 %v510_v33 }
  0x29   : > { %1556 = vmatpush1.bf16.msra.mxu1 %v510_v33  ;;  %642 = vmatprep.subr.bf16.mxu0 %v1582_v3  ;;  %v196_v33 = vld [vmem:[%s1639_s30 + $0x90] sm:$0xff] }
  0x2a   : > { %1541 = vmatprep.subr.bf16.mxu1 %v1582_v3  ;;  %v379_v41 = vpack.c.bf16 %v199_v34, %v196_v33  ;;  %v233_v33 = vld [vmem:[%s1639_s30 + $0x1b8] sm:$0xff]  ;;  %v236_v34 = vld [vmem:[%s1639_s30 + $0x1d0] sm:$0xff] }
  0x2c   : > { %643 = vmatpush1.bf16.msra.mxu0 %v511_v36 }
  0x2d   : > { %1557 = vmatpush1.bf16.msra.mxu1 %v511_v36  ;;  %644 = vmatprep.subr.bf16.mxu0 %v1582_v3  ;;  %v343_v36 = vld [vmem:[%s1639_s30 + $0x528] sm:$0xff] }
  0x2e   : > { %1542 = vmatprep.subr.bf16.mxu1 %v1582_v3 }
  0x30   : > { %645 = vmatpush1.bf16.msra.mxu0 %v512_v39 }
  0x31   : > { %1558 = vmatpush1.bf16.msra.mxu1 %v512_v39  ;;  %646 = vmatprep.subr.bf16.mxu0 %v1582_v3  ;;  %v347_v39 = vld [vmem:[%s1639_s30 + $0x548] sm:$0xff] }
  0x32   : > { %1543 = vmatprep.subr.bf16.mxu1 %v1582_v3  ;;  %v455_v44 = vpack.c.bf16 %v350_v40, %v347_v39  ;;  %v398_v39 = vpack.c.bf16 %v236_v34, %v233_v33 }
  0x34   : > { %647 = vmatpush1.bf16.msra.mxu0 %v513_v42 }
  0x35   : > { %1559 = vmatpush1.bf16.msra.mxu1 %v513_v42  ;;  %648 = vmatprep.subr.bf16.mxu0 %v1582_v3  ;;  %v451_v42 = vpack.c.bf16 %v343_v36, %v340_v35  ;;  %v192_v35 = vld [vmem:[%s1639_s30 + $0x70] sm:$0xff]  ;;  %v195_v36 = vld [vmem:[%s1639_s30 + $0x88] sm:$0xff] }
  0x36   : > { %1544 = vmatprep.subr.bf16.mxu1 %v1582_v3  ;;  %v378_v40 = vpack.c.bf16 %v195_v36, %v192_v35 }
  0x38   : > { %649 = vmatpush1.bf16.msra.mxu0 %v514_v45 }
  0x39   : > { %1560 = vmatpush1.bf16.msra.mxu1 %v514_v45  ;;  %650 = vmatprep.subr.bf16.mxu0 %v1582_v3  ;;  %v202_v45 = vld [vmem:[%s1639_s30 + $0xc0] sm:$0xff] }
  0x3a   : > { %1545 = vmatprep.subr.bf16.mxu1 %v1582_v3  ;;  %v382_v53 = vpack.c.bf16 %v205_v46, %v202_v45  ;;  %v239_v45 = vld [vmem:[%s1639_s30 + $0x1e8] sm:$0xff]  ;;  %v242_v46 = vld [vmem:[%s1639_s30 + $0x200] sm:$0xff] }
  0x3c   : > { %651 = vmatpush1.bf16.msra.mxu0 %v515_v48 }
  0x3d   : > { %1561 = vmatpush1.bf16.msra.mxu1 %v515_v48  ;;  %652 = vmatprep.subr.bf16.mxu0 %v1582_v3  ;;  %v349_v48 = vld [vmem:[%s1639_s30 + $0x558] sm:$0xff] }
  0x3e   : > { %1546 = vmatprep.subr.bf16.mxu1 %v1582_v3  ;;  %v454_v54 = vpack.c.bf16 %v349_v48, %v346_v47  ;;  %v204_v47 = vld [vmem:[%s1639_s30 + $0xd0] sm:$0xff]  ;;  %v207_v48 = vld [vmem:[%s1639_s30 + $0xe8] sm:$0xff] }
  0x40   : > { %653 = vmatpush1.bf16.msra.mxu0 %v516_v51 }
  0x41   : > { %1562 = vmatpush1.bf16.msra.mxu1 %v516_v51  ;;  %654 = vmatprep.subr.bf16.mxu0 %v1582_v3  ;;  %v353_v51 = vld [vmem:[%s1639_s30 + $0x578] sm:$0xff] }
  0x42   : > { %1547 = vmatprep.subr.bf16.mxu1 %v1582_v3  ;;  %v442_v3 = vpack.c.bf16 %v325_v60, %v322_v59  ;;  %v458_v56 = vpack.c.bf16 %v356_v52, %v353_v51  ;;  %v352_v59 = vld [vmem:[%s1639_s30 + $0x570] sm:$0xff]  ;;  %v355_v60 = vld [vmem:[%s1639_s30 + $0x588] sm:$0xff]  ;;  %v401_v51 = vpack.c.bf16 %v242_v46, %v239_v45  ;;  %v384_v52 = vpack.c.bf16 %v207_v48, %v204_v47 }
  0x43   : > { %v457_v2 = vpack.c.bf16 %v355_v60, %v352_v59  ;;  %v216_v59 = vld [vmem:[%s1639_s30 + $0x130] sm:$0xff]  ;;  %v219_v60 = vld [vmem:[%s1639_s30 + $0x148] sm:$0xff] }
  0x44   : > { %655 = vmatpush1.bf16.msra.mxu0 %v517_v57 }
  0x45   : > { %1563 = vmatpush1.bf16.msra.mxu1 %v517_v57  ;;  %v208_v57 = vld [vmem:[%s1639_s30 + $0xf0] sm:$0xff] }
  0x46   : > { %1464 = vmatprep.subr.bf16.mxu1 %v518_v61  ;;  %v385_v1 = vpack.c.bf16 %v211_v58, %v208_v57  ;;  %v245_v57 = vld [vmem:[%s1639_s30 + $0x218] sm:$0xff]  ;;  %v248_v58 = vld [vmem:[%s1639_s30 + $0x230] sm:$0xff] }
  0x47   : > { %657 = vmatmul.mubr.bf16.vlgmr.msra.gmra.mrb[0].mxu0 %v370_v5  ;;  %v461_v5 = vpack.c.bf16 %v362_v0, %v359_v63  ;;  %v404_v63 = vpack.c.bf16 %v248_v58, %v245_v57  ;;  %v390_v0 = vpack.c.bf16 %v219_v60, %v216_v59 }
  0x48   : > { %849 = vmatmul.mubr.bf16.vlgmr.msra.gmra.mrb[0].mxu1 %v442_v3  ;;  %664 = vmatprep.mubr.bf16.mxu0 %v374_v6  ;;  %v214_v3 = vld [vmem:[%s1639_s30 + $0x120] sm:$0xff]  ;;  %v217_v6 = vld [vmem:[%s1639_s30 + $0x138] sm:$0xff] }
  0x49   : > { %1465 = vmatpush3.bf16.msra.mxu1 %v518_v61  ;;  %856 = vmatprep.mubr.bf16.mxu1 %v446_v7  ;;  %v215_v61 = vld [vmem:[%s1639_s30 + $0x128] sm:$0xff]  ;;  %v358_v7 = vld [vmem:[%s1639_s30 + $0x5a0] sm:$0xff]  ;;  %v388_v13 = vpack.c.bf16 %v217_v6, %v214_v3 }
  0x4a   : > { %1466 = vmatprep.subr.bf16.mxu1 %v519_v8  ;;  %v389_v4 = vpack.c.bf16 %v218_v62, %v215_v61  ;;  %v251_v3 = vld [vmem:[%s1639_s30 + $0x248] sm:$0xff]  ;;  %v254_v6 = vld [vmem:[%s1639_s30 + $0x260] sm:$0xff] }
  0x4b   : > { %v407_v11 = vpack.c.bf16 %v254_v6, %v251_v3 }
  0x4d   : > { %1467 = vmatpush3.bf16.msra.mxu1 %v519_v8  ;;  %v361_v8 = vld [vmem:[%s1639_s30 + $0x5b8] sm:$0xff] }
  0x4e   : > { %v460_v14 = vpack.c.bf16 %v361_v8, %v358_v7  ;;  %v228_v7 = vld [vmem:[%s1639_s30 + $0x190] sm:$0xff]  ;;  %v231_v8 = vld [vmem:[%s1639_s30 + $0x1a8] sm:$0xff] }
  0x4f   : > { %665 = vmatmul.mubr.bf16.gmra.mrb[4].mxu0 %v373_v17  ;;  %v220_v17 = vld [vmem:[%s1639_s30 + $0x150] sm:$0xff]  ;;  %v396_v12 = vpack.c.bf16 %v231_v8, %v228_v7 }
  0x50   : > { %857 = vmatmul.mubr.bf16.gmra.mrb[4].mxu1 %v445_v18  ;;  %672 = vmatprep.mubr.bf16.mxu0 %v377_v19  ;;  %v223_v18 = vld [vmem:[%s1639_s30 + $0x168] sm:$0xff]  ;;  %v364_v19 = vld [vmem:[%s1639_s30 + $0x5d0] sm:$0xff] }
  0x51   : > { %864 = vmatprep.mubr.bf16.mxu1 %v449_v20  ;;  %v367_v20 = vld [vmem:[%s1639_s30 + $0x5e8] sm:$0xff]  ;;  %v391_v25 = vpack.c.bf16 %v223_v18, %v220_v17  ;;  %v257_v17 = vld [vmem:[%s1639_s30 + $0x278] sm:$0xff]  ;;  %v260_v18 = vld [vmem:[%s1639_s30 + $0x290] sm:$0xff] }
  0x52   : > { %v463_v26 = vpack.c.bf16 %v367_v20, %v364_v19  ;;  %v240_v19 = vld [vmem:[%s1639_s30 + $0x1f0] sm:$0xff]  ;;  %v243_v20 = vld [vmem:[%s1639_s30 + $0x208] sm:$0xff]  ;;  %v410_v23 = vpack.c.bf16 %v260_v18, %v257_v17 }
  0x53   : > { %v402_v24 = vpack.c.bf16 %v243_v20, %v240_v19 }
  0x57   : > { %673 = vmatmul.mubr.bf16.gmra.mrb[8].mxu0 %v376_v29  ;;  %v226_v29 = vld [vmem:[%s1639_s30 + $0x180] sm:$0xff] }
  0x58   : > { %865 = vmatmul.mubr.bf16.gmra.mrb[8].mxu1 %v448_v30  ;;  %680 = vmatprep.mubr.bf16.mxu0 %v380_v31  ;;  %v229_v30 = vld [vmem:[%s1639_s30 + $0x198] sm:$0xff]  ;;  %v186_v31 = vld [vmem:[%s1639_s30 + $0x40] sm:$0xff] }
  0x59   : > { %872 = vmatprep.mubr.bf16.mxu1 %v452_v32  ;;  %v189_v32 = vld [vmem:[%s1639_s30 + $0x58] sm:$0xff]  ;;  %v394_v37 = vpack.c.bf16 %v229_v30, %v226_v29  ;;  %v263_v29 = vld [vmem:[%s1639_s30 + $0x2a8] sm:$0xff]  ;;  %v266_v30 = vld [vmem:[%s1639_s30 + $0x2c0] sm:$0xff] }
  0x5a   : > { %v375_v38 = vpack.c.bf16 %v189_v32, %v186_v31  ;;  %v252_v31 = vld [vmem:[%s1639_s30 + $0x250] sm:$0xff]  ;;  %v255_v32 = vld [vmem:[%s1639_s30 + $0x268] sm:$0xff]  ;;  %v413_v35 = vpack.c.bf16 %v266_v30, %v263_v29 }
  0x5b   : > { %v408_v36 = vpack.c.bf16 %v255_v32, %v252_v31 }
  0x5f   : > { %681 = vmatmul.mubr.bf16.gmra.mrb[12].mxu0 %v379_v41  ;;  %v232_v41 = vld [vmem:[%s1639_s30 + $0x1b0] sm:$0xff] }
  0x60   : > { %873 = vmatmul.mubr.bf16.gmra.mrb[12].mxu1 %v451_v42  ;;  %688 = vmatprep.mubr.bf16.mxu0 %v383_v43  ;;  %v235_v42 = vld [vmem:[%s1639_s30 + $0x1c8] sm:$0xff]  ;;  %v198_v43 = vld [vmem:[%s1639_s30 + $0xa0] sm:$0xff] }
  0x61   : > { %880 = vmatprep.mubr.bf16.mxu1 %v455_v44  ;;  %v201_v44 = vld [vmem:[%s1639_s30 + $0xb8] sm:$0xff]  ;;  %v397_v49 = vpack.c.bf16 %v235_v42, %v232_v41  ;;  %v272_v42 = vld [vmem:[%s1639_s30 + $0x2f0] sm:$0xff] }
  0x62   : > { %v381_v50 = vpack.c.bf16 %v201_v44, %v198_v43  ;;  %v269_v41 = vld [vmem:[%s1639_s30 + $0x2d8] sm:$0xff]  ;;  %v264_v43 = vld [vmem:[%s1639_s30 + $0x2b0] sm:$0xff]  ;;  %v267_v44 = vld [vmem:[%s1639_s30 + $0x2c8] sm:$0xff] }
  0x63   : > { %v416_v47 = vpack.c.bf16 %v272_v42, %v269_v41  ;;  %v414_v48 = vpack.c.bf16 %v267_v44, %v264_v43 }
  0x67   : > { %689 = vmatmul.mubr.bf16.gmra.mrb[16].mxu0 %v382_v53  ;;  %v238_v53 = vld [vmem:[%s1639_s30 + $0x1e0] sm:$0xff] }
  0x68   : > { %881 = vmatmul.mubr.bf16.gmra.mrb[16].mxu1 %v454_v54  ;;  %696 = vmatprep.mubr.bf16.mxu0 %v386_v55  ;;  %v241_v54 = vld [vmem:[%s1639_s30 + $0x1f8] sm:$0xff]  ;;  %v210_v55 = vld [vmem:[%s1639_s30 + $0x100] sm:$0xff] }
  0x69   : > { %888 = vmatprep.mubr.bf16.mxu1 %v458_v56  ;;  %v213_v56 = vld [vmem:[%s1639_s30 + $0x118] sm:$0xff]  ;;  %v400_v61 = vpack.c.bf16 %v241_v54, %v238_v53  ;;  %v275_v53 = vld [vmem:[%s1639_s30 + $0x308] sm:$0xff]  ;;  %v278_v54 = vld [vmem:[%s1639_s30 + $0x320] sm:$0xff] }
  0x6a   : > { %v387_v62 = vpack.c.bf16 %v213_v56, %v210_v55  ;;  %v276_v55 = vld [vmem:[%s1639_s30 + $0x310] sm:$0xff]  ;;  %v279_v56 = vld [vmem:[%s1639_s30 + $0x328] sm:$0xff]  ;;  %v419_v59 = vpack.c.bf16 %v278_v54, %v275_v53 }
  0x6b   : > { %v420_v60 = vpack.c.bf16 %v279_v56, %v276_v55 }
  0x6f   : > { %697 = vmatmul.mubr.bf16.gmra.mrb[20].mxu0 %v385_v1  ;;  %v244_v1 = vld [vmem:[%s1639_s30 + $0x210] sm:$0xff] }
  0x70   : > { %889 = vmatmul.mubr.bf16.gmra.mrb[20].mxu1 %v457_v2  ;;  %704 = vmatprep.mubr.bf16.mxu0 %v389_v4  ;;  %v247_v2 = vld [vmem:[%s1639_s30 + $0x228] sm:$0xff]  ;;  %v222_v4 = vld [vmem:[%s1639_s30 + $0x160] sm:$0xff] }
  0x71   : > { %896 = vmatprep.mubr.bf16.mxu1 %v461_v5  ;;  %v225_v5 = vld [vmem:[%s1639_s30 + $0x178] sm:$0xff]  ;;  %v403_v9 = vpack.c.bf16 %v247_v2, %v244_v1  ;;  %v284_v2 = vld [vmem:[%s1639_s30 + $0x350] sm:$0xff] }
  0x72   : > { %v393_v10 = vpack.c.bf16 %v225_v5, %v222_v4  ;;  %v281_v1 = vld [vmem:[%s1639_s30 + $0x338] sm:$0xff]  ;;  %v288_v4 = vld [vmem:[%s1639_s30 + $0x370] sm:$0xff]  ;;  %v291_v5 = vld [vmem:[%s1639_s30 + $0x388] sm:$0xff] }
  0x73   : > { %v422_v7 = vpack.c.bf16 %v284_v2, %v281_v1  ;;  %v426_v8 = vpack.c.bf16 %v291_v5, %v288_v4 }
  0x77   : > { %705 = vmatmul.mubr.bf16.gmra.mrb[24].mxu0 %v388_v13  ;;  %v250_v13 = vld [vmem:[%s1639_s30 + $0x240] sm:$0xff] }
  0x78   : > { %897 = vmatmul.mubr.bf16.gmra.mrb[24].mxu1 %v460_v14  ;;  %712 = vmatprep.mubr.bf16.mxu0 %v392_v15  ;;  %v253_v14 = vld [vmem:[%s1639_s30 + $0x258] sm:$0xff]  ;;  %v234_v15 = vld [vmem:[%s1639_s30 + $0x1c0] sm:$0xff] }
  0x79   : > { %904 = vmatprep.mubr.bf16.mxu1 %v464_v16  ;;  %v237_v16 = vld [vmem:[%s1639_s30 + $0x1d8] sm:$0xff]  ;;  %v406_v21 = vpack.c.bf16 %v253_v14, %v250_v13  ;;  %v287_v13 = vld [vmem:[%s1639_s30 + $0x368] sm:$0xff]  ;;  %v290_v14 = vld [vmem:[%s1639_s30 + $0x380] sm:$0xff] }
  0x7a   : > { %v399_v22 = vpack.c.bf16 %v237_v16, %v234_v15  ;;  %v300_v15 = vld [vmem:[%s1639_s30 + $0x3d0] sm:$0xff]  ;;  %v303_v16 = vld [vmem:[%s1639_s30 + $0x3e8] sm:$0xff]  ;;  %v425_v19 = vpack.c.bf16 %v290_v14, %v287_v13 }
  0x7b   : > { %v432_v20 = vpack.c.bf16 %v303_v16, %v300_v15 }
  0x7f   : > { %713 = vmatmul.mubr.bf16.gmra.mrb[28].mxu0 %v391_v25  ;;  %v256_v25 = vld [vmem:[%s1639_s30 + $0x270] sm:$0xff] }
  0x80   : > { %905 = vmatmul.mubr.bf16.gmra.mrb[28].mxu1 %v463_v26  ;;  %720 = vmatprep.mubr.bf16.mxu0 %v395_v27  ;;  %v259_v26 = vld [vmem:[%s1639_s30 + $0x288] sm:$0xff]  ;;  %v246_v27 = vld [vmem:[%s1639_s30 + $0x220] sm:$0xff] }
  0x81   : > { %1468 = vmatprep.mubr.msk.bf16.mxu1 %vm527_vm0, %v372_v28  ;;  %v249_v28 = vld [vmem:[%s1639_s30 + $0x238] sm:$0xff]  ;;  %v409_v33 = vpack.c.bf16 %v259_v26, %v256_v25  ;;  %v296_v26 = vld [vmem:[%s1639_s30 + $0x3b0] sm:$0xff] }
  0x82   : > { %v405_v34 = vpack.c.bf16 %v249_v28, %v246_v27  ;;  %v293_v25 = vld [vmem:[%s1639_s30 + $0x398] sm:$0xff]  ;;  %v312_v27 = vld [vmem:[%s1639_s30 + $0x430] sm:$0xff]  ;;  %v315_v28 = vld [vmem:[%s1639_s30 + $0x448] sm:$0xff] }
  0x83   : > { %v428_v31 = vpack.c.bf16 %v296_v26, %v293_v25  ;;  %v438_v32 = vpack.c.bf16 %v315_v28, %v312_v27 }
  0x87   : > { %721 = vmatmul.mubr.bf16.gmra.mrb[32].mxu0 %v394_v37  ;;  %v262_v37 = vld [vmem:[%s1639_s30 + $0x2a0] sm:$0xff] }
  0x88   : > { %1469 = vmatmul.mubr.msk.bf16.vlgmr.msra.gmra.mrb[32].mxu1 %vm527_vm0, %v375_v38  ;;  %728 = vmatprep.mubr.bf16.mxu0 %v398_v39  ;;  %v265_v38 = vld [vmem:[%s1639_s30 + $0x2b8] sm:$0xff]  ;;  %v258_v39 = vld [vmem:[%s1639_s30 + $0x280] sm:$0xff] }
  0x89   : > { %1472 = vmatprep.mubr.msk.bf16.mxu1 %vm527_vm0, %v378_v40  ;;  %v261_v40 = vld [vmem:[%s1639_s30 + $0x298] sm:$0xff]  ;;  %v412_v45 = vpack.c.bf16 %v265_v38, %v262_v37  ;;  %v299_v37 = vld [vmem:[%s1639_s30 + $0x3c8] sm:$0xff]  ;;  %v302_v38 = vld [vmem:[%s1639_s30 + $0x3e0] sm:$0xff] }
  0x8a   : > { %v411_v46 = vpack.c.bf16 %v261_v40, %v258_v39  ;;  %v324_v39 = vld [vmem:[%s1639_s30 + $0x490] sm:$0xff]  ;;  %v327_v40 = vld [vmem:[%s1639_s30 + $0x4a8] sm:$0xff]  ;;  %v431_v43 = vpack.c.bf16 %v302_v38, %v299_v37 }
  0x8b   : > { %v444_v44 = vpack.c.bf16 %v327_v40, %v324_v39 }
  0x8f   : > { %729 = vmatmul.mubr.bf16.gmra.mrb[36].mxu0 %v397_v49  ;;  %v268_v49 = vld [vmem:[%s1639_s30 + $0x2d0] sm:$0xff] }
  0x90   : > { %1473 = vmatmul.mubr.msk.bf16.gmra.mrb[36].mxu1 %vm527_vm0, %v381_v50  ;;  %736 = vmatprep.mubr.bf16.mxu0 %v401_v51  ;;  %v271_v50 = vld [vmem:[%s1639_s30 + $0x2e8] sm:$0xff]  ;;  %v270_v51 = vld [vmem:[%s1639_s30 + $0x2e0] sm:$0xff] }
  0x91   : > { %1476 = vmatprep.mubr.msk.bf16.mxu1 %vm527_vm0, %v384_v52  ;;  %v273_v52 = vld [vmem:[%s1639_s30 + $0x2f8] sm:$0xff]  ;;  %v415_v57 = vpack.c.bf16 %v271_v50, %v268_v49  ;;  %v308_v50 = vld [vmem:[%s1639_s30 + $0x410] sm:$0xff] }
  0x92   : > { %v417_v58 = vpack.c.bf16 %v273_v52, %v270_v51  ;;  %v305_v49 = vld [vmem:[%s1639_s30 + $0x3f8] sm:$0xff]  ;;  %v336_v51 = vld [vmem:[%s1639_s30 + $0x4f0] sm:$0xff]  ;;  %v339_v52 = vld [vmem:[%s1639_s30 + $0x508] sm:$0xff] }
  0x93   : > { %v434_v55 = vpack.c.bf16 %v308_v50, %v305_v49  ;;  %v450_v56 = vpack.c.bf16 %v339_v52, %v336_v51 }
  0x97   : > { %737 = vmatmul.mubr.bf16.gmra.mrb[40].mxu0 %v400_v61  ;;  %v274_v61 = vld [vmem:[%s1639_s30 + $0x300] sm:$0xff] }
  0x98   : > { %1477 = vmatmul.mubr.msk.bf16.gmra.mrb[40].mxu1 %vm527_vm0, %v387_v62  ;;  %744 = vmatprep.mubr.bf16.mxu0 %v404_v63  ;;  %v277_v62 = vld [vmem:[%s1639_s30 + $0x318] sm:$0xff]  ;;  %v282_v63 = vld [vmem:[%s1639_s30 + $0x340] sm:$0xff] }
  0x99   : > { %1480 = vmatprep.mubr.msk.bf16.mxu1 %vm527_vm0, %v390_v0  ;;  %v285_v0 = vld [vmem:[%s1639_s30 + $0x358] sm:$0xff]  ;;  %v418_v3 = vpack.c.bf16 %v277_v62, %v274_v61  ;;  %v311_v61 = vld [vmem:[%s1639_s30 + $0x428] sm:$0xff]  ;;  %v314_v62 = vld [vmem:[%s1639_s30 + $0x440] sm:$0xff] }
  0x9a   : > { %v423_v6 = vpack.c.bf16 %v285_v0, %v282_v63  ;;  %v348_v63 = vld [vmem:[%s1639_s30 + $0x550] sm:$0xff]  ;;  %v351_v0 = vld [vmem:[%s1639_s30 + $0x568] sm:$0xff]  ;;  %v437_v4 = vpack.c.bf16 %v314_v62, %v311_v61 }
  0x9b   : > { %v456_v5 = vpack.c.bf16 %v351_v0, %v348_v63 }
  0x9f   : > { %745 = vmatmul.mubr.bf16.gmra.mrb[44].mxu0 %v403_v9  ;;  %v280_v9 = vld [vmem:[%s1639_s30 + $0x330] sm:$0xff] }
  0xa0   : > { %1481 = vmatmul.mubr.msk.bf16.gmra.mrb[44].mxu1 %vm527_vm0, %v393_v10  ;;  %752 = vmatprep.mubr.bf16.mxu0 %v407_v11  ;;  %v283_v10 = vld [vmem:[%s1639_s30 + $0x348] sm:$0xff]  ;;  %v294_v11 = vld [vmem:[%s1639_s30 + $0x3a0] sm:$0xff] }
  0xa1   : > { %1484 = vmatprep.mubr.msk.bf16.mxu1 %vm527_vm0, %v396_v12  ;;  %v297_v12 = vld [vmem:[%s1639_s30 + $0x3b8] sm:$0xff]  ;;  %v421_v17 = vpack.c.bf16 %v283_v10, %v280_v9  ;;  %v320_v10 = vld [vmem:[%s1639_s30 + $0x470] sm:$0xff] }
  0xa2   : > { %v429_v18 = vpack.c.bf16 %v297_v12, %v294_v11  ;;  %v317_v9 = vld [vmem:[%s1639_s30 + $0x458] sm:$0xff]  ;;  %v360_v11 = vld [vmem:[%s1639_s30 + $0x5b0] sm:$0xff]  ;;  %v363_v12 = vld [vmem:[%s1639_s30 + $0x5c8] sm:$0xff] }
  0xa3   : > { %v440_v15 = vpack.c.bf16 %v320_v10, %v317_v9  ;;  %v462_v16 = vpack.c.bf16 %v363_v12, %v360_v11 }
  0xa7   : > { %753 = vmatmul.mubr.bf16.gmra.mrb[48].mxu0 %v406_v21  ;;  %v286_v21 = vld [vmem:[%s1639_s30 + $0x360] sm:$0xff] }
  0xa8   : > { %1485 = vmatmul.mubr.msk.bf16.gmra.mrb[48].mxu1 %vm527_vm0, %v399_v22  ;;  %760 = vmatprep.mubr.bf16.mxu0 %v410_v23  ;;  %v289_v22 = vld [vmem:[%s1639_s30 + $0x378] sm:$0xff]  ;;  %v306_v23 = vld [vmem:[%s1639_s30 + $0x400] sm:$0xff] }
  0xa9   : > { %1488 = vmatprep.mubr.msk.bf16.mxu1 %vm527_vm0, %v402_v24  ;;  %v309_v24 = vld [vmem:[%s1639_s30 + $0x418] sm:$0xff]  ;;  %v424_v29 = vpack.c.bf16 %v289_v22, %v286_v21 }
  0xaa   : > { %v435_v30 = vpack.c.bf16 %v309_v24, %v306_v23 }
  0xaf   : > { %761 = vmatmul.mubr.bf16.gmra.mrb[52].mxu0 %v409_v33  ;;  %v292_v33 = vld [vmem:[%s1639_s30 + $0x390] sm:$0xff] }
  0xb0   : > { %1489 = vmatmul.mubr.msk.bf16.gmra.mrb[52].mxu1 %vm527_vm0, %v405_v34  ;;  %768 = vmatprep.mubr.bf16.mxu0 %v413_v35  ;;  %v295_v34 = vld [vmem:[%s1639_s30 + $0x3a8] sm:$0xff]  ;;  %v318_v35 = vld [vmem:[%s1639_s30 + $0x460] sm:$0xff] }
  0xb1   : > { %1492 = vmatprep.mubr.msk.bf16.mxu1 %vm527_vm0, %v408_v36  ;;  %v321_v36 = vld [vmem:[%s1639_s30 + $0x478] sm:$0xff]  ;;  %v427_v41 = vpack.c.bf16 %v295_v34, %v292_v33 }
  0xb2   : > { %v441_v42 = vpack.c.bf16 %v321_v36, %v318_v35 }
  0xb7   : > { %769 = vmatmul.mubr.bf16.gmra.mrb[56].mxu0 %v412_v45  ;;  %v298_v45 = vld [vmem:[%s1639_s30 + $0x3c0] sm:$0xff] }
  0xb8   : > { %1493 = vmatmul.mubr.msk.bf16.gmra.mrb[56].mxu1 %vm527_vm0, %v411_v46  ;;  %776 = vmatprep.mubr.bf16.mxu0 %v416_v47  ;;  %v301_v46 = vld [vmem:[%s1639_s30 + $0x3d8] sm:$0xff]  ;;  %v330_v47 = vld [vmem:[%s1639_s30 + $0x4c0] sm:$0xff] }
  0xb9   : > { %1496 = vmatprep.mubr.msk.bf16.mxu1 %vm527_vm0, %v414_v48  ;;  %v333_v48 = vld [vmem:[%s1639_s30 + $0x4d8] sm:$0xff]  ;;  %v430_v53 = vpack.c.bf16 %v301_v46, %v298_v45 }
  0xba   : > { %v447_v54 = vpack.c.bf16 %v333_v48, %v330_v47 }
  0xbf   : > { %777 = vmatmul.mubr.bf16.gmra.mrb[60].mxu0 %v415_v57  ;;  %v304_v57 = vld [vmem:[%s1639_s30 + $0x3f0] sm:$0xff] }
  0xc0   : > { %1497 = vmatmul.mubr.msk.bf16.gmra.mrb[60].mxu1 %vm527_vm0, %v417_v58  ;;  %784 = vmatprep.mubr.bf16.mxu0 %v419_v59  ;;  %v307_v58 = vld [vmem:[%s1639_s30 + $0x408] sm:$0xff]  ;;  %v342_v59 = vld [vmem:[%s1639_s30 + $0x520] sm:$0xff] }
  0xc1   : > { %1500 = vmatprep.mubr.msk.bf16.mxu1 %vm527_vm0, %v420_v60  ;;  %v345_v60 = vld [vmem:[%s1639_s30 + $0x538] sm:$0xff]  ;;  %v433_v1 = vpack.c.bf16 %v307_v58, %v304_v57 }
  0xc2   : > { %v453_v2 = vpack.c.bf16 %v345_v60, %v342_v59 }
  0xc7   : > { %785 = vmatmul.mubr.bf16.gmra.mrb[64].mxu0 %v418_v3  ;;  %v310_v3 = vld [vmem:[%s1639_s30 + $0x420] sm:$0xff] }
  0xc8   : > { %1501 = vmatmul.mubr.msk.bf16.gmra.mrb[64].mxu1 %vm527_vm0, %v423_v6  ;;  %792 = vmatprep.mubr.bf16.mxu0 %v422_v7  ;;  %v313_v6 = vld [vmem:[%s1639_s30 + $0x438] sm:$0xff]  ;;  %v354_v7 = vld [vmem:[%s1639_s30 + $0x580] sm:$0xff] }
  0xc9   : > { %1504 = vmatprep.mubr.msk.bf16.mxu1 %vm527_vm0, %v426_v8  ;;  %v357_v8 = vld [vmem:[%s1639_s30 + $0x598] sm:$0xff]  ;;  %v436_v13 = vpack.c.bf16 %v313_v6, %v310_v3 }
  0xca   : > { %v459_v14 = vpack.c.bf16 %v357_v8, %v354_v7 }
  0xcf   : > { %793 = vmatmul.mubr.bf16.gmra.mrb[68].mxu0 %v421_v17  ;;  %v316_v17 = vld [vmem:[%s1639_s30 + $0x450] sm:$0xff] }
  0xd0   : > { %1505 = vmatmul.mubr.msk.bf16.gmra.mrb[68].mxu1 %vm527_vm0, %v429_v18  ;;  %800 = vmatprep.mubr.bf16.mxu0 %v425_v19  ;;  %v319_v18 = vld [vmem:[%s1639_s30 + $0x468] sm:$0xff]  ;;  %v366_v19 = vld [vmem:[%s1639_s30 + $0x5e0] sm:$0xff] }
  0xd1   : > { %1508 = vmatprep.mubr.msk.bf16.mxu1 %vm527_vm0, %v432_v20  ;;  %v369_v20 = vld [vmem:[%s1639_s30 + $0x5f8] sm:$0xff]  ;;  %v439_v21 = vpack.c.bf16 %v319_v18, %v316_v17 }
  0xd2   : > { %v465_v22 = vpack.c.bf16 %v369_v20, %v366_v19 }
  0xd7   : > { %801 = vmatmul.mubr.bf16.gmra.mrb[72].mxu0 %v424_v29 }
  0xd8   : > { %1509 = vmatmul.mubr.msk.bf16.gmra.mrb[72].mxu1 %vm527_vm0, %v435_v30  ;;  %808 = vmatprep.mubr.bf16.mxu0 %v428_v31 }
  0xd9   : > { %1512 = vmatprep.mubr.msk.bf16.mxu1 %vm527_vm0, %v438_v32 }
  0xdf   : > { %809 = vmatmul.mubr.bf16.gmra.mrb[76].mxu0 %v427_v41 }
  0xe0   : > { %1513 = vmatmul.mubr.msk.bf16.gmra.mrb[76].mxu1 %vm527_vm0, %v441_v42  ;;  %816 = vmatprep.mubr.bf16.mxu0 %v431_v43 }
  0xe1   : > { %1516 = vmatprep.mubr.msk.bf16.mxu1 %vm527_vm0, %v444_v44 }
  0xe7   : > { %817 = vmatmul.mubr.bf16.gmra.mrb[80].mxu0 %v430_v53 }
  0xe8   : > { %1517 = vmatmul.mubr.msk.bf16.gmra.mrb[80].mxu1 %vm527_vm0, %v447_v54  ;;  %824 = vmatprep.mubr.bf16.mxu0 %v434_v55 }
  0xe9   : > { %1520 = vmatprep.mubr.msk.bf16.mxu1 %vm527_vm0, %v450_v56 }
  0xef   : > { %825 = vmatmul.mubr.bf16.gmra.mrb[84].mxu0 %v433_v1 }
  0xf0   : > { %1521 = vmatmul.mubr.msk.bf16.gmra.mrb[84].mxu1 %vm527_vm0, %v453_v2  ;;  %832 = vmatprep.mubr.bf16.mxu0 %v437_v4 }
  0xf1   : > { %1524 = vmatprep.mubr.msk.bf16.mxu1 %vm527_vm0, %v456_v5 }
  0xf7   : > { %833 = vmatmul.mubr.bf16.gmra.mrb[88].mxu0 %v436_v13 }
  0xf8   : > { %1525 = vmatmul.mubr.msk.bf16.gmra.mrb[88].mxu1 %vm527_vm0, %v459_v14  ;;  %840 = vmatprep.mubr.bf16.mxu0 %v440_v15 }
  0xf9   : > { %1528 = vmatprep.mubr.msk.bf16.mxu1 %vm527_vm0, %v462_v16 }
  0xff   : > { %841 = vmatmul.mubr.bf16.gmra.mrb[92].mxu0 %v439_v21 }
 0x100   : > { %1529 = vmatmul.mubr.msk.bf16.gmra.mrb[92].mxu1 %vm527_vm0, %v465_v22 }
 0x11a   : > { %v1983_v23 = vpop.f32.mrb[0].mxu0 }
 0x11b   : > { %v1985_v24 = vpop.f32.mrb[0].mxu1  ;;  %v660_v25 = vpop.f32.mrb[1].mxu0 }
 0x11c   : > { %v852_v26 = vpop.f32.mrb[1].mxu1  ;;  %v1987_v27 = vpop.f32.mrb[2].mxu0  ;;  %v2046_v25 = vld [vmem:[%s2253_s2] ss:$0 sm:$0xff] }
 0x11d   : > { %v1989_v28 = vpop.f32.mrb[2].mxu1  ;;  %v663_v29 = vpop.f32.mrb[3].mxu0 }
 0x11e   : > { %v855_v30 = vpop.f32.mrb[3].mxu1  ;;  %v659_v29 = vadd.f32 %v2046_v25, %v1983_v23 }
 0x122   : > { %v666_v31 = vpop.f32.mrb[4].mxu0 }
 0x123   : > { %v1991_v32 = vpop.f32.mrb[4].mxu1  ;;  %v668_v33 = vpop.f32.mrb[5].mxu0  ;;  %v667_v26 = vadd.f32 %v2046_v25, %v666_v31 }
 0x124   : > { %v860_v34 = vpop.f32.mrb[5].mxu1  ;;  %v669_v35 = vpop.f32.mrb[6].mxu0 }
 0x125   : > { %v1993_v36 = vpop.f32.mrb[6].mxu1  ;;  %v671_v37 = vpop.f32.mrb[7].mxu0  ;;  %v670_v34 = vadd.f32 %v2046_v25, %v669_v35 }
 0x126   : > { %v863_v38 = vpop.f32.mrb[7].mxu1 }
 0x12a   : > { %v1995_v39 = vpop.f32.mrb[8].mxu0 }
 0x12b   : > { %v1997_v40 = vpop.f32.mrb[8].mxu1  ;;  %v676_v41 = vpop.f32.mrb[9].mxu0 }
 0x12c   : > { %v868_v42 = vpop.f32.mrb[9].mxu1  ;;  %v1999_v43 = vpop.f32.mrb[10].mxu0 }
 0x12d   : > { %v2001_v44 = vpop.f32.mrb[10].mxu1  ;;  %v679_v45 = vpop.f32.mrb[11].mxu0  ;;  %v662_v42 = vadd.f32 %v2046_v25, %v1987_v27 }
 0x12e   : > { %v871_v46 = vpop.f32.mrb[11].mxu1 }
 0x132   : > { %v2003_v47 = vpop.f32.mrb[12].mxu0 }
 0x133   : > { %v2005_v48 = vpop.f32.mrb[12].mxu1  ;;  %v684_v49 = vpop.f32.mrb[13].mxu0 }
 0x134   : > { %v876_v50 = vpop.f32.mrb[13].mxu1  ;;  %v2007_v51 = vpop.f32.mrb[14].mxu0 }
 0x135   : > { %v2009_v52 = vpop.f32.mrb[14].mxu1  ;;  %v687_v53 = vpop.f32.mrb[15].mxu0 }
 0x136   : > { %v879_v54 = vpop.f32.mrb[15].mxu1 }
 0x13a   : > { %v2011_v55 = vpop.f32.mrb[16].mxu0 }
 0x13b   : > { %v2013_v56 = vpop.f32.mrb[16].mxu1  ;;  %v692_v57 = vpop.f32.mrb[17].mxu0 }
 0x13c   : > { %v884_v58 = vpop.f32.mrb[17].mxu1  ;;  %v2015_v59 = vpop.f32.mrb[18].mxu0 }
 0x13d   : > { %v2017_v60 = vpop.f32.mrb[18].mxu1  ;;  %v695_v61 = vpop.f32.mrb[19].mxu0  ;;  %v683_v58 = vadd.f32 %v2046_v25, %v2003_v47  ;;  %v678_v47 = vadd.f32 %v2046_v25, %v1999_v43  ;;  %v691_v43 = vadd.f32 %v2046_v25, %v2011_v55 }
 0x13e   : > { %v887_v62 = vpop.f32.mrb[19].mxu1  ;;  %v675_v61 = vadd.f32 %v2046_v25, %v1995_v39 }
 0x142   : > { %v2019_v63 = vpop.f32.mrb[20].mxu0 }
 0x143   : > { %v2021_v0 = vpop.f32.mrb[20].mxu1  ;;  %v700_v1 = vpop.f32.mrb[21].mxu0 }
 0x144   : > { %v892_v2 = vpop.f32.mrb[21].mxu1  ;;  %v2023_v4 = vpop.f32.mrb[22].mxu0 }
 0x145   : > { %v2025_v5 = vpop.f32.mrb[22].mxu1  ;;  %v703_v3 = vpop.f32.mrb[23].mxu0  ;;  %v686_v2 = vadd.f32 %v2046_v25, %v2007_v51 }
 0x146   : > { %v895_v6 = vpop.f32.mrb[23].mxu1 }
 0x14a   : > { %v2027_v7 = vpop.f32.mrb[24].mxu0 }
 0x14b   : > { %v2029_v8 = vpop.f32.mrb[24].mxu1  ;;  %v708_v9 = vpop.f32.mrb[25].mxu0 }
 0x14c   : > { %v900_v10 = vpop.f32.mrb[25].mxu1  ;;  %v2031_v11 = vpop.f32.mrb[26].mxu0 }
 0x14d   : > { %v2033_v12 = vpop.f32.mrb[26].mxu1  ;;  %v711_v13 = vpop.f32.mrb[27].mxu0 }
 0x14e   : > { %v903_v14 = vpop.f32.mrb[27].mxu1 }
 0x152   : > { %v2035_v15 = vpop.f32.mrb[28].mxu0 }
 0x153   : > { %v2037_v16 = vpop.f32.mrb[28].mxu1  ;;  %v716_v17 = vpop.f32.mrb[29].mxu0 }
 0x154   : > { %v908_v18 = vpop.f32.mrb[29].mxu1  ;;  %v2039_v19 = vpop.f32.mrb[30].mxu0 }
 0x155   : > { %v2041_v20 = vpop.f32.mrb[30].mxu1  ;;  %v719_v21 = vpop.f32.mrb[31].mxu0 }
 0x156   : > { %v911_v22 = vpop.f32.mrb[31].mxu1 }
 0x15a   : > { %v2052_v30 = vpop.f32.mrb[32].mxu0 }
 0x15b   : > { %v1470_v33 = vpop.f32.mrb[32].mxu1  ;;  %v724_v38 = vpop.f32.mrb[33].mxu0 }
 0x15c   : > { %v956_v37 = vadd.f32 %v1470_v33, %v667_v26  ;;  %v947_v41 = vpop.f32.mrb[33].mxu1  ;;  %v2062_v31 = vpop.f32.mrb[34].mxu0  ;;  %v699_v33 = vadd.f32 %v2046_v25, %v2019_v63  ;;  %v702_v38 = vadd.f32 %v2046_v25, %v2023_v4  ;;  %v694_v63 = vadd.f32 %v2046_v25, %v2015_v59 }
 0x15d   : > { %v948_v23 = vadd.f32 %v947_v41, %v659_v29  ;;  %v1471_v45 = vpop.f32.mrb[34].mxu1  ;;  %v727_v49 = vpop.f32.mrb[35].mxu0  ;;  %v707_v59 = vadd.f32 %v2046_v25, %v2027_v7 }
 0x15e   : > { %v1204_v35 = vmax.f32 %v956_v37, 0.0  ;;  %v959_v46 = vadd.f32 %v1471_v45, %v670_v34  ;;  %v950_v50 = vpop.f32.mrb[35].mxu1 }
 0x15f   : > { %v1202_v53 = vmax.f32 %v948_v23, 0.0  ;;  %v951_v54 = vadd.f32 %v950_v50, %v662_v42 }
 0x160   : > { %1268 = vst [vmem:[%s2060_s22 + $0x10] sm:$0xff] %v1204_v35  ;;  %v1205_v27 = vmax.f32 %v959_v46, 0.0 }
 0x161   : > { %1266 = vst [vmem:[%s2060_s22] sm:$0xff] %v1202_v53  ;;  %v1203_v57 = vmax.f32 %v951_v54, 0.0 }
 0x162   : > { %1269 = vst [vmem:[%s2060_s22 + $0x18] sm:$0xff] %v1205_v27  ;;  %v2072_v62 = vpop.f32.mrb[36].mxu0 }
 0x163   : > { %1267 = vst [vmem:[%s2060_s22 + $0x8] sm:$0xff] %v1203_v57  ;;  %v1474_v1 = vpop.f32.mrb[36].mxu1  ;;  %v732_v6 = vpop.f32.mrb[37].mxu0 }
 0x164   : > { %v972_v3 = vadd.f32 %v1474_v1, %v683_v58  ;;  %v963_v9 = vpop.f32.mrb[37].mxu1  ;;  %v2078_v13 = vpop.f32.mrb[38].mxu0  ;;  %v715_v58 = vadd.f32 %v2046_v25, %v2035_v15 }
 0x165   : > { %v964_v10 = vadd.f32 %v963_v9, %v675_v61  ;;  %v1475_v39 = vpop.f32.mrb[38].mxu1  ;;  %v735_v18 = vpop.f32.mrb[39].mxu0 }
 0x166   : > { %v1208_v14 = vmax.f32 %v972_v3, 0.0  ;;  %v975_v17 = vadd.f32 %v1475_v39, %v686_v2  ;;  %v966_v21 = vpop.f32.mrb[39].mxu1  ;;  %v718_v2 = vadd.f32 %v2046_v25, %v2039_v19 }
 0x167   : > { %v1206_v22 = vmax.f32 %v964_v10, 0.0  ;;  %v967_v26 = vadd.f32 %v966_v21, %v678_v47  ;;  %v710_v47 = vadd.f32 %v2046_v25, %v2031_v11  ;;  %v723_v11 = vadd.f32 %v2046_v25, %v2052_v30 }
 0x168   : > { %1272 = vst [vmem:[%s2060_s22 + $0x30] sm:$0xff] %v1208_v14  ;;  %v1209_v51 = vmax.f32 %v975_v17, 0.0 }
 0x169   : > { %1270 = vst [vmem:[%s2060_s22 + $0x20] sm:$0xff] %v1206_v22  ;;  %v1207_v29 = vmax.f32 %v967_v26, 0.0 }
 0x16a   : > { %1273 = vst [vmem:[%s2060_s22 + $0x38] sm:$0xff] %v1209_v51  ;;  %v2088_v34 = vpop.f32.mrb[40].mxu0  ;;  %v731_v51 = vadd.f32 %v2046_v25, %v2072_v62 }
 0x16b   : > { %1271 = vst [vmem:[%s2060_s22 + $0x28] sm:$0xff] %v1207_v29  ;;  %v1478_v37 = vpop.f32.mrb[40].mxu1  ;;  %v740_v42 = vpop.f32.mrb[41].mxu0 }
 0x16c   : > { %v988_v41 = vadd.f32 %v1478_v37, %v699_v33  ;;  %v979_v23 = vpop.f32.mrb[41].mxu1  ;;  %v2094_v35 = vpop.f32.mrb[42].mxu0  ;;  %v726_v42 = vadd.f32 %v2046_v25, %v2062_v31  ;;  %v739_v31 = vadd.f32 %v2046_v25, %v2088_v34 }
 0x16d   : > { %v980_v45 = vadd.f32 %v979_v23, %v691_v43  ;;  %v1479_v55 = vpop.f32.mrb[42].mxu1  ;;  %v743_v50 = vpop.f32.mrb[43].mxu0  ;;  %v734_v43 = vadd.f32 %v2046_v25, %v2078_v13 }
 0x16e   : > { %v1212_v46 = vmax.f32 %v988_v41, 0.0  ;;  %v991_v49 = vadd.f32 %v1479_v55, %v702_v38  ;;  %v982_v53 = vpop.f32.mrb[43].mxu1 }
 0x16f   : > { %v1210_v54 = vmax.f32 %v980_v45, 0.0  ;;  %v983_v27 = vadd.f32 %v982_v53, %v694_v63 }
 0x170   : > { %1276 = vst [vmem:[%s2060_s22 + $0x50] sm:$0xff] %v1212_v46  ;;  %v1213_v4 = vmax.f32 %v991_v49, 0.0 }
 0x171   : > { %1274 = vst [vmem:[%s2060_s22 + $0x40] sm:$0xff] %v1210_v54  ;;  %v1211_v57 = vmax.f32 %v983_v27, 0.0 }
 0x172   : > { %1277 = vst [vmem:[%s2060_s22 + $0x58] sm:$0xff] %v1213_v4  ;;  %v746_v61 = vpop.f32.mrb[44].mxu0 }
 0x173   : > { %1275 = vst [vmem:[%s2060_s22 + $0x48] sm:$0xff] %v1211_v57  ;;  %v1482_v1 = vpop.f32.mrb[44].mxu1  ;;  %v748_v6 = vpop.f32.mrb[45].mxu0  ;;  %v747_v54 = vadd.f32 %v2046_v25, %v746_v61 }
 0x174   : > { %v1004_v3 = vadd.f32 %v1482_v1, %v715_v58  ;;  %v995_v9 = vpop.f32.mrb[45].mxu1  ;;  %v749_v10 = vpop.f32.mrb[46].mxu0 }
 0x175   : > { %v996_v15 = vadd.f32 %v995_v9, %v707_v59  ;;  %v1483_v39 = vpop.f32.mrb[46].mxu1  ;;  %v751_v17 = vpop.f32.mrb[47].mxu0  ;;  %v750_v57 = vadd.f32 %v2046_v25, %v749_v10 }
 0x176   : > { %v1216_v7 = vmax.f32 %v1004_v3, 0.0  ;;  %v1007_v14 = vadd.f32 %v1483_v39, %v718_v2  ;;  %v998_v18 = vpop.f32.mrb[47].mxu1  ;;  %v742_v2 = vadd.f32 %v2046_v25, %v2094_v35 }
 0x177   : > { %v1214_v21 = vmax.f32 %v996_v15, 0.0  ;;  %v999_v22 = vadd.f32 %v998_v18, %v710_v47 }
 0x178   : > { %1280 = vst [vmem:[%s2060_s22 + $0x70] sm:$0xff] %v1216_v7  ;;  %v1217_v19 = vmax.f32 %v1007_v14, 0.0 }
 0x179   : > { %1278 = vst [vmem:[%s2060_s22 + $0x60] sm:$0xff] %v1214_v21  ;;  %v1215_v26 = vmax.f32 %v999_v22, 0.0 }
 0x17a   : > { %1281 = vst [vmem:[%s2060_s22 + $0x78] sm:$0xff] %v1217_v19  ;;  %v754_v29 = vpop.f32.mrb[48].mxu0 }
 0x17b   : > { %1279 = vst [vmem:[%s2060_s22 + $0x68] sm:$0xff] %v1215_v26  ;;  %v1486_v33 = vpop.f32.mrb[48].mxu1  ;;  %v756_v38 = vpop.f32.mrb[49].mxu0  ;;  %v755_v18 = vadd.f32 %v2046_v25, %v754_v29 }
 0x17c   : > { %v1020_v37 = vadd.f32 %v1486_v33, %v731_v51  ;;  %v1011_v41 = vpop.f32.mrb[49].mxu1  ;;  %v757_v23 = vpop.f32.mrb[50].mxu0 }
 0x17d   : > { %v1012_v62 = vadd.f32 %v1011_v41, %v723_v11  ;;  %v1487_v63 = vpop.f32.mrb[50].mxu1  ;;  %v759_v55 = vpop.f32.mrb[51].mxu0  ;;  %v758_v11 = vadd.f32 %v2046_v25, %v757_v23 }
 0x17e   : > { %v1220_v30 = vmax.f32 %v1020_v37, 0.0  ;;  %v1023_v45 = vadd.f32 %v1487_v63, %v734_v43  ;;  %v1014_v46 = vpop.f32.mrb[51].mxu1 }
 0x17f   : > { %v1218_v49 = vmax.f32 %v1012_v62, 0.0  ;;  %v1015_v50 = vadd.f32 %v1014_v46, %v726_v42 }
 0x180   : > { %1284 = vst [vmem:[%s2060_s22 + $0x90] sm:$0xff] %v1220_v30  ;;  %v1221_v13 = vmax.f32 %v1023_v45, 0.0 }
 0x181   : > { %1282 = vst [vmem:[%s2060_s22 + $0x80] sm:$0xff] %v1218_v49  ;;  %v1219_v53 = vmax.f32 %v1015_v50, 0.0 }
 0x182   : > { %1285 = vst [vmem:[%s2060_s22 + $0x98] sm:$0xff] %v1221_v13  ;;  %v762_v27 = vpop.f32.mrb[52].mxu0 }
 0x183   : > { %1283 = vst [vmem:[%s2060_s22 + $0x88] sm:$0xff] %v1219_v53  ;;  %v1490_v4 = vpop.f32.mrb[52].mxu1  ;;  %v764_v59 = vpop.f32.mrb[53].mxu0  ;;  %v763_v17 = vadd.f32 %v2046_v25, %v762_v27 }
 0x184   : > { %v1036_v58 = vadd.f32 %v1490_v4, %v747_v54  ;;  %v1027_v1 = vpop.f32.mrb[53].mxu1  ;;  %v765_v61 = vpop.f32.mrb[54].mxu0 }
 0x185   : > { %v1028_v3 = vadd.f32 %v1027_v1, %v739_v31  ;;  %v1491_v6 = vpop.f32.mrb[54].mxu1  ;;  %v767_v47 = vpop.f32.mrb[55].mxu0  ;;  %v766_v22 = vadd.f32 %v2046_v25, %v765_v61 }
 0x186   : > { %v1224_v9 = vmax.f32 %v1036_v58, 0.0  ;;  %v1039_v34 = vadd.f32 %v1491_v6, %v750_v57  ;;  %v1030_v15 = vpop.f32.mrb[55].mxu1 }
 0x187   : > { %v1222_v39 = vmax.f32 %v1028_v3, 0.0  ;;  %v1031_v7 = vadd.f32 %v1030_v15, %v742_v2 }
 0x188   : > { %1288 = vst [vmem:[%s2060_s22 + $0xb0] sm:$0xff] %v1224_v9  ;;  %v1225_v10 = vmax.f32 %v1039_v34, 0.0 }
 0x189   : > { %1286 = vst [vmem:[%s2060_s22 + $0xa0] sm:$0xff] %v1222_v39  ;;  %v1223_v14 = vmax.f32 %v1031_v7, 0.0 }
 0x18a   : > { %1289 = vst [vmem:[%s2060_s22 + $0xb8] sm:$0xff] %v1225_v10  ;;  %v770_v35 = vpop.f32.mrb[56].mxu0 }
 0x18b   : > { %1287 = vst [vmem:[%s2060_s22 + $0xa8] sm:$0xff] %v1223_v14  ;;  %v1494_v21 = vpop.f32.mrb[56].mxu1  ;;  %v772_v26 = vpop.f32.mrb[57].mxu0  ;;  %v771_v55 = vadd.f32 %v2046_v25, %v770_v35 }
 0x18c   : > { %v1052_v19 = vadd.f32 %v1494_v21, %v763_v17  ;;  %v1043_v51 = vpop.f32.mrb[57].mxu1  ;;  %v773_v43 = vpop.f32.mrb[58].mxu0 }
 0x18d   : > { %v1044_v33 = vadd.f32 %v1043_v51, %v755_v18  ;;  %v1495_v37 = vpop.f32.mrb[58].mxu1  ;;  %v775_v29 = vpop.f32.mrb[59].mxu0  ;;  %v774_v53 = vadd.f32 %v2046_v25, %v773_v43 }
 0x18e   : > { %v1228_v38 = vmax.f32 %v1052_v19, 0.0  ;;  %v1055_v41 = vadd.f32 %v1495_v37, %v766_v22  ;;  %v1046_v42 = vpop.f32.mrb[59].mxu1 }
 0x18f   : > { %v1226_v62 = vmax.f32 %v1044_v33, 0.0  ;;  %v1047_v63 = vadd.f32 %v1046_v42, %v758_v11 }
 0x190   : > { %1292 = vst [vmem:[%s2060_s22 + $0xd0] sm:$0xff] %v1228_v38  ;;  %v1229_v30 = vmax.f32 %v1055_v41, 0.0 }
 0x191   : > { %1290 = vst [vmem:[%s2060_s22 + $0xc0] sm:$0xff] %v1226_v62  ;;  %v1227_v45 = vmax.f32 %v1047_v63, 0.0 }
 0x192   : > { %1293 = vst [vmem:[%s2060_s22 + $0xd8] sm:$0xff] %v1229_v30  ;;  %v778_v46 = vpop.f32.mrb[60].mxu0 }
 0x193   : > { %1291 = vst [vmem:[%s2060_s22 + $0xc8] sm:$0xff] %v1227_v45  ;;  %v1498_v23 = vpop.f32.mrb[60].mxu1  ;;  %v779_v49 = vadd.f32 %v2046_v25, %v778_v46  ;;  %v780_v50 = vpop.f32.mrb[61].mxu0 }
 0x194   : > { %v1059_v13 = vpop.f32.mrb[61].mxu1  ;;  %v781_v31 = vpop.f32.mrb[62].mxu0 }
 0x195   : > { %v1060_v54 = vadd.f32 %v1059_v13, %v771_v55  ;;  %v1499_v27 = vpop.f32.mrb[62].mxu1  ;;  %v1068_v4 = vadd.f32 %v1498_v23, %v779_v49  ;;  %v782_v57 = vadd.f32 %v2046_v25, %v781_v31  ;;  %v783_v58 = vpop.f32.mrb[63].mxu0 }
 0x196   : > { %v1062_v59 = vpop.f32.mrb[63].mxu1 }
 0x197   : > { %v1230_v1 = vmax.f32 %v1060_v54, 0.0  ;;  %v1063_v2 = vadd.f32 %v1062_v59, %v774_v53  ;;  %v1232_v3 = vmax.f32 %v1068_v4, 0.0  ;;  %v1071_v61 = vadd.f32 %v1499_v27, %v782_v57 }
 0x199   : > { %1294 = vst [vmem:[%s2060_s22 + $0xe0] sm:$0xff] %v1230_v1  ;;  %v1231_v6 = vmax.f32 %v1063_v2, 0.0  ;;  %1296 = vst [vmem:[%s2060_s22 + $0xf0] sm:$0xff] %v1232_v3  ;;  %v1233_v9 = vmax.f32 %v1071_v61, 0.0 }
 0x19a   : > { %v786_v34 = vpop.f32.mrb[64].mxu0 }
 0x19b   : > { %1295 = vst [vmem:[%s2060_s22 + $0xe8] sm:$0xff] %v1231_v6  ;;  %v1502_v47 = vpop.f32.mrb[64].mxu1  ;;  %1297 = vst [vmem:[%s2060_s22 + $0xf8] sm:$0xff] %v1233_v9  ;;  %v787_v15 = vadd.f32 %v2046_v25, %v786_v34  ;;  %v788_v39 = vpop.f32.mrb[65].mxu0 }
 0x19c   : > { %v1075_v7 = vpop.f32.mrb[65].mxu1  ;;  %v789_v10 = vpop.f32.mrb[66].mxu0 }
 0x19d   : > { %v1503_v14 = vpop.f32.mrb[66].mxu1  ;;  %v1076_v17 = vadd.f32 %v1075_v7, %v787_v15  ;;  %v790_v18 = vadd.f32 %v2046_v25, %v789_v10  ;;  %v791_v35 = vpop.f32.mrb[67].mxu0 }
 0x19e   : > { %v1078_v21 = vpop.f32.mrb[67].mxu1 }
 0x19f   : > { %v1234_v22 = vmax.f32 %v1076_v17, 0.0  ;;  %v1079_v19 = vadd.f32 %v1078_v21, %v790_v18  ;;  %v859_v18 = vadd.f32 %v2046_v25, %v1991_v32  ;;  %v851_v21 = vadd.f32 %v2046_v25, %v1985_v24 }
 0x1a0   : > { %v854_v32 = vadd.f32 %v2046_v25, %v1989_v28 }
 0x1a1   : > { %1298 = vst [vmem:[%s2060_s22 + $0x100] sm:$0xff] %v1234_v22  ;;  %v1235_v26 = vmax.f32 %v1079_v19, 0.0 }
 0x1a2   : > { %v794_v51 = vpop.f32.mrb[68].mxu0 }
 0x1a3   : > { %v1506_v11 = vpop.f32.mrb[68].mxu1  ;;  %1299 = vst [vmem:[%s2060_s22 + $0x108] sm:$0xff] %v1235_v26  ;;  %v795_v33 = vadd.f32 %v2046_v25, %v794_v51  ;;  %v796_v43 = vpop.f32.mrb[69].mxu0  ;;  %v862_v26 = vadd.f32 %v2046_v25, %v1993_v36 }
 0x1a4   : > { %v1091_v37 = vpop.f32.mrb[69].mxu1  ;;  %v797_v38 = vpop.f32.mrb[70].mxu0 }
 0x1a5   : > { %v1507_v41 = vpop.f32.mrb[70].mxu1  ;;  %v1084_v29 = vadd.f32 %v1502_v47, %v795_v33  ;;  %v798_v42 = vadd.f32 %v2046_v25, %v797_v38  ;;  %v799_v62 = vpop.f32.mrb[71].mxu0 }
 0x1a6   : > { %v1094_v63 = vpop.f32.mrb[71].mxu1 }
 0x1a7   : > { %v1236_v30 = vmax.f32 %v1084_v29, 0.0  ;;  %v1087_v45 = vadd.f32 %v1503_v14, %v798_v42 }
 0x1a9   : > { %1300 = vst [vmem:[%s2060_s22 + $0x110] sm:$0xff] %v1236_v30  ;;  %v1237_v55 = vmax.f32 %v1087_v45, 0.0 }
 0x1aa   : > { %v802_v46 = vpop.f32.mrb[72].mxu0 }
 0x1ab   : > { %v2157_v23 = vpop.f32.mrb[72].mxu1  ;;  %1301 = vst [vmem:[%s2060_s22 + $0x118] sm:$0xff] %v1237_v55  ;;  %v803_v49 = vadd.f32 %v2046_v25, %v802_v46  ;;  %v804_v50 = vpop.f32.mrb[73].mxu0 }
 0x1ac   : > { %v1107_v13 = vpop.f32.mrb[73].mxu1  ;;  %v805_v53 = vpop.f32.mrb[74].mxu0  ;;  %v875_v50 = vadd.f32 %v2046_v25, %v2005_v48  ;;  %v870_v48 = vadd.f32 %v2046_v25, %v2001_v44 }
 0x1ad   : > { %v2161_v54 = vpop.f32.mrb[74].mxu1  ;;  %v1092_v31 = vadd.f32 %v1091_v37, %v803_v49  ;;  %v806_v27 = vadd.f32 %v2046_v25, %v805_v53  ;;  %v807_v4 = vpop.f32.mrb[75].mxu0  ;;  %v867_v53 = vadd.f32 %v2046_v25, %v1997_v40 }
 0x1ae   : > { %v1110_v57 = vpop.f32.mrb[75].mxu1  ;;  %v878_v4 = vadd.f32 %v2046_v25, %v2009_v52 }
 0x1af   : > { %v1238_v58 = vmax.f32 %v1092_v31, 0.0  ;;  %v1095_v59 = vadd.f32 %v1094_v63, %v806_v27 }
 0x1b1   : > { %1302 = vst [vmem:[%s2060_s22 + $0x120] sm:$0xff] %v1238_v58  ;;  %v1239_v1 = vmax.f32 %v1095_v59, 0.0 }
 0x1b2   : > { %v810_v2 = vpop.f32.mrb[76].mxu0 }
 0x1b3   : > { %v2165_v3 = vpop.f32.mrb[76].mxu1  ;;  %1303 = vst [vmem:[%s2060_s22 + $0x128] sm:$0xff] %v1239_v1  ;;  %v811_v61 = vadd.f32 %v2046_v25, %v810_v2  ;;  %v812_v6 = vpop.f32.mrb[77].mxu0 }
 0x1b4   : > { %v2169_v9 = vpop.f32.mrb[77].mxu1  ;;  %v813_v34 = vpop.f32.mrb[78].mxu0 }
 0x1b5   : > { %v2171_v47 = vpop.f32.mrb[78].mxu1  ;;  %v1100_v15 = vadd.f32 %v1506_v11, %v811_v61  ;;  %v814_v39 = vadd.f32 %v2046_v25, %v813_v34  ;;  %v815_v7 = vpop.f32.mrb[79].mxu0 }
 0x1b6   : > { %v2174_v10 = vpop.f32.mrb[79].mxu1 }
 0x1b7   : > { %v1240_v14 = vmax.f32 %v1100_v15, 0.0  ;;  %v1103_v17 = vadd.f32 %v1507_v41, %v814_v39 }
 0x1b9   : > { %1304 = vst [vmem:[%s2060_s22 + $0x130] sm:$0xff] %v1240_v14  ;;  %v1241_v35 = vmax.f32 %v1103_v17, 0.0 }
 0x1ba   : > { %v818_v22 = vpop.f32.mrb[80].mxu0 }
 0x1bb   : > { %v1518_v19 = vpop.f32.mrb[80].mxu1  ;;  %1305 = vst [vmem:[%s2060_s22 + $0x138] sm:$0xff] %v1241_v35  ;;  %v819_v51 = vadd.f32 %v2046_v25, %v818_v22  ;;  %v820_v33 = vpop.f32.mrb[81].mxu0 }
 0x1bc   : > { %v1148_v11 = vadd.f32 %v1518_v19, %v859_v18  ;;  %v1139_v43 = vpop.f32.mrb[81].mxu1  ;;  %v821_v38 = vpop.f32.mrb[82].mxu0  ;;  %v883_v19 = vadd.f32 %v2046_v25, %v2013_v56 }
 0x1bd   : > { %v1140_v37 = vadd.f32 %v1139_v43, %v851_v21  ;;  %v1519_v41 = vpop.f32.mrb[82].mxu1  ;;  %v1108_v24 = vadd.f32 %v1107_v13, %v819_v51  ;;  %v822_v36 = vadd.f32 %v2046_v25, %v821_v38  ;;  %v823_v62 = vpop.f32.mrb[83].mxu0 }
 0x1be   : > { %v1252_v29 = vmax.f32 %v1148_v11, 0.0  ;;  %v1151_v42 = vadd.f32 %v1519_v41, %v862_v26  ;;  %v1142_v63 = vpop.f32.mrb[83].mxu1  ;;  %v894_v11 = vadd.f32 %v2046_v25, %v2025_v5 }
 0x1bf   : > { %v1250_v30 = vmax.f32 %v1140_v37, 0.0  ;;  %v1143_v45 = vadd.f32 %v1142_v63, %v854_v32  ;;  %v1242_v55 = vmax.f32 %v1108_v24, 0.0  ;;  %v1111_v28 = vadd.f32 %v1110_v57, %v822_v36 }
 0x1c0   : > { %1316 = vst [vmem:[%s2060_s22 + $0x190] sm:$0xff] %v1252_v29  ;;  %v1253_v46 = vmax.f32 %v1151_v42, 0.0 }
 0x1c1   : > { %1314 = vst [vmem:[%s2060_s22 + $0x180] sm:$0xff] %v1250_v30  ;;  %v1251_v49 = vmax.f32 %v1143_v45, 0.0  ;;  %1306 = vst [vmem:[%s2060_s22 + $0x140] sm:$0xff] %v1242_v55  ;;  %v1243_v13 = vmax.f32 %v1111_v28, 0.0 }
 0x1c2   : > { %1317 = vst [vmem:[%s2060_s22 + $0x198] sm:$0xff] %v1253_v46  ;;  %v826_v31 = vpop.f32.mrb[84].mxu0  ;;  %v899_v46 = vadd.f32 %v2046_v25, %v2029_v8 }
 0x1c3   : > { %1315 = vst [vmem:[%s2060_s22 + $0x188] sm:$0xff] %v1251_v49  ;;  %v1522_v27 = vpop.f32.mrb[84].mxu1  ;;  %1307 = vst [vmem:[%s2060_s22 + $0x148] sm:$0xff] %v1243_v13  ;;  %v827_v57 = vadd.f32 %v2046_v25, %v826_v31  ;;  %v828_v59 = vpop.f32.mrb[85].mxu0  ;;  %v910_v13 = vadd.f32 %v2046_v25, %v2041_v20 }
 0x1c4   : > { %v1164_v58 = vadd.f32 %v1522_v27, %v875_v50  ;;  %v1155_v1 = vpop.f32.mrb[85].mxu1  ;;  %v829_v61 = vpop.f32.mrb[86].mxu0 }
 0x1c5   : > { %v1156_v2 = vadd.f32 %v1155_v1, %v867_v53  ;;  %v1523_v40 = vpop.f32.mrb[86].mxu1  ;;  %v1116_v6 = vadd.f32 %v2157_v23, %v827_v57  ;;  %v830_v52 = vadd.f32 %v2046_v25, %v829_v61  ;;  %v831_v39 = vpop.f32.mrb[87].mxu0  ;;  %v891_v23 = vadd.f32 %v2046_v25, %v2021_v0 }
 0x1c6   : > { %v1256_v34 = vmax.f32 %v1164_v58, 0.0  ;;  %v1167_v15 = vadd.f32 %v1523_v40, %v878_v4  ;;  %v1158_v7 = vpop.f32.mrb[87].mxu1  ;;  %v886_v0 = vadd.f32 %v2046_v25, %v2017_v60 }
 0x1c7   : > { %v1254_v14 = vmax.f32 %v1156_v2, 0.0  ;;  %v1159_v17 = vadd.f32 %v1158_v7, %v870_v48  ;;  %v1244_v18 = vmax.f32 %v1116_v6, 0.0  ;;  %v1119_v44 = vadd.f32 %v2161_v54, %v830_v52 }
 0x1c8   : > { %1320 = vst [vmem:[%s2060_s22 + $0x1b0] sm:$0xff] %v1256_v34  ;;  %v1257_v35 = vmax.f32 %v1167_v15, 0.0 }
 0x1c9   : > { %1318 = vst [vmem:[%s2060_s22 + $0x1a0] sm:$0xff] %v1254_v14  ;;  %v1255_v21 = vmax.f32 %v1159_v17, 0.0  ;;  %1308 = vst [vmem:[%s2060_s22 + $0x150] sm:$0xff] %v1244_v18  ;;  %v1245_v22 = vmax.f32 %v1119_v44, 0.0 }
 0x1ca   : > { %1321 = vst [vmem:[%s2060_s22 + $0x1b8] sm:$0xff] %v1257_v35  ;;  %v834_v26 = vpop.f32.mrb[88].mxu0 }
 0x1cb   : > { %1319 = vst [vmem:[%s2060_s22 + $0x1a8] sm:$0xff] %v1255_v21  ;;  %v1526_v51 = vpop.f32.mrb[88].mxu1  ;;  %1309 = vst [vmem:[%s2060_s22 + $0x158] sm:$0xff] %v1245_v22  ;;  %v835_v54 = vadd.f32 %v2046_v25, %v834_v26  ;;  %v836_v43 = vpop.f32.mrb[89].mxu0 }
 0x1cc   : > { %v1180_v33 = vadd.f32 %v1526_v51, %v891_v23  ;;  %v1171_v32 = vpop.f32.mrb[89].mxu1  ;;  %v837_v38 = vpop.f32.mrb[90].mxu0 }
 0x1cd   : > { %v1172_v37 = vadd.f32 %v1171_v32, %v883_v19  ;;  %v1527_v56 = vpop.f32.mrb[90].mxu1  ;;  %v1124_v41 = vadd.f32 %v2169_v9, %v835_v54  ;;  %v838_v5 = vadd.f32 %v2046_v25, %v837_v38  ;;  %v839_v36 = vpop.f32.mrb[91].mxu0  ;;  %v907_v9 = vadd.f32 %v2046_v25, %v2037_v16 }
 0x1ce   : > { %v1260_v24 = vmax.f32 %v1180_v33, 0.0  ;;  %v1183_v29 = vadd.f32 %v1527_v56, %v894_v11  ;;  %v1174_v42 = vpop.f32.mrb[91].mxu1  ;;  %v902_v16 = vadd.f32 %v2046_v25, %v2033_v12 }
 0x1cf   : > { %v1258_v62 = vmax.f32 %v1172_v37, 0.0  ;;  %v1175_v63 = vadd.f32 %v1174_v42, %v886_v0  ;;  %v1246_v30 = vmax.f32 %v1124_v41, 0.0  ;;  %v1127_v60 = vadd.f32 %v2174_v10, %v838_v5 }
 0x1d0   : > { %1324 = vst [vmem:[%s2060_s22 + $0x1d0] sm:$0xff] %v1260_v24  ;;  %v1261_v45 = vmax.f32 %v1183_v29, 0.0 }
 0x1d1   : > { %1322 = vst [vmem:[%s2060_s22 + $0x1c0] sm:$0xff] %v1258_v62  ;;  %v1259_v55 = vmax.f32 %v1175_v63, 0.0  ;;  %1310 = vst [vmem:[%s2060_s22 + $0x160] sm:$0xff] %v1246_v30  ;;  %v1247_v28 = vmax.f32 %v1127_v60, 0.0 }
 0x1d2   : > { %1325 = vst [vmem:[%s2060_s22 + $0x1d8] sm:$0xff] %v1261_v45  ;;  %v842_v49 = vpop.f32.mrb[92].mxu0 }
 0x1d3   : > { %1323 = vst [vmem:[%s2060_s22 + $0x1c8] sm:$0xff] %v1259_v55  ;;  %v1530_v50 = vpop.f32.mrb[92].mxu1  ;;  %1311 = vst [vmem:[%s2060_s22 + $0x168] sm:$0xff] %v1247_v28  ;;  %v843_v10 = vadd.f32 %v2046_v25, %v842_v49  ;;  %v844_v31 = vpop.f32.mrb[93].mxu0 }
 0x1d4   : > { %v1196_v53 = vadd.f32 %v1530_v50, %v907_v9  ;;  %v1187_v27 = vpop.f32.mrb[93].mxu1  ;;  %v845_v57 = vpop.f32.mrb[94].mxu0 }
 0x1d5   : > { %v1188_v4 = vadd.f32 %v1187_v27, %v899_v46  ;;  %v1531_v8 = vpop.f32.mrb[94].mxu1  ;;  %v1132_v58 = vadd.f32 %v2165_v3, %v843_v10  ;;  %v846_v20 = vadd.f32 %v2046_v25, %v845_v57  ;;  %v847_v48 = vpop.f32.mrb[95].mxu0 }
 0x1d6   : > { %v1264_v59 = vmax.f32 %v1196_v53, 0.0  ;;  %v1199_v1 = vadd.f32 %v1531_v8, %v910_v13  ;;  %v1190_v2 = vpop.f32.mrb[95].mxu1 }
 0x1d7   : > { %v1262_v61 = vmax.f32 %v1188_v4, 0.0  ;;  %v1191_v40 = vadd.f32 %v1190_v2, %v902_v16  ;;  %v1248_v6 = vmax.f32 %v1132_v58, 0.0  ;;  %v1135_v12 = vadd.f32 %v2171_v47, %v846_v20 }
 0x1d8   : > { %1328 = vst [vmem:[%s2060_s22 + $0x1f0] sm:$0xff] %v1264_v59  ;;  %v1265_v34 = vmax.f32 %v1199_v1, 0.0 }
 0x1d9   : > { %1326 = vst [vmem:[%s2060_s22 + $0x1e0] sm:$0xff] %v1262_v61  ;;  %v1263_v52 = vmax.f32 %v1191_v40, 0.0  ;;  %1312 = vst [vmem:[%s2060_s22 + $0x170] sm:$0xff] %v1248_v6  ;;  %v1249_v3 = vmax.f32 %v1135_v12, 0.0 }
 0x1da   : > { %1329 = vst [vmem:[%s2060_s22 + $0x1f8] sm:$0xff] %v1265_v34 }
 0x1db   : > { %1327 = vst [vmem:[%s2060_s22 + $0x1e8] sm:$0xff] %v1263_v52  ;;  %1313 = vst [vmem:[%s2060_s22 + $0x178] sm:$0xff] %v1249_v3 }
 0x1dc PF: > { %s13_s12 = sadd.s32 1, %s1580_s12  }
 0x1dd   : > { %p10_p4 = scmp.ge.s32.totalorder %s13_s12, 4  }
 0x1df   :  { %12 = sbr.rel (!%p10_p4) target bundleno = 1 (0x1), region = 62 }

// kernel: image_decoder_forward.8
= control target key start
LH: loop header
LB: loop body
LE: loop exit
PB: predicated region body
PF: predicated region fallthrough
CT: control target
= control target key end

     0   :  { %s2756_s12 = smov 0   ;;  %s3947_s0 = inlined_call_operand.vmem [shape: f32[4096,288], index: 0, kind: input, shape index: {}]   ;;  %s3948_s1 = inlined_call_operand.vmem [shape: f32[288,128], index: 1, kind: input, shape index: {}]   ;;  %s3949_s2 = inlined_call_operand.vmem [shape: f32[1,128], index: 2, kind: input, shape index: {}]   ;;  %s3950_s3 = inlined_call_operand.vmem [shape: f32[4096,128], index: 3, kind: output, shape index: {}]  }
   0x1 LB: > { %s2410_s13 = sadd.s32 4294967295, %s2733_s12   ;;  %p2414_p0 = scmp.ge.s32.totalorder %s2733_s12, 1  ;;  %s2733_s12 = sphi %s2756_s12, %s13_s12  }
   0x2   : > { %p139_p1 = scmp.lt.s32.totalorder %s2733_s12, 5 }
   0x4   : > { %p140_p2 = pnand %p2414_p0, %p139_p1 }
   0x6   : > { %143 = sbr.rel (%p140_p2) target bundleno = 676 (0x2a4), region = 32 }
   0xd   : > { %v754_v0 = vld [vmem:[%s3948_s1] sm:$0xff]  ;;  %v755_v1 = vld [vmem:[%s3948_s1 + $0x8] sm:$0xff]  ;;  %v756_v2 = vld [vmem:[%s3948_s1 + $0x10] sm:$0xff]  ;;  %s2415_s20 = sshll.u32 %s2410_s13, 7  ;;  %v2735_v3 = vmov 0   ;;  %vm815_vm0 = vcmask 261120  }
   0xe   : > { %1008 = vmatprep.subr.bf16.mxu0 %v2735_v3  ;;  %2684 = vmatprep.subr.bf16.mxu1 %v2735_v3  ;;  %v790_v4 = vpack.c.bf16 %v755_v1, %v754_v0  ;;  %v757_v5 = vld [vmem:[%s3948_s1 + $0x18] sm:$0xff]  ;;  %p165_p3 = scmp.lt.s32.totalorder %s2415_s20, 511  ;;  %v758_v7 = vld [vmem:[%s3948_s1 + $0x20] sm:$0xff]  ;;  %v759_v8 = vld [vmem:[%s3948_s1 + $0x28] sm:$0xff] }
   0xf   : > { %v791_v6 = vpack.c.bf16 %v757_v5, %v756_v2  ;;  %v792_v9 = vpack.c.bf16 %v759_v8, %v758_v7  ;;  %v760_v10 = vld [vmem:[%s3948_s1 + $0x30] sm:$0xff]  ;;  %v761_v11 = vld [vmem:[%s3948_s1 + $0x38] sm:$0xff]  ;;  %v762_v17 = vld [vmem:[%s3948_s1 + $0x40] sm:$0xff] }
  0x10   : > { %1009 = vmatpush1.bf16.msra.mxu0 %v790_v4  ;;  %2700 = vmatpush1.bf16.msra.mxu1 %v790_v4  ;;  %s3996_s20 = smov (!%p165_p3, %s2415_s20), 511  ;;  %v793_v13 = vpack.c.bf16 %v761_v11, %v760_v10  ;;  %v763_v18 = vld [vmem:[%s3948_s1 + $0x48] sm:$0xff]  ;;  %v764_v22 = vld [vmem:[%s3948_s1 + $0x50] sm:$0xff]  ;;  %v765_v23 = vld [vmem:[%s3948_s1 + $0x58] sm:$0xff] }
  0x11   : > { %1010 = vmatprep.subr.bf16.mxu0 %v2735_v3  ;;  %2685 = vmatprep.subr.bf16.mxu1 %v2735_v3  ;;  %s2716_s27 = smul.u32 24, %s3996_s20  ;;  %v794_v21 = vpack.c.bf16 %v763_v18, %v762_v17  ;;  %v795_v24 = vpack.c.bf16 %v765_v23, %v764_v22  ;;  %v766_v25 = vld [vmem:[%s3948_s1 + $0x60] sm:$0xff]  ;;  %v767_v26 = vld [vmem:[%s3948_s1 + $0x68] sm:$0xff]  ;;  %v768_v28 = vld [vmem:[%s3948_s1 + $0x70] sm:$0xff]  ;;  %s2418_s19 = sshll.u32 %s3996_s20, 3 }
  0x12   : > { %v796_v27 = vpack.c.bf16 %v767_v26, %v766_v25  ;;  %v769_v29 = vld [vmem:[%s3948_s1 + $0x78] sm:$0xff]  ;;  %v770_v31 = vld [vmem:[%s3948_s1 + $0x80] sm:$0xff]  ;;  %v771_v32 = vld [vmem:[%s3948_s1 + $0x88] sm:$0xff]  ;;  %s3470_s22 = scalar_lea.vmem %s3950_s3, %s2418_s19 }
  0x13   : > { %s2792_s30 = scalar_lea.vmem %s3947_s0, %s2716_s27  ;;  %v797_v30 = vpack.c.bf16 %v769_v29, %v768_v28  ;;  %v798_v33 = vpack.c.bf16 %v771_v32, %v770_v31  ;;  %v772_v34 = vld [vmem:[%s3948_s1 + $0x90] sm:$0xff]  ;;  %v773_v35 = vld [vmem:[%s3948_s1 + $0x98] sm:$0xff]  ;;  %v774_v37 = vld [vmem:[%s3948_s1 + $0xa0] sm:$0xff] }
  0x14   : > { %1011 = vmatpush1.bf16.msra.mxu0 %v791_v6  ;;  %2701 = vmatpush1.bf16.msra.mxu1 %v791_v6  ;;  %v179_v12 = vld [vmem:[%s2792_s30 + $0x8] sm:$0xff]  ;;  %v182_v14 = vld [vmem:[%s2792_s30 + $0x20] sm:$0xff]  ;;  %v799_v36 = vpack.c.bf16 %v773_v35, %v772_v34  ;;  %v776_v40 = vld [vmem:[%s3948_s1 + $0xb0] sm:$0xff] }
  0x15   : > { %1012 = vmatprep.subr.bf16.mxu0 %v2735_v3  ;;  %2686 = vmatprep.subr.bf16.mxu1 %v2735_v3  ;;  %v467_v15 = vld [vmem:[%s2792_s30 + $0x908] sm:$0xff]  ;;  %v470_v16 = vld [vmem:[%s2792_s30 + $0x920] sm:$0xff]  ;;  %v563_v19 = vpack.c.bf16 %v182_v14, %v179_v12  ;;  %v777_v41 = vld [vmem:[%s3948_s1 + $0xb8] sm:$0xff] }
  0x16   : > { %v707_v20 = vpack.c.bf16 %v470_v16, %v467_v15  ;;  %v775_v38 = vld [vmem:[%s3948_s1 + $0xa8] sm:$0xff]  ;;  %v801_v42 = vpack.c.bf16 %v777_v41, %v776_v40  ;;  %v778_v43 = vld [vmem:[%s3948_s1 + $0xc0] sm:$0xff]  ;;  %v780_v46 = vld [vmem:[%s3948_s1 + $0xd0] sm:$0xff] }
  0x17   : > { %1040 = vmatprep.mubr.bf16.mxu0 %v563_v19  ;;  %v800_v39 = vpack.c.bf16 %v775_v38, %v774_v37  ;;  %v779_v44 = vld [vmem:[%s3948_s1 + $0xc8] sm:$0xff]  ;;  %v781_v47 = vld [vmem:[%s3948_s1 + $0xd8] sm:$0xff]  ;;  %v782_v49 = vld [vmem:[%s3948_s1 + $0xe0] sm:$0xff] }
  0x18   : > { %1013 = vmatpush1.bf16.msra.mxu0 %v792_v9  ;;  %2702 = vmatpush1.bf16.msra.mxu1 %v792_v9  ;;  %v802_v45 = vpack.c.bf16 %v779_v44, %v778_v43  ;;  %v803_v48 = vpack.c.bf16 %v781_v47, %v780_v46  ;;  %v783_v50 = vld [vmem:[%s3948_s1 + $0xe8] sm:$0xff]  ;;  %v784_v52 = vld [vmem:[%s3948_s1 + $0xf0] sm:$0xff]  ;;  %v785_v53 = vld [vmem:[%s3948_s1 + $0xf8] sm:$0xff] }
  0x19   : > { %1014 = vmatprep.subr.bf16.mxu0 %v2735_v3  ;;  %2687 = vmatprep.subr.bf16.mxu1 %v2735_v3  ;;  %v804_v51 = vpack.c.bf16 %v783_v50, %v782_v49  ;;  %v786_v54 = vld [vmem:[%s3948_s1 + $0x100] sm:$0xff]  ;;  %v787_v55 = vld [vmem:[%s3948_s1 + $0x108] sm:$0xff]  ;;  %v805_v57 = vpack.c.bf16 %v785_v53, %v784_v52  ;;  %v181_v58 = vld [vmem:[%s2792_s30 + $0x18] sm:$0xff] }
  0x1a   : > { %1424 = vmatprep.mubr.bf16.mxu1 %v707_v20  ;;  %v178_v56 = vld [vmem:[%s2792_s30] sm:$0xff]  ;;  %v469_v60 = vld [vmem:[%s2792_s30 + $0x918] sm:$0xff]  ;;  %v806_v61 = vpack.c.bf16 %v787_v55, %v786_v54  ;;  %v188_v63 = vld [vmem:[%s2792_s30 + $0x50] sm:$0xff] }
  0x1b   : > { %v466_v59 = vld [vmem:[%s2792_s30 + $0x900] sm:$0xff]  ;;  %v185_v62 = vld [vmem:[%s2792_s30 + $0x38] sm:$0xff]  ;;  %v476_v1 = vld [vmem:[%s2792_s30 + $0x950] sm:$0xff]  ;;  %v562_v5 = vpack.c.bf16 %v181_v58, %v178_v56 }
  0x1c   : > { %1015 = vmatpush1.bf16.msra.mxu0 %v793_v13  ;;  %2703 = vmatpush1.bf16.msra.mxu1 %v793_v13  ;;  %v473_v0 = vld [vmem:[%s2792_s30 + $0x938] sm:$0xff]  ;;  %v788_v2 = vld [vmem:[%s3948_s1 + $0x110] sm:$0xff]  ;;  %v566_v6 = vpack.c.bf16 %v188_v63, %v185_v62  ;;  %v187_v10 = vld [vmem:[%s2792_s30 + $0x48] sm:$0xff] }
  0x1d   : > { %1016 = vmatprep.subr.bf16.mxu0 %v2735_v3  ;;  %2688 = vmatprep.subr.bf16.mxu1 %v2735_v3  ;;  %v789_v4 = vld [vmem:[%s3948_s1 + $0x118] sm:$0xff]  ;;  %v710_v7 = vpack.c.bf16 %v476_v1, %v473_v0  ;;  %v184_v9 = vld [vmem:[%s2792_s30 + $0x30] sm:$0xff]  ;;  %v475_v12 = vld [vmem:[%s2792_s30 + $0x948] sm:$0xff] }
  0x1e   : > { %v807_v8 = vpack.c.bf16 %v789_v4, %v788_v2  ;;  %v472_v11 = vld [vmem:[%s2792_s30 + $0x930] sm:$0xff]  ;;  %v191_v13 = vld [vmem:[%s2792_s30 + $0x68] sm:$0xff]  ;;  %v194_v14 = vld [vmem:[%s2792_s30 + $0x80] sm:$0xff]  ;;  %v565_v17 = vpack.c.bf16 %v187_v10, %v184_v9 }
  0x1f   : > { %v479_v15 = vld [vmem:[%s2792_s30 + $0x968] sm:$0xff]  ;;  %v482_v16 = vld [vmem:[%s2792_s30 + $0x980] sm:$0xff]  ;;  %v709_v18 = vpack.c.bf16 %v475_v12, %v472_v11  ;;  %v569_v19 = vpack.c.bf16 %v194_v14, %v191_v13  ;;  %v193_v22 = vld [vmem:[%s2792_s30 + $0x78] sm:$0xff] }
  0x20   : > { %1017 = vmatpush1.bf16.msra.mxu0 %v794_v21  ;;  %2704 = vmatpush1.bf16.msra.mxu1 %v794_v21  ;;  %v713_v20 = vpack.c.bf16 %v482_v16, %v479_v15  ;;  %v190_v21 = vld [vmem:[%s2792_s30 + $0x60] sm:$0xff]  ;;  %v197_v25 = vld [vmem:[%s2792_s30 + $0x98] sm:$0xff]  ;;  %v200_v26 = vld [vmem:[%s2792_s30 + $0xb0] sm:$0xff] }
  0x21   : > { %1018 = vmatprep.subr.bf16.mxu0 %v2735_v3  ;;  %2689 = vmatprep.subr.bf16.mxu1 %v2735_v3  ;;  %v478_v23 = vld [vmem:[%s2792_s30 + $0x960] sm:$0xff]  ;;  %v488_v28 = vld [vmem:[%s2792_s30 + $0x9b0] sm:$0xff]  ;;  %v568_v29 = vpack.c.bf16 %v193_v22, %v190_v21  ;;  %v572_v31 = vpack.c.bf16 %v200_v26, %v197_v25  ;;  %v199_v34 = vld [vmem:[%s2792_s30 + $0xa8] sm:$0xff] }
  0x22   : > { %v484_v35 = vld [vmem:[%s2792_s30 + $0x990] sm:$0xff]  ;;  %v203_v37 = vld [vmem:[%s2792_s30 + $0xc8] sm:$0xff]  ;;  %v206_v38 = vld [vmem:[%s2792_s30 + $0xe0] sm:$0xff] }
  0x23   : > { %v494_v40 = vld [vmem:[%s2792_s30 + $0x9e0] sm:$0xff]  ;;  %v575_v43 = vpack.c.bf16 %v206_v38, %v203_v37  ;;  %v205_v46 = vld [vmem:[%s2792_s30 + $0xd8] sm:$0xff]  ;;  %v212_v50 = vld [vmem:[%s2792_s30 + $0x110] sm:$0xff] }
  0x24   : > { %1019 = vmatpush1.bf16.msra.mxu0 %v795_v24  ;;  %2705 = vmatpush1.bf16.msra.mxu1 %v795_v24  ;;  %v481_v24 = vld [vmem:[%s2792_s30 + $0x978] sm:$0xff]  ;;  %v490_v47 = vld [vmem:[%s2792_s30 + $0x9c0] sm:$0xff]  ;;  %v500_v52 = vld [vmem:[%s2792_s30 + $0xa10] sm:$0xff] }
  0x25   : > { %1020 = vmatprep.subr.bf16.mxu0 %v2735_v3  ;;  %2690 = vmatprep.subr.bf16.mxu1 %v2735_v3  ;;  %v209_v49 = vld [vmem:[%s2792_s30 + $0xf8] sm:$0xff]  ;;  %v211_v58 = vld [vmem:[%s2792_s30 + $0x108] sm:$0xff]  ;;  %v218_v62 = vld [vmem:[%s2792_s30 + $0x140] sm:$0xff] }
  0x26   : > { %v578_v55 = vpack.c.bf16 %v212_v50, %v209_v49  ;;  %v503_v63 = vld [vmem:[%s2792_s30 + $0xa28] sm:$0xff]  ;;  %v506_v0 = vld [vmem:[%s2792_s30 + $0xa40] sm:$0xff]  ;;  %v221_v9 = vld [vmem:[%s2792_s30 + $0x158] sm:$0xff] }
  0x27   : > { %v224_v10 = vld [vmem:[%s2792_s30 + $0x170] sm:$0xff]  ;;  %v509_v11 = vld [vmem:[%s2792_s30 + $0xa58] sm:$0xff]  ;;  %v227_v21 = vld [vmem:[%s2792_s30 + $0x188] sm:$0xff] }
  0x28   : > { %1021 = vmatpush1.bf16.msra.mxu0 %v796_v27  ;;  %2706 = vmatpush1.bf16.msra.mxu1 %v796_v27  ;;  %v485_v27 = vld [vmem:[%s2792_s30 + $0x998] sm:$0xff]  ;;  %v512_v12 = vld [vmem:[%s2792_s30 + $0xa70] sm:$0xff]  ;;  %v584_v15 = vpack.c.bf16 %v224_v10, %v221_v9  ;;  %v230_v22 = vld [vmem:[%s2792_s30 + $0x1a0] sm:$0xff] }
  0x29   : > { %1022 = vmatprep.subr.bf16.mxu0 %v2735_v3  ;;  %2691 = vmatprep.subr.bf16.mxu1 %v2735_v3  ;;  %v716_v32 = vpack.c.bf16 %v488_v28, %v485_v27  ;;  %v728_v16 = vpack.c.bf16 %v512_v12, %v509_v11  ;;  %v587_v27 = vpack.c.bf16 %v230_v22, %v227_v21 }
  0x2c   : > { %1023 = vmatpush1.bf16.msra.mxu0 %v797_v30  ;;  %2707 = vmatpush1.bf16.msra.mxu1 %v797_v30  ;;  %v712_v30 = vpack.c.bf16 %v481_v24, %v478_v23  ;;  %v515_v23 = vld [vmem:[%s2792_s30 + $0xa88] sm:$0xff]  ;;  %v518_v24 = vld [vmem:[%s2792_s30 + $0xaa0] sm:$0xff] }
  0x2d   : > { %1024 = vmatprep.subr.bf16.mxu0 %v2735_v3  ;;  %2692 = vmatprep.subr.bf16.mxu1 %v2735_v3  ;;  %v731_v28 = vpack.c.bf16 %v518_v24, %v515_v23 }
  0x30   : > { %1025 = vmatpush1.bf16.msra.mxu0 %v798_v33  ;;  %2708 = vmatpush1.bf16.msra.mxu1 %v798_v33  ;;  %v196_v33 = vld [vmem:[%s2792_s30 + $0x90] sm:$0xff] }
  0x31   : > { %1026 = vmatprep.subr.bf16.mxu0 %v2735_v3  ;;  %2693 = vmatprep.subr.bf16.mxu1 %v2735_v3  ;;  %v571_v41 = vpack.c.bf16 %v199_v34, %v196_v33  ;;  %v233_v33 = vld [vmem:[%s2792_s30 + $0x1b8] sm:$0xff]  ;;  %v236_v34 = vld [vmem:[%s2792_s30 + $0x1d0] sm:$0xff] }
  0x34   : > { %1027 = vmatpush1.bf16.msra.mxu0 %v799_v36  ;;  %2709 = vmatpush1.bf16.msra.mxu1 %v799_v36  ;;  %v487_v36 = vld [vmem:[%s2792_s30 + $0x9a8] sm:$0xff] }
  0x35   : > { %1028 = vmatprep.subr.bf16.mxu0 %v2735_v3  ;;  %2694 = vmatprep.subr.bf16.mxu1 %v2735_v3 }
  0x38   : > { %1029 = vmatpush1.bf16.msra.mxu0 %v800_v39  ;;  %2710 = vmatpush1.bf16.msra.mxu1 %v800_v39  ;;  %v491_v39 = vld [vmem:[%s2792_s30 + $0x9c8] sm:$0xff] }
  0x39   : > { %1030 = vmatprep.subr.bf16.mxu0 %v2735_v3  ;;  %2695 = vmatprep.subr.bf16.mxu1 %v2735_v3  ;;  %v719_v44 = vpack.c.bf16 %v494_v40, %v491_v39  ;;  %v590_v39 = vpack.c.bf16 %v236_v34, %v233_v33 }
  0x3c   : > { %1031 = vmatpush1.bf16.msra.mxu0 %v801_v42  ;;  %2711 = vmatpush1.bf16.msra.mxu1 %v801_v42  ;;  %v715_v42 = vpack.c.bf16 %v487_v36, %v484_v35  ;;  %v521_v35 = vld [vmem:[%s2792_s30 + $0xab8] sm:$0xff]  ;;  %v524_v36 = vld [vmem:[%s2792_s30 + $0xad0] sm:$0xff] }
  0x3d   : > { %1032 = vmatprep.subr.bf16.mxu0 %v2735_v3  ;;  %2696 = vmatprep.subr.bf16.mxu1 %v2735_v3  ;;  %v734_v40 = vpack.c.bf16 %v524_v36, %v521_v35 }
  0x40   : > { %1033 = vmatpush1.bf16.msra.mxu0 %v802_v45  ;;  %2712 = vmatpush1.bf16.msra.mxu1 %v802_v45  ;;  %v202_v45 = vld [vmem:[%s2792_s30 + $0xc0] sm:$0xff] }
  0x41   : > { %1034 = vmatprep.subr.bf16.mxu0 %v2735_v3  ;;  %2697 = vmatprep.subr.bf16.mxu1 %v2735_v3  ;;  %v574_v53 = vpack.c.bf16 %v205_v46, %v202_v45  ;;  %v239_v45 = vld [vmem:[%s2792_s30 + $0x1e8] sm:$0xff]  ;;  %v242_v46 = vld [vmem:[%s2792_s30 + $0x200] sm:$0xff] }
  0x44   : > { %1035 = vmatpush1.bf16.msra.mxu0 %v803_v48  ;;  %2713 = vmatpush1.bf16.msra.mxu1 %v803_v48  ;;  %v493_v48 = vld [vmem:[%s2792_s30 + $0x9d8] sm:$0xff] }
  0x45   : > { %1036 = vmatprep.subr.bf16.mxu0 %v2735_v3  ;;  %2698 = vmatprep.subr.bf16.mxu1 %v2735_v3  ;;  %v718_v54 = vpack.c.bf16 %v493_v48, %v490_v47  ;;  %v527_v47 = vld [vmem:[%s2792_s30 + $0xae8] sm:$0xff]  ;;  %v530_v48 = vld [vmem:[%s2792_s30 + $0xb00] sm:$0xff] }
  0x48   : > { %1037 = vmatpush1.bf16.msra.mxu0 %v804_v51  ;;  %2714 = vmatpush1.bf16.msra.mxu1 %v804_v51  ;;  %v497_v51 = vld [vmem:[%s2792_s30 + $0x9f8] sm:$0xff] }
  0x49   : > { %1038 = vmatprep.subr.bf16.mxu0 %v2735_v3  ;;  %2699 = vmatprep.subr.bf16.mxu1 %v2735_v3  ;;  %v706_v3 = vpack.c.bf16 %v469_v60, %v466_v59  ;;  %v722_v56 = vpack.c.bf16 %v500_v52, %v497_v51  ;;  %v496_v59 = vld [vmem:[%s2792_s30 + $0x9f0] sm:$0xff]  ;;  %v499_v60 = vld [vmem:[%s2792_s30 + $0xa08] sm:$0xff]  ;;  %v593_v51 = vpack.c.bf16 %v242_v46, %v239_v45 }
  0x4a   : > { %v721_v2 = vpack.c.bf16 %v499_v60, %v496_v59  ;;  %v737_v52 = vpack.c.bf16 %v530_v48, %v527_v47  ;;  %v533_v59 = vld [vmem:[%s2792_s30 + $0xb18] sm:$0xff]  ;;  %v536_v60 = vld [vmem:[%s2792_s30 + $0xb30] sm:$0xff] }
  0x4c   : > { %1039 = vmatpush1.bf16.msra.mxu0 %v805_v57  ;;  %2715 = vmatpush1.bf16.msra.mxu1 %v805_v57  ;;  %v208_v57 = vld [vmem:[%s2792_s30 + $0xf0] sm:$0xff] }
  0x4d   : > { %2552 = vmatprep.subr.bf16.mxu1 %v806_v61  ;;  %v577_v1 = vpack.c.bf16 %v211_v58, %v208_v57  ;;  %v245_v57 = vld [vmem:[%s2792_s30 + $0x218] sm:$0xff]  ;;  %v248_v58 = vld [vmem:[%s2792_s30 + $0x230] sm:$0xff] }
  0x4f   : > { %1041 = vmatmul.mubr.bf16.vlgmr.msra.gmra.mrb[0].mxu0 %v562_v5  ;;  %1425 = vmatmul.mubr.bf16.vlgmr.msra.gmra.mrb[0].mxu1 %v706_v3  ;;  %v725_v5 = vpack.c.bf16 %v506_v0, %v503_v63  ;;  %v214_v3 = vld [vmem:[%s2792_s30 + $0x120] sm:$0xff]  ;;  %v596_v63 = vpack.c.bf16 %v248_v58, %v245_v57  ;;  %v740_v0 = vpack.c.bf16 %v536_v60, %v533_v59 }
  0x50   : > { %2553 = vmatpush3.bf16.msra.mxu1 %v806_v61  ;;  %1048 = vmatprep.mubr.bf16.mxu0 %v566_v6  ;;  %v215_v61 = vld [vmem:[%s2792_s30 + $0x128] sm:$0xff]  ;;  %v217_v6 = vld [vmem:[%s2792_s30 + $0x138] sm:$0xff] }
  0x51   : > { %1432 = vmatprep.mubr.bf16.mxu1 %v710_v7  ;;  %2554 = vmatprep.subr.bf16.mxu1 %v807_v8  ;;  %v581_v4 = vpack.c.bf16 %v218_v62, %v215_v61  ;;  %v502_v7 = vld [vmem:[%s2792_s30 + $0xa20] sm:$0xff]  ;;  %v580_v13 = vpack.c.bf16 %v217_v6, %v214_v3  ;;  %v251_v3 = vld [vmem:[%s2792_s30 + $0x248] sm:$0xff] }
  0x52   : > { %v254_v6 = vld [vmem:[%s2792_s30 + $0x260] sm:$0xff] }
  0x53   : > { %v599_v11 = vpack.c.bf16 %v254_v6, %v251_v3 }
  0x54   : > { %2555 = vmatpush3.bf16.msra.mxu1 %v807_v8  ;;  %v505_v8 = vld [vmem:[%s2792_s30 + $0xa38] sm:$0xff] }
  0x55   : > { %v724_v14 = vpack.c.bf16 %v505_v8, %v502_v7  ;;  %v539_v7 = vld [vmem:[%s2792_s30 + $0xb48] sm:$0xff]  ;;  %v542_v8 = vld [vmem:[%s2792_s30 + $0xb60] sm:$0xff] }
  0x56   : > { %v743_v12 = vpack.c.bf16 %v542_v8, %v539_v7 }
  0x57   : > { %1049 = vmatmul.mubr.bf16.gmra.mrb[4].mxu0 %v565_v17  ;;  %1433 = vmatmul.mubr.bf16.gmra.mrb[4].mxu1 %v709_v18  ;;  %v220_v17 = vld [vmem:[%s2792_s30 + $0x150] sm:$0xff]  ;;  %v223_v18 = vld [vmem:[%s2792_s30 + $0x168] sm:$0xff] }
  0x58   : > { %1056 = vmatprep.mubr.bf16.mxu0 %v569_v19  ;;  %1440 = vmatprep.mubr.bf16.mxu1 %v713_v20  ;;  %v508_v19 = vld [vmem:[%s2792_s30 + $0xa50] sm:$0xff]  ;;  %v511_v20 = vld [vmem:[%s2792_s30 + $0xa68] sm:$0xff]  ;;  %v583_v25 = vpack.c.bf16 %v223_v18, %v220_v17  ;;  %v257_v17 = vld [vmem:[%s2792_s30 + $0x278] sm:$0xff] }
  0x59   : > { %v727_v26 = vpack.c.bf16 %v511_v20, %v508_v19  ;;  %v260_v18 = vld [vmem:[%s2792_s30 + $0x290] sm:$0xff]  ;;  %v545_v19 = vld [vmem:[%s2792_s30 + $0xb78] sm:$0xff] }
  0x5a   : > { %v548_v20 = vld [vmem:[%s2792_s30 + $0xb90] sm:$0xff]  ;;  %v602_v23 = vpack.c.bf16 %v260_v18, %v257_v17 }
  0x5b   : > { %v746_v24 = vpack.c.bf16 %v548_v20, %v545_v19 }
  0x5f   : > { %1057 = vmatmul.mubr.bf16.gmra.mrb[8].mxu0 %v568_v29  ;;  %1441 = vmatmul.mubr.bf16.gmra.mrb[8].mxu1 %v712_v30  ;;  %v226_v29 = vld [vmem:[%s2792_s30 + $0x180] sm:$0xff]  ;;  %v229_v30 = vld [vmem:[%s2792_s30 + $0x198] sm:$0xff] }
  0x60   : > { %1064 = vmatprep.mubr.bf16.mxu0 %v572_v31  ;;  %1448 = vmatprep.mubr.bf16.mxu1 %v716_v32  ;;  %v514_v31 = vld [vmem:[%s2792_s30 + $0xa80] sm:$0xff]  ;;  %v517_v32 = vld [vmem:[%s2792_s30 + $0xa98] sm:$0xff]  ;;  %v586_v37 = vpack.c.bf16 %v229_v30, %v226_v29  ;;  %v263_v29 = vld [vmem:[%s2792_s30 + $0x2a8] sm:$0xff] }
  0x61   : > { %v730_v38 = vpack.c.bf16 %v517_v32, %v514_v31  ;;  %v266_v30 = vld [vmem:[%s2792_s30 + $0x2c0] sm:$0xff]  ;;  %v551_v31 = vld [vmem:[%s2792_s30 + $0xba8] sm:$0xff] }
  0x62   : > { %v554_v32 = vld [vmem:[%s2792_s30 + $0xbc0] sm:$0xff]  ;;  %v605_v35 = vpack.c.bf16 %v266_v30, %v263_v29 }
  0x63   : > { %v749_v36 = vpack.c.bf16 %v554_v32, %v551_v31 }
  0x67   : > { %1065 = vmatmul.mubr.bf16.gmra.mrb[12].mxu0 %v571_v41  ;;  %1449 = vmatmul.mubr.bf16.gmra.mrb[12].mxu1 %v715_v42  ;;  %v232_v41 = vld [vmem:[%s2792_s30 + $0x1b0] sm:$0xff]  ;;  %v235_v42 = vld [vmem:[%s2792_s30 + $0x1c8] sm:$0xff] }
  0x68   : > { %1072 = vmatprep.mubr.bf16.mxu0 %v575_v43  ;;  %1456 = vmatprep.mubr.bf16.mxu1 %v719_v44  ;;  %v520_v43 = vld [vmem:[%s2792_s30 + $0xab0] sm:$0xff]  ;;  %v523_v44 = vld [vmem:[%s2792_s30 + $0xac8] sm:$0xff]  ;;  %v589_v49 = vpack.c.bf16 %v235_v42, %v232_v41  ;;  %v269_v41 = vld [vmem:[%s2792_s30 + $0x2d8] sm:$0xff] }
  0x69   : > { %v733_v50 = vpack.c.bf16 %v523_v44, %v520_v43  ;;  %v272_v42 = vld [vmem:[%s2792_s30 + $0x2f0] sm:$0xff]  ;;  %v557_v43 = vld [vmem:[%s2792_s30 + $0xbd8] sm:$0xff] }
  0x6a   : > { %v560_v44 = vld [vmem:[%s2792_s30 + $0xbf0] sm:$0xff]  ;;  %v608_v47 = vpack.c.bf16 %v272_v42, %v269_v41 }
  0x6b   : > { %v752_v48 = vpack.c.bf16 %v560_v44, %v557_v43 }
  0x6f   : > { %1073 = vmatmul.mubr.bf16.gmra.mrb[16].mxu0 %v574_v53  ;;  %1457 = vmatmul.mubr.bf16.gmra.mrb[16].mxu1 %v718_v54  ;;  %v238_v53 = vld [vmem:[%s2792_s30 + $0x1e0] sm:$0xff]  ;;  %v241_v54 = vld [vmem:[%s2792_s30 + $0x1f8] sm:$0xff] }
  0x70   : > { %1080 = vmatprep.mubr.bf16.mxu0 %v578_v55  ;;  %1464 = vmatprep.mubr.bf16.mxu1 %v722_v56  ;;  %v526_v55 = vld [vmem:[%s2792_s30 + $0xae0] sm:$0xff]  ;;  %v529_v56 = vld [vmem:[%s2792_s30 + $0xaf8] sm:$0xff]  ;;  %v592_v61 = vpack.c.bf16 %v241_v54, %v238_v53  ;;  %v275_v53 = vld [vmem:[%s2792_s30 + $0x308] sm:$0xff] }
  0x71   : > { %v736_v62 = vpack.c.bf16 %v529_v56, %v526_v55  ;;  %v278_v54 = vld [vmem:[%s2792_s30 + $0x320] sm:$0xff]  ;;  %v180_v55 = vld [vmem:[%s2792_s30 + $0x10] sm:$0xff]  ;;  %v183_v56 = vld [vmem:[%s2792_s30 + $0x28] sm:$0xff] }
  0x72   : > { %v611_v59 = vpack.c.bf16 %v278_v54, %v275_v53  ;;  %v564_v60 = vpack.c.bf16 %v183_v56, %v180_v55 }
  0x77   : > { %1081 = vmatmul.mubr.bf16.gmra.mrb[20].mxu0 %v577_v1  ;;  %1465 = vmatmul.mubr.bf16.gmra.mrb[20].mxu1 %v721_v2  ;;  %v244_v1 = vld [vmem:[%s2792_s30 + $0x210] sm:$0xff]  ;;  %v247_v2 = vld [vmem:[%s2792_s30 + $0x228] sm:$0xff] }
  0x78   : > { %1088 = vmatprep.mubr.bf16.mxu0 %v581_v4  ;;  %1472 = vmatprep.mubr.bf16.mxu1 %v725_v5  ;;  %v532_v4 = vld [vmem:[%s2792_s30 + $0xb10] sm:$0xff]  ;;  %v535_v5 = vld [vmem:[%s2792_s30 + $0xb28] sm:$0xff]  ;;  %v595_v9 = vpack.c.bf16 %v247_v2, %v244_v1  ;;  %v281_v1 = vld [vmem:[%s2792_s30 + $0x338] sm:$0xff] }
  0x79   : > { %v739_v10 = vpack.c.bf16 %v535_v5, %v532_v4  ;;  %v284_v2 = vld [vmem:[%s2792_s30 + $0x350] sm:$0xff]  ;;  %v195_v5 = vld [vmem:[%s2792_s30 + $0x88] sm:$0xff] }
  0x7a   : > { %v192_v4 = vld [vmem:[%s2792_s30 + $0x70] sm:$0xff]  ;;  %v614_v7 = vpack.c.bf16 %v284_v2, %v281_v1 }
  0x7b   : > { %v570_v8 = vpack.c.bf16 %v195_v5, %v192_v4 }
  0x7f   : > { %1089 = vmatmul.mubr.bf16.gmra.mrb[24].mxu0 %v580_v13  ;;  %1473 = vmatmul.mubr.bf16.gmra.mrb[24].mxu1 %v724_v14  ;;  %v250_v13 = vld [vmem:[%s2792_s30 + $0x240] sm:$0xff]  ;;  %v253_v14 = vld [vmem:[%s2792_s30 + $0x258] sm:$0xff] }
  0x80   : > { %1096 = vmatprep.mubr.bf16.mxu0 %v584_v15  ;;  %1480 = vmatprep.mubr.bf16.mxu1 %v728_v16  ;;  %v538_v15 = vld [vmem:[%s2792_s30 + $0xb40] sm:$0xff]  ;;  %v541_v16 = vld [vmem:[%s2792_s30 + $0xb58] sm:$0xff]  ;;  %v598_v21 = vpack.c.bf16 %v253_v14, %v250_v13  ;;  %v287_v13 = vld [vmem:[%s2792_s30 + $0x368] sm:$0xff] }
  0x81   : > { %v742_v22 = vpack.c.bf16 %v541_v16, %v538_v15  ;;  %v290_v14 = vld [vmem:[%s2792_s30 + $0x380] sm:$0xff]  ;;  %v204_v15 = vld [vmem:[%s2792_s30 + $0xd0] sm:$0xff]  ;;  %v207_v16 = vld [vmem:[%s2792_s30 + $0xe8] sm:$0xff] }
  0x82   : > { %v617_v19 = vpack.c.bf16 %v290_v14, %v287_v13  ;;  %v576_v20 = vpack.c.bf16 %v207_v16, %v204_v15 }
  0x87   : > { %1097 = vmatmul.mubr.bf16.gmra.mrb[28].mxu0 %v583_v25  ;;  %1481 = vmatmul.mubr.bf16.gmra.mrb[28].mxu1 %v727_v26  ;;  %v256_v25 = vld [vmem:[%s2792_s30 + $0x270] sm:$0xff]  ;;  %v259_v26 = vld [vmem:[%s2792_s30 + $0x288] sm:$0xff] }
  0x88   : > { %1104 = vmatprep.mubr.bf16.mxu0 %v587_v27  ;;  %1488 = vmatprep.mubr.bf16.mxu1 %v731_v28  ;;  %v544_v27 = vld [vmem:[%s2792_s30 + $0xb70] sm:$0xff]  ;;  %v547_v28 = vld [vmem:[%s2792_s30 + $0xb88] sm:$0xff]  ;;  %v601_v33 = vpack.c.bf16 %v259_v26, %v256_v25  ;;  %v293_v25 = vld [vmem:[%s2792_s30 + $0x398] sm:$0xff] }
  0x89   : > { %v745_v34 = vpack.c.bf16 %v547_v28, %v544_v27  ;;  %v296_v26 = vld [vmem:[%s2792_s30 + $0x3b0] sm:$0xff]  ;;  %v219_v28 = vld [vmem:[%s2792_s30 + $0x148] sm:$0xff] }
  0x8a   : > { %v216_v27 = vld [vmem:[%s2792_s30 + $0x130] sm:$0xff]  ;;  %v620_v31 = vpack.c.bf16 %v296_v26, %v293_v25 }
  0x8b   : > { %v582_v32 = vpack.c.bf16 %v219_v28, %v216_v27 }
  0x8f   : > { %1105 = vmatmul.mubr.bf16.gmra.mrb[32].mxu0 %v586_v37  ;;  %1489 = vmatmul.mubr.bf16.gmra.mrb[32].mxu1 %v730_v38  ;;  %v262_v37 = vld [vmem:[%s2792_s30 + $0x2a0] sm:$0xff]  ;;  %v265_v38 = vld [vmem:[%s2792_s30 + $0x2b8] sm:$0xff] }
  0x90   : > { %1112 = vmatprep.mubr.bf16.mxu0 %v590_v39  ;;  %1496 = vmatprep.mubr.bf16.mxu1 %v734_v40  ;;  %v550_v39 = vld [vmem:[%s2792_s30 + $0xba0] sm:$0xff]  ;;  %v553_v40 = vld [vmem:[%s2792_s30 + $0xbb8] sm:$0xff]  ;;  %v604_v45 = vpack.c.bf16 %v265_v38, %v262_v37  ;;  %v299_v37 = vld [vmem:[%s2792_s30 + $0x3c8] sm:$0xff] }
  0x91   : > { %v748_v46 = vpack.c.bf16 %v553_v40, %v550_v39  ;;  %v302_v38 = vld [vmem:[%s2792_s30 + $0x3e0] sm:$0xff]  ;;  %v228_v39 = vld [vmem:[%s2792_s30 + $0x190] sm:$0xff]  ;;  %v231_v40 = vld [vmem:[%s2792_s30 + $0x1a8] sm:$0xff] }
  0x92   : > { %v623_v43 = vpack.c.bf16 %v302_v38, %v299_v37  ;;  %v588_v44 = vpack.c.bf16 %v231_v40, %v228_v39 }
  0x97   : > { %1113 = vmatmul.mubr.bf16.gmra.mrb[36].mxu0 %v589_v49  ;;  %1497 = vmatmul.mubr.bf16.gmra.mrb[36].mxu1 %v733_v50  ;;  %v268_v49 = vld [vmem:[%s2792_s30 + $0x2d0] sm:$0xff]  ;;  %v271_v50 = vld [vmem:[%s2792_s30 + $0x2e8] sm:$0xff] }
  0x98   : > { %1120 = vmatprep.mubr.bf16.mxu0 %v593_v51  ;;  %1504 = vmatprep.mubr.bf16.mxu1 %v737_v52  ;;  %v556_v51 = vld [vmem:[%s2792_s30 + $0xbd0] sm:$0xff]  ;;  %v559_v52 = vld [vmem:[%s2792_s30 + $0xbe8] sm:$0xff]  ;;  %v607_v57 = vpack.c.bf16 %v271_v50, %v268_v49  ;;  %v305_v49 = vld [vmem:[%s2792_s30 + $0x3f8] sm:$0xff] }
  0x99   : > { %v751_v58 = vpack.c.bf16 %v559_v52, %v556_v51  ;;  %v308_v50 = vld [vmem:[%s2792_s30 + $0x410] sm:$0xff]  ;;  %v243_v52 = vld [vmem:[%s2792_s30 + $0x208] sm:$0xff] }
  0x9a   : > { %v240_v51 = vld [vmem:[%s2792_s30 + $0x1f0] sm:$0xff]  ;;  %v626_v55 = vpack.c.bf16 %v308_v50, %v305_v49 }
  0x9b   : > { %v594_v56 = vpack.c.bf16 %v243_v52, %v240_v51 }
  0x9f   : > { %1121 = vmatmul.mubr.bf16.gmra.mrb[40].mxu0 %v592_v61  ;;  %1505 = vmatmul.mubr.bf16.gmra.mrb[40].mxu1 %v736_v62  ;;  %v274_v61 = vld [vmem:[%s2792_s30 + $0x300] sm:$0xff]  ;;  %v277_v62 = vld [vmem:[%s2792_s30 + $0x318] sm:$0xff] }
  0xa0   : > { %1128 = vmatprep.mubr.bf16.mxu0 %v596_v63  ;;  %1512 = vmatprep.mubr.bf16.mxu1 %v740_v0  ;;  %v186_v63 = vld [vmem:[%s2792_s30 + $0x40] sm:$0xff]  ;;  %v189_v0 = vld [vmem:[%s2792_s30 + $0x58] sm:$0xff]  ;;  %v610_v3 = vpack.c.bf16 %v277_v62, %v274_v61  ;;  %v311_v61 = vld [vmem:[%s2792_s30 + $0x428] sm:$0xff] }
  0xa1   : > { %v567_v6 = vpack.c.bf16 %v189_v0, %v186_v63  ;;  %v314_v62 = vld [vmem:[%s2792_s30 + $0x440] sm:$0xff]  ;;  %v252_v63 = vld [vmem:[%s2792_s30 + $0x250] sm:$0xff]  ;;  %v255_v0 = vld [vmem:[%s2792_s30 + $0x268] sm:$0xff] }
  0xa2   : > { %v629_v4 = vpack.c.bf16 %v314_v62, %v311_v61  ;;  %v600_v5 = vpack.c.bf16 %v255_v0, %v252_v63 }
  0xa7   : > { %1129 = vmatmul.mubr.bf16.gmra.mrb[44].mxu0 %v595_v9  ;;  %1513 = vmatmul.mubr.bf16.gmra.mrb[44].mxu1 %v739_v10  ;;  %v280_v9 = vld [vmem:[%s2792_s30 + $0x330] sm:$0xff]  ;;  %v283_v10 = vld [vmem:[%s2792_s30 + $0x348] sm:$0xff] }
  0xa8   : > { %1136 = vmatprep.mubr.bf16.mxu0 %v599_v11  ;;  %1520 = vmatprep.mubr.bf16.mxu1 %v743_v12  ;;  %v198_v11 = vld [vmem:[%s2792_s30 + $0xa0] sm:$0xff]  ;;  %v201_v12 = vld [vmem:[%s2792_s30 + $0xb8] sm:$0xff]  ;;  %v613_v17 = vpack.c.bf16 %v283_v10, %v280_v9  ;;  %v320_v10 = vld [vmem:[%s2792_s30 + $0x470] sm:$0xff] }
  0xa9   : > { %v573_v18 = vpack.c.bf16 %v201_v12, %v198_v11  ;;  %v317_v9 = vld [vmem:[%s2792_s30 + $0x458] sm:$0xff]  ;;  %v264_v11 = vld [vmem:[%s2792_s30 + $0x2b0] sm:$0xff]  ;;  %v267_v12 = vld [vmem:[%s2792_s30 + $0x2c8] sm:$0xff] }
  0xaa   : > { %v632_v15 = vpack.c.bf16 %v320_v10, %v317_v9  ;;  %v606_v16 = vpack.c.bf16 %v267_v12, %v264_v11 }
  0xaf   : > { %1137 = vmatmul.mubr.bf16.gmra.mrb[48].mxu0 %v598_v21  ;;  %1521 = vmatmul.mubr.bf16.gmra.mrb[48].mxu1 %v742_v22  ;;  %v286_v21 = vld [vmem:[%s2792_s30 + $0x360] sm:$0xff]  ;;  %v289_v22 = vld [vmem:[%s2792_s30 + $0x378] sm:$0xff] }
  0xb0   : > { %1144 = vmatprep.mubr.bf16.mxu0 %v602_v23  ;;  %1528 = vmatprep.mubr.bf16.mxu1 %v746_v24  ;;  %v210_v23 = vld [vmem:[%s2792_s30 + $0x100] sm:$0xff]  ;;  %v213_v24 = vld [vmem:[%s2792_s30 + $0x118] sm:$0xff]  ;;  %v616_v29 = vpack.c.bf16 %v289_v22, %v286_v21  ;;  %v323_v21 = vld [vmem:[%s2792_s30 + $0x488] sm:$0xff] }
  0xb1   : > { %v579_v30 = vpack.c.bf16 %v213_v24, %v210_v23  ;;  %v326_v22 = vld [vmem:[%s2792_s30 + $0x4a0] sm:$0xff]  ;;  %v276_v23 = vld [vmem:[%s2792_s30 + $0x310] sm:$0xff]  ;;  %v279_v24 = vld [vmem:[%s2792_s30 + $0x328] sm:$0xff] }
  0xb2   : > { %v635_v27 = vpack.c.bf16 %v326_v22, %v323_v21  ;;  %v612_v28 = vpack.c.bf16 %v279_v24, %v276_v23  ;;  %v346_v21 = vld [vmem:[%s2792_s30 + $0x540] sm:$0xff]  ;;  %v349_v22 = vld [vmem:[%s2792_s30 + $0x558] sm:$0xff] }
  0xb3   : > { %v330_v23 = vld [vmem:[%s2792_s30 + $0x4c0] sm:$0xff]  ;;  %v333_v24 = vld [vmem:[%s2792_s30 + $0x4d8] sm:$0xff] }
  0xb7   : > { %1145 = vmatmul.mubr.bf16.gmra.mrb[52].mxu0 %v601_v33  ;;  %1529 = vmatmul.mubr.bf16.gmra.mrb[52].mxu1 %v745_v34  ;;  %v292_v33 = vld [vmem:[%s2792_s30 + $0x390] sm:$0xff]  ;;  %v295_v34 = vld [vmem:[%s2792_s30 + $0x3a8] sm:$0xff] }
  0xb8   : > { %1152 = vmatprep.mubr.bf16.mxu0 %v605_v35  ;;  %1536 = vmatprep.mubr.bf16.mxu1 %v749_v36  ;;  %v222_v35 = vld [vmem:[%s2792_s30 + $0x160] sm:$0xff]  ;;  %v225_v36 = vld [vmem:[%s2792_s30 + $0x178] sm:$0xff]  ;;  %v619_v41 = vpack.c.bf16 %v295_v34, %v292_v33  ;;  %v332_v34 = vld [vmem:[%s2792_s30 + $0x4d0] sm:$0xff] }
  0xb9   : > { %v585_v42 = vpack.c.bf16 %v225_v36, %v222_v35  ;;  %v329_v33 = vld [vmem:[%s2792_s30 + $0x4b8] sm:$0xff]  ;;  %v288_v35 = vld [vmem:[%s2792_s30 + $0x370] sm:$0xff]  ;;  %v291_v36 = vld [vmem:[%s2792_s30 + $0x388] sm:$0xff] }
  0xba   : > { %v638_v39 = vpack.c.bf16 %v332_v34, %v329_v33  ;;  %v618_v40 = vpack.c.bf16 %v291_v36, %v288_v35  ;;  %v646_v33 = vpack.c.bf16 %v349_v22, %v346_v21  ;;  %v639_v34 = vpack.c.bf16 %v333_v24, %v330_v23  ;;  %v364_v21 = vld [vmem:[%s2792_s30 + $0x5d0] sm:$0xff]  ;;  %v367_v22 = vld [vmem:[%s2792_s30 + $0x5e8] sm:$0xff]  ;;  %v366_v23 = vld [vmem:[%s2792_s30 + $0x5e0] sm:$0xff] }
  0xbb   : > { %v369_v24 = vld [vmem:[%s2792_s30 + $0x5f8] sm:$0xff] }
  0xbf   : > { %1153 = vmatmul.mubr.bf16.gmra.mrb[56].mxu0 %v604_v45  ;;  %1537 = vmatmul.mubr.bf16.gmra.mrb[56].mxu1 %v748_v46  ;;  %v298_v45 = vld [vmem:[%s2792_s30 + $0x3c0] sm:$0xff]  ;;  %v301_v46 = vld [vmem:[%s2792_s30 + $0x3d8] sm:$0xff] }
  0xc0   : > { %1160 = vmatprep.mubr.bf16.mxu0 %v608_v47  ;;  %1544 = vmatprep.mubr.bf16.mxu1 %v752_v48  ;;  %v234_v47 = vld [vmem:[%s2792_s30 + $0x1c0] sm:$0xff]  ;;  %v237_v48 = vld [vmem:[%s2792_s30 + $0x1d8] sm:$0xff]  ;;  %v622_v53 = vpack.c.bf16 %v301_v46, %v298_v45  ;;  %v335_v45 = vld [vmem:[%s2792_s30 + $0x4e8] sm:$0xff] }
  0xc1   : > { %v591_v54 = vpack.c.bf16 %v237_v48, %v234_v47  ;;  %v338_v46 = vld [vmem:[%s2792_s30 + $0x500] sm:$0xff]  ;;  %v300_v47 = vld [vmem:[%s2792_s30 + $0x3d0] sm:$0xff]  ;;  %v303_v48 = vld [vmem:[%s2792_s30 + $0x3e8] sm:$0xff] }
  0xc2   : > { %v641_v51 = vpack.c.bf16 %v338_v46, %v335_v45  ;;  %v624_v52 = vpack.c.bf16 %v303_v48, %v300_v47  ;;  %v359_v45 = vld [vmem:[%s2792_s30 + $0x5a8] sm:$0xff]  ;;  %v362_v46 = vld [vmem:[%s2792_s30 + $0x5c0] sm:$0xff]  ;;  %v348_v47 = vld [vmem:[%s2792_s30 + $0x550] sm:$0xff] }
  0xc3   : > { %v351_v48 = vld [vmem:[%s2792_s30 + $0x568] sm:$0xff] }
  0xc7   : > { %1161 = vmatmul.mubr.bf16.gmra.mrb[60].mxu0 %v607_v57  ;;  %1545 = vmatmul.mubr.bf16.gmra.mrb[60].mxu1 %v751_v58  ;;  %v304_v57 = vld [vmem:[%s2792_s30 + $0x3f0] sm:$0xff]  ;;  %v307_v58 = vld [vmem:[%s2792_s30 + $0x408] sm:$0xff] }
  0xc8   : > { %1168 = vmatprep.mubr.bf16.mxu0 %v611_v59  ;;  %2556 = vmatprep.mubr.msk.bf16.mxu1 %vm815_vm0, %v564_v60  ;;  %v246_v59 = vld [vmem:[%s2792_s30 + $0x220] sm:$0xff]  ;;  %v249_v60 = vld [vmem:[%s2792_s30 + $0x238] sm:$0xff]  ;;  %v625_v1 = vpack.c.bf16 %v307_v58, %v304_v57  ;;  %v344_v58 = vld [vmem:[%s2792_s30 + $0x530] sm:$0xff] }
  0xc9   : > { %v597_v2 = vpack.c.bf16 %v249_v60, %v246_v59  ;;  %v341_v57 = vld [vmem:[%s2792_s30 + $0x518] sm:$0xff]  ;;  %v312_v59 = vld [vmem:[%s2792_s30 + $0x430] sm:$0xff]  ;;  %v315_v60 = vld [vmem:[%s2792_s30 + $0x448] sm:$0xff] }
  0xca   : > { %v644_v63 = vpack.c.bf16 %v344_v58, %v341_v57  ;;  %v630_v0 = vpack.c.bf16 %v315_v60, %v312_v59  ;;  %v653_v57 = vpack.c.bf16 %v362_v46, %v359_v45  ;;  %v648_v58 = vpack.c.bf16 %v351_v48, %v348_v47  ;;  %v370_v45 = vld [vmem:[%s2792_s30 + $0x600] sm:$0xff]  ;;  %v373_v46 = vld [vmem:[%s2792_s30 + $0x618] sm:$0xff] }
  0xcb   : > { %v378_v47 = vld [vmem:[%s2792_s30 + $0x640] sm:$0xff]  ;;  %v381_v48 = vld [vmem:[%s2792_s30 + $0x658] sm:$0xff] }
  0xcf   : > { %1169 = vmatmul.mubr.bf16.gmra.mrb[64].mxu0 %v610_v3  ;;  %2557 = vmatmul.mubr.msk.bf16.vlgmr.msra.gmra.mrb[64].mxu1 %vm815_vm0, %v567_v6  ;;  %v310_v3 = vld [vmem:[%s2792_s30 + $0x420] sm:$0xff]  ;;  %v313_v6 = vld [vmem:[%s2792_s30 + $0x438] sm:$0xff] }
  0xd0   : > { %1176 = vmatprep.mubr.bf16.mxu0 %v614_v7  ;;  %2560 = vmatprep.mubr.msk.bf16.mxu1 %vm815_vm0, %v570_v8  ;;  %v258_v7 = vld [vmem:[%s2792_s30 + $0x280] sm:$0xff]  ;;  %v261_v8 = vld [vmem:[%s2792_s30 + $0x298] sm:$0xff]  ;;  %v628_v13 = vpack.c.bf16 %v313_v6, %v310_v3  ;;  %v347_v3 = vld [vmem:[%s2792_s30 + $0x548] sm:$0xff] }
  0xd1   : > { %v603_v14 = vpack.c.bf16 %v261_v8, %v258_v7  ;;  %v350_v6 = vld [vmem:[%s2792_s30 + $0x560] sm:$0xff]  ;;  %v324_v7 = vld [vmem:[%s2792_s30 + $0x490] sm:$0xff]  ;;  %v327_v8 = vld [vmem:[%s2792_s30 + $0x4a8] sm:$0xff] }
  0xd7   : > { %1177 = vmatmul.mubr.bf16.gmra.mrb[68].mxu0 %v613_v17  ;;  %2561 = vmatmul.mubr.msk.bf16.gmra.mrb[68].mxu1 %vm815_vm0, %v573_v18  ;;  %v316_v17 = vld [vmem:[%s2792_s30 + $0x450] sm:$0xff]  ;;  %v319_v18 = vld [vmem:[%s2792_s30 + $0x468] sm:$0xff] }
  0xd8   : > { %1184 = vmatprep.mubr.bf16.mxu0 %v617_v19  ;;  %2564 = vmatprep.mubr.msk.bf16.mxu1 %vm815_vm0, %v576_v20  ;;  %v270_v19 = vld [vmem:[%s2792_s30 + $0x2e0] sm:$0xff]  ;;  %v273_v20 = vld [vmem:[%s2792_s30 + $0x2f8] sm:$0xff]  ;;  %v631_v25 = vpack.c.bf16 %v319_v18, %v316_v17  ;;  %v647_v17 = vpack.c.bf16 %v350_v6, %v347_v3  ;;  %v636_v18 = vpack.c.bf16 %v327_v8, %v324_v7 }
  0xd9   : > { %v609_v26 = vpack.c.bf16 %v273_v20, %v270_v19 }
  0xdf   : > { %1185 = vmatmul.mubr.bf16.gmra.mrb[72].mxu0 %v616_v29  ;;  %2565 = vmatmul.mubr.msk.bf16.gmra.mrb[72].mxu1 %vm815_vm0, %v579_v30  ;;  %v322_v29 = vld [vmem:[%s2792_s30 + $0x480] sm:$0xff]  ;;  %v325_v30 = vld [vmem:[%s2792_s30 + $0x498] sm:$0xff] }
  0xe0   : > { %1192 = vmatprep.mubr.bf16.mxu0 %v620_v31  ;;  %2568 = vmatprep.mubr.msk.bf16.mxu1 %vm815_vm0, %v582_v32  ;;  %v282_v31 = vld [vmem:[%s2792_s30 + $0x340] sm:$0xff]  ;;  %v285_v32 = vld [vmem:[%s2792_s30 + $0x358] sm:$0xff]  ;;  %v634_v37 = vpack.c.bf16 %v325_v30, %v322_v29 }
  0xe1   : > { %v615_v38 = vpack.c.bf16 %v285_v32, %v282_v31 }
  0xe7   : > { %1193 = vmatmul.mubr.bf16.gmra.mrb[76].mxu0 %v619_v41  ;;  %2569 = vmatmul.mubr.msk.bf16.gmra.mrb[76].mxu1 %vm815_vm0, %v585_v42  ;;  %v328_v41 = vld [vmem:[%s2792_s30 + $0x4b0] sm:$0xff]  ;;  %v331_v42 = vld [vmem:[%s2792_s30 + $0x4c8] sm:$0xff] }
  0xe8   : > { %1200 = vmatprep.mubr.bf16.mxu0 %v623_v43  ;;  %2572 = vmatprep.mubr.msk.bf16.mxu1 %vm815_vm0, %v588_v44  ;;  %v294_v43 = vld [vmem:[%s2792_s30 + $0x3a0] sm:$0xff]  ;;  %v297_v44 = vld [vmem:[%s2792_s30 + $0x3b8] sm:$0xff]  ;;  %v637_v49 = vpack.c.bf16 %v331_v42, %v328_v41  ;;  %v352_v41 = vld [vmem:[%s2792_s30 + $0x570] sm:$0xff] }
  0xe9   : > { %v621_v50 = vpack.c.bf16 %v297_v44, %v294_v43  ;;  %v355_v42 = vld [vmem:[%s2792_s30 + $0x588] sm:$0xff]  ;;  %v342_v43 = vld [vmem:[%s2792_s30 + $0x520] sm:$0xff]  ;;  %v345_v44 = vld [vmem:[%s2792_s30 + $0x538] sm:$0xff] }
  0xef   : > { %1201 = vmatmul.mubr.bf16.gmra.mrb[80].mxu0 %v622_v53  ;;  %2573 = vmatmul.mubr.msk.bf16.gmra.mrb[80].mxu1 %vm815_vm0, %v591_v54  ;;  %v334_v53 = vld [vmem:[%s2792_s30 + $0x4e0] sm:$0xff]  ;;  %v337_v54 = vld [vmem:[%s2792_s30 + $0x4f8] sm:$0xff] }
  0xf0   : > { %1208 = vmatprep.mubr.bf16.mxu0 %v626_v55  ;;  %2576 = vmatprep.mubr.msk.bf16.mxu1 %vm815_vm0, %v594_v56  ;;  %v306_v55 = vld [vmem:[%s2792_s30 + $0x400] sm:$0xff]  ;;  %v309_v56 = vld [vmem:[%s2792_s30 + $0x418] sm:$0xff]  ;;  %v640_v61 = vpack.c.bf16 %v337_v54, %v334_v53  ;;  %v649_v53 = vpack.c.bf16 %v355_v42, %v352_v41  ;;  %v645_v54 = vpack.c.bf16 %v345_v44, %v342_v43 }
  0xf1   : > { %v627_v62 = vpack.c.bf16 %v309_v56, %v306_v55 }
  0xf7   : > { %1209 = vmatmul.mubr.bf16.gmra.mrb[84].mxu0 %v625_v1  ;;  %2577 = vmatmul.mubr.msk.bf16.gmra.mrb[84].mxu1 %vm815_vm0, %v597_v2  ;;  %v340_v1 = vld [vmem:[%s2792_s30 + $0x510] sm:$0xff]  ;;  %v343_v2 = vld [vmem:[%s2792_s30 + $0x528] sm:$0xff] }
  0xf8   : > { %1216 = vmatprep.mubr.bf16.mxu0 %v629_v4  ;;  %2580 = vmatprep.mubr.msk.bf16.mxu1 %vm815_vm0, %v600_v5  ;;  %v318_v4 = vld [vmem:[%s2792_s30 + $0x460] sm:$0xff]  ;;  %v321_v5 = vld [vmem:[%s2792_s30 + $0x478] sm:$0xff] }
  0xff   : > { %1217 = vmatmul.mubr.bf16.gmra.mrb[88].mxu0 %v628_v13  ;;  %2581 = vmatmul.mubr.msk.bf16.gmra.mrb[88].mxu1 %vm815_vm0, %v603_v14  ;;  %v643_v13 = vpack.c.bf16 %v343_v2, %v340_v1  ;;  %v633_v14 = vpack.c.bf16 %v321_v5, %v318_v4  ;;  %v365_v1 = vld [vmem:[%s2792_s30 + $0x5d8] sm:$0xff]  ;;  %v368_v2 = vld [vmem:[%s2792_s30 + $0x5f0] sm:$0xff]  ;;  %v363_v5 = vld [vmem:[%s2792_s30 + $0x5c8] sm:$0xff] }
 0x100   : > { %1224 = vmatprep.mubr.bf16.mxu0 %v632_v15  ;;  %2584 = vmatprep.mubr.msk.bf16.mxu1 %vm815_vm0, %v606_v16  ;;  %v360_v4 = vld [vmem:[%s2792_s30 + $0x5b0] sm:$0xff] }
 0x107   : > { %1225 = vmatmul.mubr.bf16.gmra.mrb[92].mxu0 %v631_v25  ;;  %2585 = vmatmul.mubr.msk.bf16.gmra.mrb[92].mxu1 %vm815_vm0, %v609_v26  ;;  %v353_v25 = vld [vmem:[%s2792_s30 + $0x578] sm:$0xff]  ;;  %v356_v26 = vld [vmem:[%s2792_s30 + $0x590] sm:$0xff] }
 0x108   : > { %1232 = vmatprep.mubr.bf16.mxu0 %v635_v27  ;;  %2588 = vmatprep.mubr.msk.bf16.mxu1 %vm815_vm0, %v612_v28  ;;  %v336_v27 = vld [vmem:[%s2792_s30 + $0x4f0] sm:$0xff]  ;;  %v339_v28 = vld [vmem:[%s2792_s30 + $0x508] sm:$0xff] }
 0x10f   : > { %1233 = vmatmul.mubr.bf16.gmra.mrb[96].mxu0 %v634_v37  ;;  %2589 = vmatmul.mubr.msk.bf16.gmra.mrb[96].mxu1 %vm815_vm0, %v615_v38  ;;  %v650_v37 = vpack.c.bf16 %v356_v26, %v353_v25  ;;  %v642_v38 = vpack.c.bf16 %v339_v28, %v336_v27  ;;  %v371_v25 = vld [vmem:[%s2792_s30 + $0x608] sm:$0xff]  ;;  %v374_v26 = vld [vmem:[%s2792_s30 + $0x620] sm:$0xff]  ;;  %v372_v27 = vld [vmem:[%s2792_s30 + $0x610] sm:$0xff] }
 0x110   : > { %1240 = vmatprep.mubr.bf16.mxu0 %v638_v39  ;;  %2592 = vmatprep.mubr.msk.bf16.mxu1 %vm815_vm0, %v618_v40  ;;  %v375_v28 = vld [vmem:[%s2792_s30 + $0x628] sm:$0xff]  ;;  %v659_v41 = vpack.c.bf16 %v374_v26, %v371_v25 }
 0x111   : > { %v660_v42 = vpack.c.bf16 %v375_v28, %v372_v27 }
 0x117   : > { %1241 = vmatmul.mubr.bf16.gmra.mrb[100].mxu0 %v637_v49  ;;  %2593 = vmatmul.mubr.msk.bf16.gmra.mrb[100].mxu1 %vm815_vm0, %v621_v50 }
 0x118   : > { %1248 = vmatprep.mubr.bf16.mxu0 %v641_v51  ;;  %2596 = vmatprep.mubr.msk.bf16.mxu1 %vm815_vm0, %v624_v52 }
 0x11f   : > { %1249 = vmatmul.mubr.bf16.gmra.mrb[104].mxu0 %v640_v61  ;;  %2597 = vmatmul.mubr.msk.bf16.gmra.mrb[104].mxu1 %vm815_vm0, %v627_v62  ;;  %v358_v61 = vld [vmem:[%s2792_s30 + $0x5a0] sm:$0xff]  ;;  %v361_v62 = vld [vmem:[%s2792_s30 + $0x5b8] sm:$0xff] }
 0x120   : > { %1256 = vmatprep.mubr.bf16.mxu0 %v644_v63  ;;  %2600 = vmatprep.mubr.msk.bf16.mxu1 %vm815_vm0, %v630_v0  ;;  %v354_v63 = vld [vmem:[%s2792_s30 + $0x580] sm:$0xff]  ;;  %v357_v0 = vld [vmem:[%s2792_s30 + $0x598] sm:$0xff] }
 0x122   : > { %v3163_v9 = vpop.f32.mrb[0].mxu0  ;;  %v3165_v10 = vpop.f32.mrb[0].mxu1 }
 0x123   : > { %v1044_v11 = vpop.f32.mrb[1].mxu0  ;;  %v1428_v12 = vpop.f32.mrb[1].mxu1 }
 0x124   : > { %v3167_v15 = vpop.f32.mrb[2].mxu0  ;;  %v3169_v16 = vpop.f32.mrb[2].mxu1  ;;  %v652_v11 = vpack.c.bf16 %v361_v62, %v358_v61  ;;  %v651_v12 = vpack.c.bf16 %v357_v0, %v354_v63  ;;  %v658_v61 = vpack.c.bf16 %v373_v46, %v370_v45  ;;  %v663_v62 = vpack.c.bf16 %v381_v48, %v378_v47  ;;  %v389_v45 = vld [vmem:[%s2792_s30 + $0x698] sm:$0xff]  ;;  %v392_v46 = vld [vmem:[%s2792_s30 + $0x6b0] sm:$0xff]  ;;  %v411_v48 = vld [vmem:[%s2792_s30 + $0x748] sm:$0xff] }
 0x125   : > { %v1047_v19 = vpop.f32.mrb[3].mxu0  ;;  %v1431_v20 = vpop.f32.mrb[3].mxu1  ;;  %v408_v47 = vld [vmem:[%s2792_s30 + $0x730] sm:$0xff] }
 0x127   : > { %1257 = vmatmul.mubr.bf16.gmra.mrb[108].mxu0 %v643_v13  ;;  %2601 = vmatmul.mubr.msk.bf16.gmra.mrb[108].mxu1 %vm815_vm0, %v633_v14 }
 0x128   : > { %1264 = vmatprep.mubr.bf16.mxu0 %v647_v17  ;;  %2604 = vmatprep.mubr.msk.bf16.mxu1 %vm815_vm0, %v636_v18  ;;  %v656_v17 = vpack.c.bf16 %v368_v2, %v365_v1  ;;  %v654_v18 = vpack.c.bf16 %v363_v5, %v360_v4 }
 0x12a   : > { %v3181_v29 = vpop.f32.mrb[4].mxu0  ;;  %v3183_v30 = vpop.f32.mrb[4].mxu1 }
 0x12b   : > { %v1052_v31 = vpop.f32.mrb[5].mxu0  ;;  %v1436_v32 = vpop.f32.mrb[5].mxu1 }
 0x12c   : > { %v3185_v35 = vpop.f32.mrb[6].mxu0  ;;  %v3187_v36 = vpop.f32.mrb[6].mxu1 }
 0x12d   : > { %v1055_v39 = vpop.f32.mrb[7].mxu0  ;;  %v1439_v40 = vpop.f32.mrb[7].mxu1 }
 0x12f   : > { %1265 = vmatmul.mubr.bf16.gmra.mrb[112].mxu0 %v646_v33  ;;  %2605 = vmatmul.mubr.msk.bf16.gmra.mrb[112].mxu1 %vm815_vm0, %v639_v34 }
 0x130   : > { %1272 = vmatprep.mubr.bf16.mxu0 %v650_v37  ;;  %2608 = vmatprep.mubr.msk.bf16.mxu1 %vm815_vm0, %v642_v38  ;;  %v655_v37 = vpack.c.bf16 %v367_v22, %v364_v21  ;;  %v657_v38 = vpack.c.bf16 %v369_v24, %v366_v23 }
 0x132   : > { %v3199_v49 = vpop.f32.mrb[8].mxu0  ;;  %v3201_v50 = vpop.f32.mrb[8].mxu1 }
 0x133   : > { %v1060_v51 = vpop.f32.mrb[9].mxu0  ;;  %v1444_v52 = vpop.f32.mrb[9].mxu1 }
 0x134   : > { %v3203_v55 = vpop.f32.mrb[10].mxu0  ;;  %v3205_v56 = vpop.f32.mrb[10].mxu1  ;;  %v377_v51 = vld [vmem:[%s2792_s30 + $0x638] sm:$0xff]  ;;  %v380_v52 = vld [vmem:[%s2792_s30 + $0x650] sm:$0xff] }
 0x135   : > { %v1063_v59 = vpop.f32.mrb[11].mxu0  ;;  %v1447_v60 = vpop.f32.mrb[11].mxu1  ;;  %v662_v1 = vpack.c.bf16 %v380_v52, %v377_v51 }
 0x137   : > { %1273 = vmatmul.mubr.bf16.gmra.mrb[116].mxu0 %v649_v53  ;;  %2609 = vmatmul.mubr.msk.bf16.gmra.mrb[116].mxu1 %vm815_vm0, %v645_v54  ;;  %v384_v53 = vld [vmem:[%s2792_s30 + $0x670] sm:$0xff]  ;;  %v387_v54 = vld [vmem:[%s2792_s30 + $0x688] sm:$0xff] }
 0x138   : > { %1280 = vmatprep.mubr.bf16.mxu0 %v653_v57  ;;  %2612 = vmatprep.mubr.msk.bf16.mxu1 %vm815_vm0, %v648_v58  ;;  %v666_v2 = vpack.c.bf16 %v387_v54, %v384_v53 }
 0x13a   : > { %v3217_v3 = vpop.f32.mrb[12].mxu0  ;;  %v3219_v6 = vpop.f32.mrb[12].mxu1 }
 0x13b   : > { %v1068_v7 = vpop.f32.mrb[13].mxu0  ;;  %v1452_v8 = vpop.f32.mrb[13].mxu1 }
 0x13c   : > { %v3221_v13 = vpop.f32.mrb[14].mxu0  ;;  %v3223_v14 = vpop.f32.mrb[14].mxu1  ;;  %v376_v7 = vld [vmem:[%s2792_s30 + $0x630] sm:$0xff]  ;;  %v379_v8 = vld [vmem:[%s2792_s30 + $0x648] sm:$0xff] }
 0x13d   : > { %v1071_v19 = vpop.f32.mrb[15].mxu0  ;;  %v1455_v20 = vpop.f32.mrb[15].mxu1  ;;  %v661_v25 = vpack.c.bf16 %v379_v8, %v376_v7  ;;  %v388_v7 = vld [vmem:[%s2792_s30 + $0x690] sm:$0xff]  ;;  %v391_v8 = vld [vmem:[%s2792_s30 + $0x6a8] sm:$0xff] }
 0x13e   : > { %v396_v19 = vld [vmem:[%s2792_s30 + $0x6d0] sm:$0xff]  ;;  %v399_v20 = vld [vmem:[%s2792_s30 + $0x6e8] sm:$0xff] }
 0x13f   : > { %1281 = vmatmul.mubr.bf16.gmra.mrb[120].mxu0 %v652_v11  ;;  %2613 = vmatmul.mubr.msk.bf16.gmra.mrb[120].mxu1 %vm815_vm0, %v651_v12  ;;  %v390_v11 = vld [vmem:[%s2792_s30 + $0x6a0] sm:$0xff]  ;;  %v393_v12 = vld [vmem:[%s2792_s30 + $0x6b8] sm:$0xff] }
 0x140   : > { %1288 = vmatprep.mubr.bf16.mxu0 %v656_v17  ;;  %2616 = vmatprep.mubr.msk.bf16.mxu1 %vm815_vm0, %v654_v18  ;;  %v383_v17 = vld [vmem:[%s2792_s30 + $0x668] sm:$0xff]  ;;  %v386_v18 = vld [vmem:[%s2792_s30 + $0x680] sm:$0xff]  ;;  %v669_v26 = vpack.c.bf16 %v393_v12, %v390_v11  ;;  %v417_v12 = vld [vmem:[%s2792_s30 + $0x778] sm:$0xff] }
 0x141   : > { %v414_v11 = vld [vmem:[%s2792_s30 + $0x760] sm:$0xff] }
 0x142   : > { %v3235_v31 = vpop.f32.mrb[16].mxu0  ;;  %v3237_v32 = vpop.f32.mrb[16].mxu1 }
 0x143   : > { %v1076_v33 = vpop.f32.mrb[17].mxu0  ;;  %v1460_v34 = vpop.f32.mrb[17].mxu1 }
 0x144   : > { %v3239_v39 = vpop.f32.mrb[18].mxu0  ;;  %v3241_v40 = vpop.f32.mrb[18].mxu1  ;;  %v665_v33 = vpack.c.bf16 %v386_v18, %v383_v17  ;;  %v672_v34 = vpack.c.bf16 %v399_v20, %v396_v19  ;;  %v395_v17 = vld [vmem:[%s2792_s30 + $0x6c8] sm:$0xff]  ;;  %v398_v18 = vld [vmem:[%s2792_s30 + $0x6e0] sm:$0xff]  ;;  %v420_v19 = vld [vmem:[%s2792_s30 + $0x790] sm:$0xff] }
 0x145   : > { %3951 = vst [vmem:[#allocation2_spill] sm:$0xff] %v3241_v40  ;;  %v1079_v43 = vpop.f32.mrb[19].mxu0  ;;  %v1463_v44 = vpop.f32.mrb[19].mxu1  ;;  %v423_v20 = vld [vmem:[%s2792_s30 + $0x7a8] sm:$0xff] }
 0x146   : > { %v402_v43 = vld [vmem:[%s2792_s30 + $0x700] sm:$0xff]  ;;  %v405_v44 = vld [vmem:[%s2792_s30 + $0x718] sm:$0xff] }
 0x147   : > { %1289 = vmatmul.mubr.bf16.gmra.mrb[124].mxu0 %v655_v37  ;;  %2617 = vmatmul.mubr.msk.bf16.gmra.mrb[124].mxu1 %vm815_vm0, %v657_v38 }
 0x148   : > { %1296 = vmatprep.mubr.bf16.mxu0 %v659_v41  ;;  %2620 = vmatprep.mubr.msk.bf16.mxu1 %vm815_vm0, %v660_v42  ;;  %v382_v41 = vld [vmem:[%s2792_s30 + $0x660] sm:$0xff]  ;;  %v385_v42 = vld [vmem:[%s2792_s30 + $0x678] sm:$0xff] }
 0x14a   : > { %v3253_v57 = vpop.f32.mrb[20].mxu0  ;;  %v3255_v58 = vpop.f32.mrb[20].mxu1 }
 0x14b   : > { %v1084_v59 = vpop.f32.mrb[21].mxu0  ;;  %v1468_v60 = vpop.f32.mrb[21].mxu1 }
 0x14c   : > { %v3257_v63 = vpop.f32.mrb[22].mxu0  ;;  %v3259_v0 = vpop.f32.mrb[22].mxu1  ;;  %v664_v59 = vpack.c.bf16 %v385_v42, %v382_v41  ;;  %v675_v60 = vpack.c.bf16 %v405_v44, %v402_v43  ;;  %v671_v41 = vpack.c.bf16 %v398_v18, %v395_v17  ;;  %v684_v42 = vpack.c.bf16 %v423_v20, %v420_v19 }
 0x14d   : > { %3952 = vst [vmem:[#allocation3_spill] sm:$0xff] %v3259_v0  ;;  %v1087_v4 = vpop.f32.mrb[23].mxu0  ;;  %v1471_v5 = vpop.f32.mrb[23].mxu1 }
 0x14f   : > { %1297 = vmatmul.mubr.bf16.gmra.mrb[128].mxu0 %v658_v61  ;;  %2621 = vmatmul.mubr.msk.bf16.gmra.mrb[128].mxu1 %vm815_vm0, %v663_v62 }
 0x150   : > { %1304 = vmatprep.mubr.bf16.mxu0 %v662_v1  ;;  %2624 = vmatprep.mubr.msk.bf16.mxu1 %vm815_vm0, %v666_v2  ;;  %v668_v1 = vpack.c.bf16 %v392_v46, %v389_v45  ;;  %v678_v2 = vpack.c.bf16 %v411_v48, %v408_v47  ;;  %v394_v45 = vld [vmem:[%s2792_s30 + $0x6c0] sm:$0xff]  ;;  %v397_v46 = vld [vmem:[%s2792_s30 + $0x6d8] sm:$0xff] }
 0x151   : > { %v426_v47 = vld [vmem:[%s2792_s30 + $0x7c0] sm:$0xff]  ;;  %v429_v48 = vld [vmem:[%s2792_s30 + $0x7d8] sm:$0xff] }
 0x152   : > { %v3271_v21 = vpop.f32.mrb[24].mxu0  ;;  %v3273_v22 = vpop.f32.mrb[24].mxu1 }
 0x153   : > { %3953 = vst [vmem:[#allocation4_spill] sm:$0xff] %v3273_v22  ;;  %v1092_v23 = vpop.f32.mrb[25].mxu0  ;;  %v1476_v24 = vpop.f32.mrb[25].mxu1 }
 0x154   : > { %v3275_v27 = vpop.f32.mrb[26].mxu0  ;;  %v3277_v28 = vpop.f32.mrb[26].mxu1 }
 0x155   : > { %3954 = vst [vmem:[#allocation5_spill] sm:$0xff] %v3277_v28  ;;  %v1095_v37 = vpop.f32.mrb[27].mxu0  ;;  %v1479_v38 = vpop.f32.mrb[27].mxu1  ;;  %v507_v28 = vld [vmem:[%s2792_s30 + $0xa48] sm:$0xff] }
 0x157   : > { %1305 = vmatmul.mubr.bf16.gmra.mrb[132].mxu0 %v661_v25  ;;  %2625 = vmatmul.mubr.msk.bf16.gmra.mrb[132].mxu1 %vm815_vm0, %v669_v26 }
 0x158   : > { %1312 = vmatprep.mubr.bf16.mxu0 %v665_v33  ;;  %2628 = vmatprep.mubr.msk.bf16.mxu1 %vm815_vm0, %v672_v34  ;;  %v667_v33 = vpack.c.bf16 %v391_v8, %v388_v7  ;;  %v681_v34 = vpack.c.bf16 %v417_v12, %v414_v11  ;;  %v670_v7 = vpack.c.bf16 %v397_v46, %v394_v45 }
 0x159   : > { %v687_v8 = vpack.c.bf16 %v429_v48, %v426_v47 }
 0x15a   : > { %v3289_v51 = vpop.f32.mrb[28].mxu0  ;;  %v3291_v52 = vpop.f32.mrb[28].mxu1 }
 0x15b   : > { %3955 = vst [vmem:[#allocation6_spill] sm:$0xff] %v3291_v52  ;;  %v1100_v53 = vpop.f32.mrb[29].mxu0  ;;  %v1484_v54 = vpop.f32.mrb[29].mxu1 }
 0x15c   : > { %v3293_v61 = vpop.f32.mrb[30].mxu0  ;;  %v3295_v62 = vpop.f32.mrb[30].mxu1  ;;  %v401_v53 = vld [vmem:[%s2792_s30 + $0x6f8] sm:$0xff]  ;;  %v404_v54 = vld [vmem:[%s2792_s30 + $0x710] sm:$0xff] }
 0x15d   : > { %3956 = vst [vmem:[#allocation7_spill] sm:$0xff] %v3295_v62  ;;  %v1103_v4 = vpop.f32.mrb[31].mxu0  ;;  %v1487_v5 = vpop.f32.mrb[31].mxu1  ;;  %v674_v17 = vpack.c.bf16 %v404_v54, %v401_v53 }
 0x15f   : > { %1313 = vmatmul.mubr.bf16.gmra.mrb[136].mxu0 %v664_v59  ;;  %2629 = vmatmul.mubr.msk.bf16.gmra.mrb[136].mxu1 %vm815_vm0, %v675_v60  ;;  %v432_v59 = vld [vmem:[%s2792_s30 + $0x7f0] sm:$0xff]  ;;  %v435_v60 = vld [vmem:[%s2792_s30 + $0x808] sm:$0xff] }
 0x160   : > { %1320 = vmatprep.mubr.bf16.mxu0 %v668_v1  ;;  %2632 = vmatprep.mubr.msk.bf16.mxu1 %vm815_vm0, %v678_v2  ;;  %v690_v18 = vpack.c.bf16 %v435_v60, %v432_v59 }
 0x162   : > { %v3307_v23 = vpop.f32.mrb[32].mxu0  ;;  %v3309_v24 = vpop.f32.mrb[32].mxu1 }
 0x163   : > { %3957 = vst [vmem:[#allocation8_spill] sm:$0xff] %v3309_v24  ;;  %v1108_v25 = vpop.f32.mrb[33].mxu0  ;;  %v1492_v26 = vpop.f32.mrb[33].mxu1 }
 0x164   : > { %v3311_v37 = vpop.f32.mrb[34].mxu0  ;;  %v3313_v38 = vpop.f32.mrb[34].mxu1  ;;  %v400_v25 = vld [vmem:[%s2792_s30 + $0x6f0] sm:$0xff]  ;;  %v403_v26 = vld [vmem:[%s2792_s30 + $0x708] sm:$0xff] }
 0x165   : > { %3958 = vst [vmem:[#allocation9_spill] sm:$0xff] %v3313_v38  ;;  %v1111_v43 = vpop.f32.mrb[35].mxu0  ;;  %v1495_v44 = vpop.f32.mrb[35].mxu1  ;;  %v673_v53 = vpack.c.bf16 %v403_v26, %v400_v25  ;;  %v413_v25 = vld [vmem:[%s2792_s30 + $0x758] sm:$0xff]  ;;  %v416_v26 = vld [vmem:[%s2792_s30 + $0x770] sm:$0xff] }
 0x166   : > { %v444_v43 = vld [vmem:[%s2792_s30 + $0x850] sm:$0xff]  ;;  %v447_v44 = vld [vmem:[%s2792_s30 + $0x868] sm:$0xff] }
 0x167   : > { %1321 = vmatmul.mubr.bf16.gmra.mrb[140].mxu0 %v667_v33  ;;  %2633 = vmatmul.mubr.msk.bf16.gmra.mrb[140].mxu1 %vm815_vm0, %v681_v34  ;;  %v438_v33 = vld [vmem:[%s2792_s30 + $0x820] sm:$0xff]  ;;  %v441_v34 = vld [vmem:[%s2792_s30 + $0x838] sm:$0xff] }
 0x168   : > { %1328 = vmatprep.mubr.bf16.mxu0 %v671_v41  ;;  %2636 = vmatprep.mubr.msk.bf16.mxu1 %vm815_vm0, %v684_v42  ;;  %v407_v41 = vld [vmem:[%s2792_s30 + $0x728] sm:$0xff]  ;;  %v410_v42 = vld [vmem:[%s2792_s30 + $0x740] sm:$0xff]  ;;  %v693_v54 = vpack.c.bf16 %v441_v34, %v438_v33  ;;  %v456_v33 = vld [vmem:[%s2792_s30 + $0x8b0] sm:$0xff] }
 0x169   : > { %v459_v34 = vld [vmem:[%s2792_s30 + $0x8c8] sm:$0xff] }
 0x16a   : > { %v3325_v1 = vpop.f32.mrb[36].mxu0  ;;  %v3327_v2 = vpop.f32.mrb[36].mxu1 }
 0x16b   : > { %3959 = vst [vmem:[#allocation10_spill] sm:$0xff] %v3327_v2  ;;  %v1116_v4 = vpop.f32.mrb[37].mxu0  ;;  %v1500_v5 = vpop.f32.mrb[37].mxu1 }
 0x16c   : > { %v3329_v11 = vpop.f32.mrb[38].mxu0  ;;  %v3331_v12 = vpop.f32.mrb[38].mxu1  ;;  %v677_v4 = vpack.c.bf16 %v410_v42, %v407_v41  ;;  %v696_v5 = vpack.c.bf16 %v447_v44, %v444_v43 }
 0x16d   : > { %3960 = vst [vmem:[#allocation11_spill] sm:$0xff] %v3331_v12  ;;  %v1119_v19 = vpop.f32.mrb[39].mxu0  ;;  %v1503_v20 = vpop.f32.mrb[39].mxu1 }
 0x16e   : > { %v450_v19 = vld [vmem:[%s2792_s30 + $0x880] sm:$0xff]  ;;  %v453_v20 = vld [vmem:[%s2792_s30 + $0x898] sm:$0xff] }
 0x16f   : > { %1329 = vmatmul.mubr.bf16.gmra.mrb[144].mxu0 %v670_v7  ;;  %2637 = vmatmul.mubr.msk.bf16.gmra.mrb[144].mxu1 %vm815_vm0, %v687_v8 }
 0x170   : > { %1336 = vmatprep.mubr.bf16.mxu0 %v674_v17  ;;  %2640 = vmatprep.mubr.msk.bf16.mxu1 %vm815_vm0, %v690_v18  ;;  %v406_v17 = vld [vmem:[%s2792_s30 + $0x720] sm:$0xff]  ;;  %v409_v18 = vld [vmem:[%s2792_s30 + $0x738] sm:$0xff] }
 0x172   : > { %v3343_v45 = vpop.f32.mrb[40].mxu0  ;;  %v3345_v46 = vpop.f32.mrb[40].mxu1 }
 0x173   : > { %3961 = vst [vmem:[#allocation12_spill] sm:$0xff] %v3345_v46  ;;  %v1124_v47 = vpop.f32.mrb[41].mxu0  ;;  %v1508_v48 = vpop.f32.mrb[41].mxu1 }
 0x174   : > { %v3347_v59 = vpop.f32.mrb[42].mxu0  ;;  %v3349_v60 = vpop.f32.mrb[42].mxu1  ;;  %v676_v47 = vpack.c.bf16 %v409_v18, %v406_v17  ;;  %v699_v48 = vpack.c.bf16 %v453_v20, %v450_v19  ;;  %v462_v17 = vld [vmem:[%s2792_s30 + $0x8e0] sm:$0xff]  ;;  %v465_v18 = vld [vmem:[%s2792_s30 + $0x8f8] sm:$0xff]  ;;  %v419_v19 = vld [vmem:[%s2792_s30 + $0x788] sm:$0xff] }
 0x175   : > { %3962 = vst [vmem:[#allocation13_spill] sm:$0xff] %v3349_v60  ;;  %v1127_v7 = vpop.f32.mrb[43].mxu0  ;;  %v1511_v8 = vpop.f32.mrb[43].mxu1  ;;  %v422_v20 = vld [vmem:[%s2792_s30 + $0x7a0] sm:$0xff]  ;;  %v468_v60 = vld [vmem:[%s2792_s30 + $0x910] sm:$0xff] }
 0x177   : > { %1337 = vmatmul.mubr.bf16.gmra.mrb[148].mxu0 %v673_v53  ;;  %2641 = vmatmul.mubr.msk.bf16.gmra.mrb[148].mxu1 %vm815_vm0, %v693_v54 }
 0x178   : > { %1344 = vmatprep.mubr.bf16.mxu0 %v677_v4  ;;  %2644 = vmatprep.mubr.msk.bf16.mxu1 %vm815_vm0, %v696_v5  ;;  %v680_v4 = vpack.c.bf16 %v416_v26, %v413_v25  ;;  %v702_v5 = vpack.c.bf16 %v459_v34, %v456_v33 }
 0x17a   : > { %v3361_v41 = vpop.f32.mrb[44].mxu0  ;;  %v3363_v42 = vpop.f32.mrb[44].mxu1 }
 0x17b   : > { %3963 = vst [vmem:[#allocation14_spill] sm:$0xff] %v3363_v42  ;;  %v1132_v43 = vpop.f32.mrb[45].mxu0  ;;  %v1516_v44 = vpop.f32.mrb[45].mxu1 }
 0x17c   : > { %v3365_v53 = vpop.f32.mrb[46].mxu0  ;;  %v3367_v54 = vpop.f32.mrb[46].mxu1  ;;  %v412_v43 = vld [vmem:[%s2792_s30 + $0x750] sm:$0xff]  ;;  %v415_v44 = vld [vmem:[%s2792_s30 + $0x768] sm:$0xff] }
 0x17d   : > { %3964 = vst [vmem:[#allocation15_spill] sm:$0xff] %v3367_v54  ;;  %v1135_v7 = vpop.f32.mrb[47].mxu0  ;;  %v1519_v8 = vpop.f32.mrb[47].mxu1  ;;  %v471_v54 = vld [vmem:[%s2792_s30 + $0x928] sm:$0xff] }
 0x17e   : > { %v683_v7 = vpack.c.bf16 %v422_v20, %v419_v19  ;;  %v708_v8 = vpack.c.bf16 %v471_v54, %v468_v60 }
 0x17f   : > { %1345 = vmatmul.mubr.bf16.gmra.mrb[152].mxu0 %v676_v47  ;;  %2645 = vmatmul.mubr.msk.bf16.gmra.mrb[152].mxu1 %vm815_vm0, %v699_v48  ;;  %v679_v47 = vpack.c.bf16 %v415_v44, %v412_v43  ;;  %v705_v48 = vpack.c.bf16 %v465_v18, %v462_v17  ;;  %v474_v43 = vld [vmem:[%s2792_s30 + $0x940] sm:$0xff]  ;;  %v477_v44 = vld [vmem:[%s2792_s30 + $0x958] sm:$0xff]  ;;  %v428_v18 = vld [vmem:[%s2792_s30 + $0x7d0] sm:$0xff] }
 0x180   : > { %1352 = vmatprep.mubr.bf16.mxu0 %v680_v4  ;;  %2648 = vmatprep.mubr.msk.bf16.mxu1 %vm815_vm0, %v702_v5  ;;  %v425_v17 = vld [vmem:[%s2792_s30 + $0x7b8] sm:$0xff]  ;;  %v711_v20 = vpack.c.bf16 %v477_v44, %v474_v43  ;;  %v431_v43 = vld [vmem:[%s2792_s30 + $0x7e8] sm:$0xff]  ;;  %v434_v44 = vld [vmem:[%s2792_s30 + $0x800] sm:$0xff] }
 0x182   : > { %v3379_v25 = vpop.f32.mrb[48].mxu0  ;;  %v3381_v26 = vpop.f32.mrb[48].mxu1 }
 0x183   : > { %3965 = vst [vmem:[#allocation16_spill] sm:$0xff] %v3381_v26  ;;  %v1140_v33 = vpop.f32.mrb[49].mxu0  ;;  %v1524_v34 = vpop.f32.mrb[49].mxu1  ;;  %v480_v26 = vld [vmem:[%s2792_s30 + $0x970] sm:$0xff] }
 0x184   : > { %v3383_v4 = vpop.f32.mrb[50].mxu0  ;;  %v3385_v5 = vpop.f32.mrb[50].mxu1  ;;  %v418_v33 = vld [vmem:[%s2792_s30 + $0x780] sm:$0xff]  ;;  %v421_v34 = vld [vmem:[%s2792_s30 + $0x798] sm:$0xff] }
 0x185   : > { %3966 = vst [vmem:[#allocation17_spill] sm:$0xff] %v3385_v5  ;;  %v1143_v46 = vpop.f32.mrb[51].mxu0  ;;  %v1527_v42 = vpop.f32.mrb[51].mxu1  ;;  %v483_v5 = vld [vmem:[%s2792_s30 + $0x988] sm:$0xff]  ;;  %v682_v54 = vpack.c.bf16 %v421_v34, %v418_v33  ;;  %v486_v33 = vld [vmem:[%s2792_s30 + $0x9a0] sm:$0xff]  ;;  %v489_v34 = vld [vmem:[%s2792_s30 + $0x9b8] sm:$0xff] }
 0x187   : > { %1353 = vmatmul.mubr.bf16.gmra.mrb[156].mxu0 %v679_v47  ;;  %2649 = vmatmul.mubr.msk.bf16.gmra.mrb[156].mxu1 %vm815_vm0, %v705_v48 }
 0x188   : > { %1360 = vmatprep.mubr.bf16.mxu0 %v683_v7  ;;  %2652 = vmatprep.mubr.msk.bf16.mxu1 %vm815_vm0, %v708_v8  ;;  %v686_v7 = vpack.c.bf16 %v428_v18, %v425_v17  ;;  %v714_v8 = vpack.c.bf16 %v483_v5, %v480_v26  ;;  %v717_v18 = vpack.c.bf16 %v489_v34, %v486_v33  ;;  %v437_v33 = vld [vmem:[%s2792_s30 + $0x818] sm:$0xff]  ;;  %v440_v34 = vld [vmem:[%s2792_s30 + $0x830] sm:$0xff] }
 0x18a   : > { %v3397_v19 = vpop.f32.mrb[52].mxu0  ;;  %v3399_v46 = vpop.f32.mrb[52].mxu1 }
 0x18b   : > { %3967 = vst [vmem:[#allocation18_spill] sm:$0xff] %v3399_v46  ;;  %v1148_v60 = vpop.f32.mrb[53].mxu0  ;;  %v1532_v42 = vpop.f32.mrb[53].mxu1  ;;  %v492_v46 = vld [vmem:[%s2792_s30 + $0x9d0] sm:$0xff] }
 0x18c   : > { %v3401_v47 = vpop.f32.mrb[54].mxu0  ;;  %v3403_v48 = vpop.f32.mrb[54].mxu1  ;;  %v424_v60 = vld [vmem:[%s2792_s30 + $0x7b0] sm:$0xff]  ;;  %v427_v42 = vld [vmem:[%s2792_s30 + $0x7c8] sm:$0xff] }
 0x18d   : > { %3968 = vst [vmem:[#allocation19_spill] sm:$0xff] %v3403_v48  ;;  %v1151_v38 = vpop.f32.mrb[55].mxu0  ;;  %v1535_v12 = vpop.f32.mrb[55].mxu1  ;;  %v495_v48 = vld [vmem:[%s2792_s30 + $0x9e8] sm:$0xff]  ;;  %v685_v5 = vpack.c.bf16 %v427_v42, %v424_v60  ;;  %v498_v60 = vld [vmem:[%s2792_s30 + $0xa00] sm:$0xff]  ;;  %v501_v42 = vld [vmem:[%s2792_s30 + $0xa18] sm:$0xff] }
 0x18f   : > { %1361 = vmatmul.mubr.bf16.gmra.mrb[160].mxu0 %v682_v54  ;;  %2653 = vmatmul.mubr.msk.bf16.gmra.mrb[160].mxu1 %vm815_vm0, %v711_v20 }
 0x190   : > { %1368 = vmatprep.mubr.bf16.mxu0 %v686_v7  ;;  %2656 = vmatprep.mubr.msk.bf16.mxu1 %vm815_vm0, %v714_v8  ;;  %v689_v7 = vpack.c.bf16 %v434_v44, %v431_v43  ;;  %v720_v8 = vpack.c.bf16 %v495_v48, %v492_v46  ;;  %v723_v43 = vpack.c.bf16 %v501_v42, %v498_v60  ;;  %v510_v60 = vld [vmem:[%s2792_s30 + $0xa60] sm:$0xff]  ;;  %v513_v42 = vld [vmem:[%s2792_s30 + $0xa78] sm:$0xff] }
 0x191   : > { %v729_v22 = vpack.c.bf16 %v513_v42, %v510_v60 }
 0x192   : > { %v3415_v17 = vpop.f32.mrb[56].mxu0  ;;  %v3417_v38 = vpop.f32.mrb[56].mxu1 }
 0x193   : > { %3969 = vst [vmem:[#allocation20_spill] sm:$0xff] %v3417_v38  ;;  %v1156_v12 = vpop.f32.mrb[57].mxu0  ;;  %v1540_v26 = vpop.f32.mrb[57].mxu1  ;;  %v504_v38 = vld [vmem:[%s2792_s30 + $0xa30] sm:$0xff] }
 0x194   : > { %v3419_v54 = vpop.f32.mrb[58].mxu0  ;;  %v3421_v20 = vpop.f32.mrb[58].mxu1  ;;  %v430_v12 = vld [vmem:[%s2792_s30 + $0x7e0] sm:$0xff]  ;;  %v433_v26 = vld [vmem:[%s2792_s30 + $0x7f8] sm:$0xff] }
 0x195   : > { %3970 = vst [vmem:[#allocation21_spill] sm:$0xff] %v3421_v20  ;;  %v1159_v24 = vpop.f32.mrb[59].mxu0  ;;  %v1543_v2 = vpop.f32.mrb[59].mxu1  ;;  %v688_v48 = vpack.c.bf16 %v433_v26, %v430_v12  ;;  %v436_v12 = vld [vmem:[%s2792_s30 + $0x810] sm:$0xff]  ;;  %v439_v26 = vld [vmem:[%s2792_s30 + $0x828] sm:$0xff] }
 0x197   : > { %1369 = vmatmul.mubr.bf16.gmra.mrb[164].mxu0 %v685_v5  ;;  %2657 = vmatmul.mubr.msk.bf16.gmra.mrb[164].mxu1 %vm815_vm0, %v717_v18  ;;  %v692_v18 = vpack.c.bf16 %v440_v34, %v437_v33  ;;  %v516_v33 = vld [vmem:[%s2792_s30 + $0xa90] sm:$0xff]  ;;  %v519_v34 = vld [vmem:[%s2792_s30 + $0xaa8] sm:$0xff] }
 0x198   : > { %1376 = vmatprep.mubr.bf16.mxu0 %v689_v7  ;;  %2660 = vmatprep.mubr.msk.bf16.mxu1 %vm815_vm0, %v720_v8  ;;  %v726_v7 = vpack.c.bf16 %v507_v28, %v504_v38  ;;  %v443_v28 = vld [vmem:[%s2792_s30 + $0x848] sm:$0xff] }
 0x19a   : > { %v3433_v20 = vpop.f32.mrb[60].mxu0  ;;  %v3435_v24 = vpop.f32.mrb[60].mxu1 }
 0x19b   : > { %3971 = vst [vmem:[#allocation22_spill] sm:$0xff] %v3435_v24  ;;  %v1164_v2 = vpop.f32.mrb[61].mxu0  ;;  %v1548_v46 = vpop.f32.mrb[61].mxu1  ;;  %v691_v24 = vpack.c.bf16 %v439_v26, %v436_v12 }
 0x19c   : > { %v3437_v44 = vpop.f32.mrb[62].mxu0  ;;  %v3439_v5 = vpop.f32.mrb[62].mxu1  ;;  %v3444_v2 = vld [vmem:[%s3949_s2] ss:$0 sm:$0xff] }
 0x19d   : > { %3972 = vst [vmem:[#allocation23_spill] sm:$0xff] %v3439_v5  ;;  %v1167_v8 = vpop.f32.mrb[63].mxu0  ;;  %v1551_v62 = vpop.f32.mrb[63].mxu1  ;;  %v1051_v38 = vadd.f32 %v3444_v2, %v3181_v29  ;;  %v1043_v46 = vadd.f32 %v3444_v2, %v3163_v9  ;;  %v1046_v29 = vadd.f32 %v3444_v2, %v3167_v15 }
 0x19e   : > { %v446_v62 = vld [vmem:[%s2792_s30 + $0x860] sm:$0xff] }
 0x19f   : > { %1377 = vmatmul.mubr.bf16.gmra.mrb[168].mxu0 %v688_v48  ;;  %2661 = vmatmul.mubr.msk.bf16.gmra.mrb[168].mxu1 %vm815_vm0, %v723_v43 }
 0x1a0   : > { %1384 = vmatprep.mubr.bf16.mxu0 %v692_v18  ;;  %2664 = vmatprep.mubr.msk.bf16.mxu1 %vm815_vm0, %v726_v7  ;;  %v1054_v18 = vadd.f32 %v3444_v2, %v3185_v35 }
 0x1a2   : > { %v3461_v48 = vpop.f32.mrb[64].mxu0  ;;  %v2558_v43 = vpop.f32.mrb[64].mxu1 }
 0x1a3   : > { %v1596_v7 = vadd.f32 %v2558_v43, %v1051_v38  ;;  %v1172_v8 = vpop.f32.mrb[65].mxu0  ;;  %v1587_v5 = vpop.f32.mrb[65].mxu1  ;;  %v695_v38 = vpack.c.bf16 %v446_v62, %v443_v28  ;;  %v732_v43 = vpack.c.bf16 %v519_v34, %v516_v33  ;;  %v442_v28 = vld [vmem:[%s2792_s30 + $0x840] sm:$0xff]  ;;  %v445_v62 = vld [vmem:[%s2792_s30 + $0x858] sm:$0xff] }
 0x1a4   : > { %v1588_v9 = vadd.f32 %v1587_v5, %v1043_v46  ;;  %v3472_v52 = vpop.f32.mrb[66].mxu0  ;;  %v2559_v35 = vpop.f32.mrb[66].mxu1  ;;  %v522_v34 = vld [vmem:[%s2792_s30 + $0xac0] sm:$0xff]  ;;  %v525_v46 = vld [vmem:[%s2792_s30 + $0xad8] sm:$0xff] }
 0x1a5   : > { %v2100_v12 = vmax.f32 %v1596_v7, 0.0  ;;  %v1599_v26 = vadd.f32 %v2559_v35, %v1054_v18  ;;  %v1175_v15 = vpop.f32.mrb[67].mxu0  ;;  %v1590_v60 = vpop.f32.mrb[67].mxu1  ;;  %v449_v18 = vld [vmem:[%s2792_s30 + $0x878] sm:$0xff]  ;;  %v1067_v7 = vadd.f32 %v3444_v2, %v3217_v3  ;;  %v735_v3 = vpack.c.bf16 %v525_v46, %v522_v34  ;;  %v448_v46 = vld [vmem:[%s2792_s30 + $0x870] sm:$0xff] }
 0x1a6   : > { %v2098_v42 = vmax.f32 %v1588_v9, 0.0  ;;  %v1591_v8 = vadd.f32 %v1590_v60, %v1046_v29  ;;  %v452_v29 = vld [vmem:[%s2792_s30 + $0x890] sm:$0xff]  ;;  %v694_v60 = vpack.c.bf16 %v445_v62, %v442_v28 }
 0x1a7   : > { %2228 = vst [vmem:[%s3470_s22 + $0x10] sm:$0xff] %v2100_v12  ;;  %v2101_v5 = vmax.f32 %v1599_v26, 0.0  ;;  %1385 = vmatmul.mubr.bf16.gmra.mrb[172].mxu0 %v691_v24  ;;  %2665 = vmatmul.mubr.msk.bf16.gmra.mrb[172].mxu1 %vm815_vm0, %v729_v22  ;;  %v528_v9 = vld [vmem:[%s2792_s30 + $0xaf0] sm:$0xff]  ;;  %v531_v24 = vld [vmem:[%s2792_s30 + $0xb08] sm:$0xff]  ;;  %v1059_v22 = vadd.f32 %v3444_v2, %v3199_v49 }
 0x1a8   : > { %2226 = vst [vmem:[%s3470_s22] sm:$0xff] %v2098_v42  ;;  %v2099_v33 = vmax.f32 %v1591_v8, 0.0  ;;  %1392 = vmatprep.mubr.bf16.mxu0 %v695_v38  ;;  %2668 = vmatprep.mubr.msk.bf16.mxu1 %vm815_vm0, %v732_v43  ;;  %v1070_v38 = vadd.f32 %v3444_v2, %v3221_v13  ;;  %v1062_v42 = vadd.f32 %v3444_v2, %v3203_v55 }
 0x1a9   : > { %2229 = vst [vmem:[%s3470_s22 + $0x18] sm:$0xff] %v2101_v5  ;;  %v738_v40 = vpack.c.bf16 %v531_v24, %v528_v9  ;;  %v534_v9 = vld [vmem:[%s2792_s30 + $0xb20] sm:$0xff]  ;;  %v537_v24 = vld [vmem:[%s2792_s30 + $0xb38] sm:$0xff] }
 0x1aa   : > { %2227 = vst [vmem:[%s3470_s22 + $0x8] sm:$0xff] %v2099_v33  ;;  %v3492_v35 = vpop.f32.mrb[68].mxu0  ;;  %v2562_v12 = vpop.f32.mrb[68].mxu1  ;;  %v698_v33 = vpack.c.bf16 %v452_v29, %v449_v18  ;;  %v451_v18 = vld [vmem:[%s2792_s30 + $0x888] sm:$0xff] }
 0x1ab   : > { %v1612_v43 = vadd.f32 %v2562_v12, %v1067_v7  ;;  %v1180_v26 = vpop.f32.mrb[69].mxu0  ;;  %v1603_v15 = vpop.f32.mrb[69].mxu1  ;;  %v458_v12 = vld [vmem:[%s2792_s30 + $0x8c0] sm:$0xff] }
 0x1ac   : > { %v1604_v8 = vadd.f32 %v1603_v15, %v1059_v22  ;;  %v3498_v49 = vpop.f32.mrb[70].mxu0  ;;  %v2563_v5 = vpop.f32.mrb[70].mxu1  ;;  %v455_v22 = vld [vmem:[%s2792_s30 + $0x8a8] sm:$0xff]  ;;  %v1075_v26 = vadd.f32 %v3444_v2, %v3235_v31 }
 0x1ad   : > { %v2104_v0 = vmax.f32 %v1612_v43, 0.0  ;;  %v1615_v13 = vadd.f32 %v2563_v5, %v1070_v38  ;;  %v1183_v7 = vpop.f32.mrb[71].mxu0  ;;  %v1606_v28 = vpop.f32.mrb[71].mxu1  ;;  %v540_v38 = vld [vmem:[%s2792_s30 + $0xb50] sm:$0xff]  ;;  %v543_v43 = vld [vmem:[%s2792_s30 + $0xb68] sm:$0xff]  ;;  %v697_v5 = vpack.c.bf16 %v451_v18, %v448_v46 }
 0x1ae   : > { %v2102_v62 = vmax.f32 %v1604_v8, 0.0  ;;  %v1607_v34 = vadd.f32 %v1606_v28, %v1062_v42  ;;  %v701_v28 = vpack.c.bf16 %v458_v12, %v455_v22  ;;  %v549_v12 = vld [vmem:[%s2792_s30 + $0xb98] sm:$0xff] }
 0x1af   : > { %2232 = vst [vmem:[%s3470_s22 + $0x30] sm:$0xff] %v2104_v0  ;;  %v2105_v55 = vmax.f32 %v1615_v13, 0.0  ;;  %1393 = vmatmul.mubr.bf16.gmra.mrb[176].mxu0 %v694_v60  ;;  %2669 = vmatmul.mubr.msk.bf16.gmra.mrb[176].mxu1 %vm815_vm0, %v735_v3  ;;  %v1083_v0 = vadd.f32 %v3444_v2, %v3253_v57  ;;  %v741_v57 = vpack.c.bf16 %v537_v24, %v534_v9  ;;  %v454_v9 = vld [vmem:[%s2792_s30 + $0x8a0] sm:$0xff]  ;;  %v457_v24 = vld [vmem:[%s2792_s30 + $0x8b8] sm:$0xff] }
 0x1b0   : > { %2230 = vst [vmem:[%s3470_s22 + $0x20] sm:$0xff] %v2102_v62  ;;  %v2103_v29 = vmax.f32 %v1607_v34, 0.0  ;;  %1400 = vmatprep.mubr.bf16.mxu0 %v698_v33  ;;  %2672 = vmatprep.mubr.msk.bf16.mxu1 %vm815_vm0, %v738_v40  ;;  %v1086_v40 = vadd.f32 %v3444_v2, %v3257_v63  ;;  %v1078_v33 = vadd.f32 %v3444_v2, %v3239_v39 }
 0x1b1   : > { %2233 = vst [vmem:[%s3470_s22 + $0x38] sm:$0xff] %v2105_v55  ;;  %v744_v62 = vpack.c.bf16 %v543_v43, %v540_v38  ;;  %v461_v38 = vld [vmem:[%s2792_s30 + $0x8d8] sm:$0xff]  ;;  %v1099_v43 = vadd.f32 %v3444_v2, %v3289_v51 }
 0x1b2   : > { %2231 = vst [vmem:[%s3470_s22 + $0x28] sm:$0xff] %v2103_v29  ;;  %v3518_v15 = vpop.f32.mrb[72].mxu0  ;;  %v2566_v60 = vpop.f32.mrb[72].mxu1 }
 0x1b3   : > { %v1628_v3 = vadd.f32 %v2566_v60, %v1083_v0  ;;  %v1188_v42 = vpop.f32.mrb[73].mxu0  ;;  %v1619_v8 = vpop.f32.mrb[73].mxu1  ;;  %v546_v0 = vld [vmem:[%s2792_s30 + $0xb80] sm:$0xff]  ;;  %v552_v60 = vld [vmem:[%s2792_s30 + $0xbb0] sm:$0xff] }
 0x1b4   : > { %v1620_v13 = vadd.f32 %v1619_v8, %v1075_v26  ;;  %v3524_v31 = vpop.f32.mrb[74].mxu0  ;;  %v2567_v7 = vpop.f32.mrb[74].mxu1  ;;  %v464_v26 = vld [vmem:[%s2792_s30 + $0x8f0] sm:$0xff]  ;;  %v747_v51 = vpack.c.bf16 %v549_v12, %v546_v0  ;;  %v463_v0 = vld [vmem:[%s2792_s30 + $0x8e8] sm:$0xff]  ;;  %v558_v12 = vld [vmem:[%s2792_s30 + $0xbe0] sm:$0xff] }
 0x1b5   : > { %v2108_v34 = vmax.f32 %v1628_v3, 0.0  ;;  %v1631_v63 = vadd.f32 %v2567_v7, %v1086_v40  ;;  %v1191_v55 = vpop.f32.mrb[75].mxu0  ;;  %v1622_v46 = vpop.f32.mrb[75].mxu1  ;;  %v555_v40 = vld [vmem:[%s2792_s30 + $0xbc8] sm:$0xff]  ;;  %v1091_v3 = vadd.f32 %v3444_v2, %v3271_v21  ;;  %v700_v7 = vpack.c.bf16 %v457_v24, %v454_v9  ;;  %v460_v24 = vld [vmem:[%s2792_s30 + $0x8d0] sm:$0xff] }
 0x1b6   : > { %v2106_v18 = vmax.f32 %v1620_v13, 0.0  ;;  %v1623_v29 = vadd.f32 %v1622_v46, %v1078_v33  ;;  %v750_v55 = vpack.c.bf16 %v555_v40, %v552_v60 }
 0x1b7   : > { %2236 = vst [vmem:[%s3470_s22 + $0x50] sm:$0xff] %v2108_v34  ;;  %v2109_v39 = vmax.f32 %v1631_v63, 0.0  ;;  %1401 = vmatmul.mubr.bf16.gmra.mrb[180].mxu0 %v697_v5  ;;  %2673 = vmatmul.mubr.msk.bf16.gmra.mrb[180].mxu1 %vm815_vm0, %v741_v57  ;;  %v1102_v5 = vadd.f32 %v3444_v2, %v3293_v61  ;;  %v704_v63 = vpack.c.bf16 %v464_v26, %v461_v38  ;;  %v561_v38 = vld [vmem:[%s2792_s30 + $0xbf8] sm:$0xff] }
 0x1b8   : > { %2234 = vst [vmem:[%s3470_s22 + $0x40] sm:$0xff] %v2106_v18  ;;  %v2107_v22 = vmax.f32 %v1623_v29, 0.0  ;;  %1408 = vmatprep.mubr.bf16.mxu0 %v701_v28  ;;  %2676 = vmatprep.mubr.msk.bf16.mxu1 %vm815_vm0, %v744_v62  ;;  %v1094_v28 = vadd.f32 %v3444_v2, %v3275_v27  ;;  %v1107_v26 = vadd.f32 %v3444_v2, %v3307_v23 }
 0x1b9   : > { %2237 = vst [vmem:[%s3470_s22 + $0x58] sm:$0xff] %v2109_v39 }
 0x1ba   : > { %2235 = vst [vmem:[%s3470_s22 + $0x48] sm:$0xff] %v2107_v22  ;;  %v3544_v42 = vpop.f32.mrb[76].mxu0  ;;  %v2570_v8 = vpop.f32.mrb[76].mxu1 }
 0x1bb   : > { %v1644_v57 = vadd.f32 %v2570_v8, %v1099_v43  ;;  %v1196_v33 = vpop.f32.mrb[77].mxu0  ;;  %v1635_v13 = vpop.f32.mrb[77].mxu1  ;;  %v1115_v43 = vadd.f32 %v3444_v2, %v3325_v1  ;;  %v1110_v1 = vadd.f32 %v3444_v2, %v3311_v37  ;;  %v1131_v37 = vadd.f32 %v3444_v2, %v3361_v41 }
 0x1bc   : > { %v1636_v62 = vadd.f32 %v1635_v13, %v1091_v3  ;;  %v3550_v21 = vpop.f32.mrb[78].mxu0  ;;  %v2571_v34 = vpop.f32.mrb[78].mxu1  ;;  %v1118_v3 = vadd.f32 %v3444_v2, %v3329_v11  ;;  %v703_v33 = vpack.c.bf16 %v463_v0, %v460_v24  ;;  %v753_v13 = vpack.c.bf16 %v561_v38, %v558_v12 }
 0x1bd   : > { %v2112_v46 = vmax.f32 %v1644_v57, 0.0  ;;  %v1647_v61 = vadd.f32 %v2571_v34, %v1102_v5  ;;  %v1199_v18 = vpop.f32.mrb[79].mxu0  ;;  %v1638_v29 = vpop.f32.mrb[79].mxu1  ;;  %v1126_v41 = vadd.f32 %v3444_v2, %v3347_v59  ;;  %v1139_v59 = vadd.f32 %v3444_v2, %v3379_v25 }
 0x1be   : > { %v2110_v39 = vmax.f32 %v1636_v62, 0.0  ;;  %v1639_v9 = vadd.f32 %v1638_v29, %v1094_v28  ;;  %v1123_v18 = vadd.f32 %v3444_v2, %v3343_v45 }
 0x1bf   : > { %2240 = vst [vmem:[%s3470_s22 + $0x70] sm:$0xff] %v2112_v46  ;;  %v2113_v27 = vmax.f32 %v1647_v61, 0.0  ;;  %1409 = vmatmul.mubr.bf16.gmra.mrb[184].mxu0 %v700_v7  ;;  %2677 = vmatmul.mubr.msk.bf16.gmra.mrb[184].mxu1 %vm815_vm0, %v747_v51 }
 0x1c0   : > { %2238 = vst [vmem:[%s3470_s22 + $0x60] sm:$0xff] %v2110_v39  ;;  %v2111_v22 = vmax.f32 %v1639_v9, 0.0  ;;  %1416 = vmatprep.mubr.bf16.mxu0 %v704_v63  ;;  %2680 = vmatprep.mubr.msk.bf16.mxu1 %vm815_vm0, %v750_v55  ;;  %v1134_v9 = vadd.f32 %v3444_v2, %v3365_v53 }
 0x1c1   : > { %2241 = vst [vmem:[%s3470_s22 + $0x78] sm:$0xff] %v2113_v27 }
 0x1c2   : > { %2239 = vst [vmem:[%s3470_s22 + $0x68] sm:$0xff] %v2111_v22  ;;  %v3566_v60 = vpop.f32.mrb[80].mxu0  ;;  %v2574_v40 = vpop.f32.mrb[80].mxu1 }
 0x1c3   : > { %v1660_v8 = vadd.f32 %v2574_v40, %v1115_v43  ;;  %v1204_v5 = vpop.f32.mrb[81].mxu0  ;;  %v1651_v57 = vpop.f32.mrb[81].mxu1 }
 0x1c4   : > { %v1652_v7 = vadd.f32 %v1651_v57, %v1107_v26  ;;  %v3572_v23 = vpop.f32.mrb[82].mxu0  ;;  %v2575_v51 = vpop.f32.mrb[82].mxu1  ;;  %v1147_v57 = vadd.f32 %v3444_v2, %v3397_v19  ;;  %v1142_v19 = vadd.f32 %v3444_v2, %v3383_v4  ;;  %v1155_v4 = vadd.f32 %v3444_v2, %v3415_v17 }
 0x1c5   : > { %v2116_v28 = vmax.f32 %v1660_v8, 0.0  ;;  %v1663_v62 = vadd.f32 %v2575_v51, %v1118_v3  ;;  %v1207_v34 = vpop.f32.mrb[83].mxu0  ;;  %v1654_v11 = vpop.f32.mrb[83].mxu1 }
 0x1c6   : > { %v2114_v63 = vmax.f32 %v1652_v7, 0.0  ;;  %v1655_v55 = vadd.f32 %v1654_v11, %v1110_v1  ;;  %v1150_v1 = vadd.f32 %v3444_v2, %v3401_v47 }
 0x1c7   : > { %2244 = vst [vmem:[%s3470_s22 + $0x90] sm:$0xff] %v2116_v28  ;;  %v2117_v46 = vmax.f32 %v1663_v62, 0.0  ;;  %1417 = vmatmul.mubr.bf16.gmra.mrb[188].mxu0 %v703_v33  ;;  %2681 = vmatmul.mubr.msk.bf16.gmra.mrb[188].mxu1 %vm815_vm0, %v753_v13 }
 0x1c8   : > { %2242 = vst [vmem:[%s3470_s22 + $0x80] sm:$0xff] %v2114_v63  ;;  %v2115_v61 = vmax.f32 %v1655_v55, 0.0 }
 0x1c9   : > { %2245 = vst [vmem:[%s3470_s22 + $0x98] sm:$0xff] %v2117_v46 }
 0x1ca   : > { %2243 = vst [vmem:[%s3470_s22 + $0x88] sm:$0xff] %v2115_v61  ;;  %v3583_v29 = vpop.f32.mrb[84].mxu0  ;;  %v2578_v39 = vpop.f32.mrb[84].mxu1 }
 0x1cb   : > { %v1676_v27 = vadd.f32 %v2578_v39, %v1131_v37  ;;  %v1212_v24 = vpop.f32.mrb[85].mxu0  ;;  %v1667_v22 = vpop.f32.mrb[85].mxu1  ;;  %v1163_v39 = vadd.f32 %v3444_v2, %v3433_v20  ;;  %v1158_v20 = vadd.f32 %v3444_v2, %v3419_v54  ;;  %v1171_v54 = vadd.f32 %v3444_v2, %v3461_v48 }
 0x1cc   : > { %v1668_v0 = vadd.f32 %v1667_v22, %v1123_v18  ;;  %v3589_v12 = vpop.f32.mrb[86].mxu0  ;;  %v2579_v45 = vpop.f32.mrb[86].mxu1  ;;  %v1166_v24 = vadd.f32 %v3444_v2, %v3437_v44 }
 0x1cd   : > { %v2120_v38 = vmax.f32 %v1676_v27, 0.0  ;;  %v1679_v43 = vadd.f32 %v2579_v45, %v1134_v9  ;;  %v1215_v26 = vpop.f32.mrb[87].mxu0  ;;  %v1670_v40 = vpop.f32.mrb[87].mxu1 }
 0x1ce   : > { %v2118_v3 = vmax.f32 %v1668_v0, 0.0  ;;  %v1671_v8 = vadd.f32 %v1670_v40, %v1126_v41 }
 0x1cf   : > { %2248 = vst [vmem:[%s3470_s22 + $0xb0] sm:$0xff] %v2120_v38  ;;  %v2121_v53 = vmax.f32 %v1679_v43, 0.0 }
 0x1d0   : > { %2246 = vst [vmem:[%s3470_s22 + $0xa0] sm:$0xff] %v2118_v3  ;;  %v2119_v5 = vmax.f32 %v1671_v8, 0.0 }
 0x1d1   : > { %2249 = vst [vmem:[%s3470_s22 + $0xb8] sm:$0xff] %v2121_v53 }
 0x1d2   : > { %2247 = vst [vmem:[%s3470_s22 + $0xa8] sm:$0xff] %v2119_v5  ;;  %v3599_v33 = vpop.f32.mrb[88].mxu0  ;;  %v2582_v13 = vpop.f32.mrb[88].mxu1 }
 0x1d3   : > { %v1692_v7 = vadd.f32 %v2582_v13, %v1147_v57  ;;  %v1220_v51 = vpop.f32.mrb[89].mxu0  ;;  %v1683_v28 = vpop.f32.mrb[89].mxu1  ;;  %v1179_v57 = vadd.f32 %v3444_v2, %v3492_v35  ;;  %v1174_v35 = vadd.f32 %v3444_v2, %v3472_v52  ;;  %v1187_v52 = vadd.f32 %v3444_v2, %v3518_v15 }
 0x1d4   : > { %v1684_v62 = vadd.f32 %v1683_v28, %v1139_v59  ;;  %v3605_v34 = vpop.f32.mrb[90].mxu0  ;;  %v2583_v25 = vpop.f32.mrb[90].mxu1 }
 0x1d5   : > { %v2124_v11 = vmax.f32 %v1692_v7, 0.0  ;;  %v1695_v63 = vadd.f32 %v2583_v25, %v1150_v1  ;;  %v1223_v55 = vpop.f32.mrb[91].mxu0  ;;  %v1686_v46 = vpop.f32.mrb[91].mxu1  ;;  %v1182_v1 = vadd.f32 %v3444_v2, %v3498_v49 }
 0x1d6   : > { %v2122_v61 = vmax.f32 %v1684_v62, 0.0  ;;  %v1687_v37 = vadd.f32 %v1686_v46, %v1142_v19 }
 0x1d7   : > { %2252 = vst [vmem:[%s3470_s22 + $0xd0] sm:$0xff] %v2124_v11  ;;  %v2125_v47 = vmax.f32 %v1695_v63, 0.0 }
 0x1d8   : > { %2250 = vst [vmem:[%s3470_s22 + $0xc0] sm:$0xff] %v2122_v61  ;;  %v2123_v18 = vmax.f32 %v1687_v37, 0.0 }
 0x1d9   : > { %2253 = vst [vmem:[%s3470_s22 + $0xd8] sm:$0xff] %v2125_v47  ;;  %v1195_v47 = vadd.f32 %v3444_v2, %v3544_v42  ;;  %v1190_v42 = vadd.f32 %v3444_v2, %v3524_v31  ;;  %v1203_v31 = vadd.f32 %v3444_v2, %v3566_v60 }
 0x1da   : > { %2251 = vst [vmem:[%s3470_s22 + $0xc8] sm:$0xff] %v2123_v18  ;;  %v3615_v9 = vpop.f32.mrb[92].mxu0  ;;  %v2586_v27 = vpop.f32.mrb[92].mxu1 }
 0x1db   : > { %v1708_v22 = vadd.f32 %v2586_v27, %v1163_v39  ;;  %v1228_v41 = vpop.f32.mrb[93].mxu0  ;;  %v1699_v0 = vpop.f32.mrb[93].mxu1 }
 0x1dc   : > { %v1700_v45 = vadd.f32 %v1699_v0, %v1155_v4  ;;  %v3621_v38 = vpop.f32.mrb[94].mxu0  ;;  %v2587_v17 = vpop.f32.mrb[94].mxu1  ;;  %v1198_v4 = vadd.f32 %v3444_v2, %v3550_v21 }
 0x1dd   : > { %v2128_v43 = vmax.f32 %v1708_v22, 0.0  ;;  %v1711_v26 = vadd.f32 %v2587_v17, %v1166_v24  ;;  %v1231_v40 = vpop.f32.mrb[95].mxu0  ;;  %v1702_v3 = vpop.f32.mrb[95].mxu1 }
 0x1de   : > { %v2126_v8 = vmax.f32 %v1700_v45, 0.0  ;;  %v1703_v53 = vadd.f32 %v1702_v3, %v1158_v20 }
 0x1df   : > { %2256 = vst [vmem:[%s3470_s22 + $0xf0] sm:$0xff] %v2128_v43  ;;  %v2129_v44 = vmax.f32 %v1711_v26, 0.0 }
 0x1e0   : > { %2254 = vst [vmem:[%s3470_s22 + $0xe0] sm:$0xff] %v2126_v8  ;;  %v2127_v5 = vmax.f32 %v1703_v53, 0.0  ;;  %v1211_v8 = vadd.f32 %v3444_v2, %v3583_v29  ;;  %v1206_v29 = vadd.f32 %v3444_v2, %v3572_v23  ;;  %v1219_v23 = vadd.f32 %v3444_v2, %v3599_v33 }
 0x1e1   : > { %2257 = vst [vmem:[%s3470_s22 + $0xf8] sm:$0xff] %v2129_v44 }
 0x1e2   : > { %2255 = vst [vmem:[%s3470_s22 + $0xe8] sm:$0xff] %v2127_v5  ;;  %v3631_v59 = vpop.f32.mrb[96].mxu0  ;;  %v2590_v13 = vpop.f32.mrb[96].mxu1  ;;  %v1214_v5 = vadd.f32 %v3444_v2, %v3589_v12 }
 0x1e3   : > { %v1724_v7 = vadd.f32 %v2590_v13, %v1179_v57  ;;  %v1236_v51 = vpop.f32.mrb[97].mxu0  ;;  %v1715_v28 = vpop.f32.mrb[97].mxu1 }
 0x1e4   : > { %v1716_v19 = vadd.f32 %v1715_v28, %v1171_v54  ;;  %v3637_v62 = vpop.f32.mrb[98].mxu0  ;;  %v2591_v48 = vpop.f32.mrb[98].mxu1 }
 0x1e5   : > { %v2132_v25 = vmax.f32 %v1724_v7, 0.0  ;;  %v1727_v11 = vadd.f32 %v2591_v48, %v1182_v1  ;;  %v1239_v63 = vpop.f32.mrb[99].mxu0  ;;  %v1718_v55 = vpop.f32.mrb[99].mxu1 }
 0x1e6   : > { %v2130_v46 = vmax.f32 %v1716_v19, 0.0  ;;  %v1719_v61 = vadd.f32 %v1718_v55, %v1174_v35  ;;  %v1227_v63 = vadd.f32 %v3444_v2, %v3615_v9 }
 0x1e7   : > { %2260 = vst [vmem:[%s3470_s22 + $0x110] sm:$0xff] %v2132_v25  ;;  %v2133_v49 = vmax.f32 %v1727_v11, 0.0 }
 0x1e8   : > { %2258 = vst [vmem:[%s3470_s22 + $0x100] sm:$0xff] %v2130_v46  ;;  %v2131_v37 = vmax.f32 %v1719_v61, 0.0  ;;  %v1230_v61 = vadd.f32 %v3444_v2, %v3621_v38 }
 0x1e9   : > { %2261 = vst [vmem:[%s3470_s22 + $0x118] sm:$0xff] %v2133_v49 }
 0x1ea   : > { %2259 = vst [vmem:[%s3470_s22 + $0x108] sm:$0xff] %v2131_v37  ;;  %v3647_v18 = vpop.f32.mrb[100].mxu0  ;;  %v2594_v39 = vpop.f32.mrb[100].mxu1 }
 0x1eb   : > { %v1740_v27 = vadd.f32 %v2594_v39, %v1195_v47  ;;  %v1244_v24 = vpop.f32.mrb[101].mxu0  ;;  %v1731_v22 = vpop.f32.mrb[101].mxu1 }
 0x1ec   : > { %v1732_v41 = vadd.f32 %v1731_v22, %v1187_v52  ;;  %v3653_v0 = vpop.f32.mrb[102].mxu0  ;;  %v2595_v15 = vpop.f32.mrb[102].mxu1  ;;  %v1222_v52 = vadd.f32 %v3444_v2, %v3605_v34  ;;  %v1235_v34 = vadd.f32 %v3444_v2, %v3631_v59 }
 0x1ed   : > { %v2136_v20 = vmax.f32 %v1740_v27, 0.0  ;;  %v1743_v45 = vadd.f32 %v2595_v15, %v1198_v4  ;;  %v1247_v17 = vpop.f32.mrb[103].mxu0  ;;  %v1734_v43 = vpop.f32.mrb[103].mxu1 }
 0x1ee   : > { %v2134_v26 = vmax.f32 %v1732_v41, 0.0  ;;  %v1735_v40 = vadd.f32 %v1734_v43, %v1190_v42  ;;  %v1246_v43 = vadd.f32 %v3444_v2, %v3653_v0 }
 0x1ef   : > { %2264 = vst [vmem:[%s3470_s22 + $0x130] sm:$0xff] %v2136_v20  ;;  %v2137_v21 = vmax.f32 %v1743_v45, 0.0  ;;  %v1243_v20 = vadd.f32 %v3444_v2, %v3647_v18 }
 0x1f0   : > { %2262 = vst [vmem:[%s3470_s22 + $0x120] sm:$0xff] %v2134_v26  ;;  %v2135_v3 = vmax.f32 %v1735_v40, 0.0 }
 0x1f1   : > { %2265 = vst [vmem:[%s3470_s22 + $0x138] sm:$0xff] %v2137_v21 }
 0x1f2   : > { %2263 = vst [vmem:[%s3470_s22 + $0x128] sm:$0xff] %v2135_v3  ;;  %v3663_v53 = vpop.f32.mrb[104].mxu0  ;;  %v2598_v44 = vpop.f32.mrb[104].mxu1  ;;  %v1238_v3 = vadd.f32 %v3444_v2, %v3637_v62 }
 0x1f3   : > { %v1756_v57 = vadd.f32 %v2598_v44, %v1211_v8  ;;  %v1252_v54 = vpop.f32.mrb[105].mxu0  ;;  %v1747_v13 = vpop.f32.mrb[105].mxu1  ;;  %v1251_v62 = vadd.f32 %v3444_v2, %v3663_v53 }
 0x1f4   : > { %v1748_v1 = vadd.f32 %v1747_v13, %v1203_v31  ;;  %v3669_v7 = vpop.f32.mrb[106].mxu0  ;;  %v2599_v60 = vpop.f32.mrb[106].mxu1 }
 0x1f5   : > { %v2140_v51 = vmax.f32 %v1756_v57, 0.0  ;;  %v1759_v28 = vadd.f32 %v2599_v60, %v1214_v5  ;;  %v1255_v35 = vpop.f32.mrb[107].mxu0  ;;  %v1750_v19 = vpop.f32.mrb[107].mxu1 }
 0x1f6   : > { %v2138_v48 = vmax.f32 %v1748_v1, 0.0  ;;  %v1751_v25 = vadd.f32 %v1750_v19, %v1206_v29 }
 0x1f7   : > { %2268 = vst [vmem:[%s3470_s22 + $0x150] sm:$0xff] %v2140_v51  ;;  %v2141_v12 = vmax.f32 %v1759_v28, 0.0 }
 0x1f8   : > { %2266 = vst [vmem:[%s3470_s22 + $0x140] sm:$0xff] %v2138_v48  ;;  %v2139_v11 = vmax.f32 %v1751_v25, 0.0  ;;  %v1254_v25 = vadd.f32 %v3444_v2, %v3669_v7 }
 0x1f9   : > { %2269 = vst [vmem:[%s3470_s22 + $0x158] sm:$0xff] %v2141_v12 }
 0x1fa   : > { %2267 = vst [vmem:[%s3470_s22 + $0x148] sm:$0xff] %v2139_v11  ;;  %v1258_v55 = vpop.f32.mrb[108].mxu0  ;;  %v2602_v46 = vpop.f32.mrb[108].mxu1 }
 0x1fb   : > { %v1772_v49 = vadd.f32 %v2602_v46, %v1227_v63  ;;  %v1260_v37 = vpop.f32.mrb[109].mxu0  ;;  %v1763_v47 = vpop.f32.mrb[109].mxu1  ;;  %v1259_v1 = vadd.f32 %v3444_v2, %v1258_v55 }
 0x1fc   : > { %v1764_v9 = vadd.f32 %v1763_v47, %v1219_v23  ;;  %v1261_v39 = vpop.f32.mrb[110].mxu0  ;;  %v2603_v4 = vpop.f32.mrb[110].mxu1 }
 0x1fd   : > { %v2144_v33 = vmax.f32 %v1772_v49, 0.0  ;;  %v1775_v27 = vadd.f32 %v2603_v4, %v1230_v61  ;;  %v1263_v24 = vpop.f32.mrb[111].mxu0  ;;  %v1766_v22 = vpop.f32.mrb[111].mxu1  ;;  %v1262_v28 = vadd.f32 %v3444_v2, %v1261_v39 }
 0x1fe   : > { %v2142_v42 = vmax.f32 %v1764_v9, 0.0  ;;  %v1767_v41 = vadd.f32 %v1766_v22, %v1222_v52 }
 0x1ff   : > { %2272 = vst [vmem:[%s3470_s22 + $0x170] sm:$0xff] %v2144_v33  ;;  %v2145_v38 = vmax.f32 %v1775_v27, 0.0 }
 0x200   : > { %2270 = vst [vmem:[%s3470_s22 + $0x160] sm:$0xff] %v2142_v42  ;;  %v2143_v15 = vmax.f32 %v1767_v41, 0.0 }
 0x201   : > { %2273 = vst [vmem:[%s3470_s22 + $0x178] sm:$0xff] %v2145_v38 }
 0x202   : > { %2271 = vst [vmem:[%s3470_s22 + $0x168] sm:$0xff] %v2143_v15  ;;  %v1266_v45 = vpop.f32.mrb[112].mxu0  ;;  %v2606_v17 = vpop.f32.mrb[112].mxu1 }
 0x203   : > { %v1788_v26 = vadd.f32 %v2606_v17, %v1243_v20  ;;  %v1268_v40 = vpop.f32.mrb[113].mxu0  ;;  %v1779_v21 = vpop.f32.mrb[113].mxu1  ;;  %v1267_v9 = vadd.f32 %v3444_v2, %v1266_v45 }
 0x204   : > { %v1780_v18 = vadd.f32 %v1779_v21, %v1235_v34  ;;  %v1269_v8 = vpop.f32.mrb[114].mxu0  ;;  %v2607_v31 = vpop.f32.mrb[114].mxu1 }
 0x205   : > { %v2148_v59 = vmax.f32 %v1788_v26, 0.0  ;;  %v1791_v44 = vadd.f32 %v2607_v31, %v1246_v43  ;;  %v1271_v5 = vpop.f32.mrb[115].mxu0  ;;  %v1782_v57 = vpop.f32.mrb[115].mxu1  ;;  %v1270_v22 = vadd.f32 %v3444_v2, %v1269_v8 }
 0x206   : > { %v2146_v54 = vmax.f32 %v1780_v18, 0.0  ;;  %v1783_v13 = vadd.f32 %v1782_v57, %v1238_v3 }
 0x207   : > { %2276 = vst [vmem:[%s3470_s22 + $0x190] sm:$0xff] %v2148_v59  ;;  %v2149_v0 = vmax.f32 %v1791_v44, 0.0 }
 0x208   : > { %2274 = vst [vmem:[%s3470_s22 + $0x180] sm:$0xff] %v2146_v54  ;;  %v2147_v29 = vmax.f32 %v1783_v13, 0.0 }
 0x209   : > { %2277 = vst [vmem:[%s3470_s22 + $0x198] sm:$0xff] %v2149_v0 }
 0x20a   : > { %2275 = vst [vmem:[%s3470_s22 + $0x188] sm:$0xff] %v2147_v29  ;;  %v1274_v60 = vpop.f32.mrb[116].mxu0  ;;  %v2610_v51 = vpop.f32.mrb[116].mxu1 }
 0x20b   : > { %v1804_v35 = vadd.f32 %v2610_v51, %v1259_v1  ;;  %v1276_v19 = vpop.f32.mrb[117].mxu0  ;;  %v1795_v48 = vpop.f32.mrb[117].mxu1  ;;  %v1275_v52 = vadd.f32 %v3444_v2, %v1274_v60 }
 0x20c   : > { %v1796_v12 = vadd.f32 %v1795_v48, %v1251_v62  ;;  %v1277_v11 = vpop.f32.mrb[118].mxu0  ;;  %v2611_v63 = vpop.f32.mrb[118].mxu1 }
 0x20d   : > { %v2152_v23 = vmax.f32 %v1804_v35, 0.0  ;;  %v1807_v53 = vadd.f32 %v2611_v63, %v1262_v28  ;;  %v1279_v55 = vpop.f32.mrb[119].mxu0  ;;  %v1798_v46 = vpop.f32.mrb[119].mxu1  ;;  %v1278_v4 = vadd.f32 %v3444_v2, %v1277_v11 }
 0x20e   : > { %v2150_v61 = vmax.f32 %v1796_v12, 0.0  ;;  %v1799_v49 = vadd.f32 %v1798_v46, %v1254_v25 }
 0x20f   : > { %2280 = vst [vmem:[%s3470_s22 + $0x1b0] sm:$0xff] %v2152_v23  ;;  %v2153_v37 = vmax.f32 %v1807_v53, 0.0 }
 0x210   : > { %2278 = vst [vmem:[%s3470_s22 + $0x1a0] sm:$0xff] %v2150_v61  ;;  %v2151_v47 = vmax.f32 %v1799_v49, 0.0 }
 0x211   : > { %2281 = vst [vmem:[%s3470_s22 + $0x1b8] sm:$0xff] %v2153_v37 }
 0x212   : > { %2279 = vst [vmem:[%s3470_s22 + $0x1a8] sm:$0xff] %v2151_v47  ;;  %v1282_v7 = vpop.f32.mrb[120].mxu0  ;;  %v2614_v39 = vpop.f32.mrb[120].mxu1 }
 0x213   : > { %v1820_v33 = vadd.f32 %v2614_v39, %v1275_v52  ;;  %v1284_v27 = vpop.f32.mrb[121].mxu0  ;;  %v1811_v24 = vpop.f32.mrb[121].mxu1  ;;  %v1283_v21 = vadd.f32 %v3444_v2, %v1282_v7 }
 0x214   : > { %v1812_v42 = vadd.f32 %v1811_v24, %v1267_v9  ;;  %v1285_v41 = vpop.f32.mrb[122].mxu0  ;;  %v2615_v38 = vpop.f32.mrb[122].mxu1 }
 0x215   : > { %v2156_v15 = vmax.f32 %v1820_v33, 0.0  ;;  %v1823_v20 = vadd.f32 %v2615_v38, %v1278_v4  ;;  %v1287_v34 = vpop.f32.mrb[123].mxu0  ;;  %v1814_v45 = vpop.f32.mrb[123].mxu1  ;;  %v1286_v44 = vadd.f32 %v3444_v2, %v1285_v41 }
 0x216   : > { %v2154_v17 = vmax.f32 %v1812_v42, 0.0  ;;  %v1815_v43 = vadd.f32 %v1814_v45, %v1270_v22 }
 0x217   : > { %2284 = vst [vmem:[%s3470_s22 + $0x1d0] sm:$0xff] %v2156_v15  ;;  %v2157_v26 = vmax.f32 %v1823_v20, 0.0 }
 0x218   : > { %2282 = vst [vmem:[%s3470_s22 + $0x1c0] sm:$0xff] %v2154_v17  ;;  %v2155_v40 = vmax.f32 %v1815_v43, 0.0 }
 0x219   : > { %2285 = vst [vmem:[%s3470_s22 + $0x1d8] sm:$0xff] %v2157_v26 }
 0x21a   : > { %2283 = vst [vmem:[%s3470_s22 + $0x1c8] sm:$0xff] %v2155_v40  ;;  %v1290_v3 = vpop.f32.mrb[124].mxu0  ;;  %v2618_v18 = vpop.f32.mrb[124].mxu1 }
 0x21b   : > { %v1291_v8 = vadd.f32 %v3444_v2, %v1290_v3  ;;  %v1292_v31 = vpop.f32.mrb[125].mxu0  ;;  %v1827_v59 = vpop.f32.mrb[125].mxu1 }
 0x21c   : > { %v1828_v5 = vadd.f32 %v1827_v59, %v1283_v21  ;;  %v1293_v57 = vpop.f32.mrb[126].mxu0  ;;  %v2619_v54 = vpop.f32.mrb[126].mxu1 }
 0x21d   : > { %v1836_v13 = vadd.f32 %v2618_v18, %v1291_v8  ;;  %v1294_v0 = vadd.f32 %v3444_v2, %v1293_v57  ;;  %v1295_v29 = vpop.f32.mrb[127].mxu0  ;;  %v1830_v1 = vpop.f32.mrb[127].mxu1 }
 0x21e   : > { %v2158_v62 = vmax.f32 %v1828_v5, 0.0  ;;  %v1831_v60 = vadd.f32 %v1830_v1, %v1286_v44 }
 0x21f   : > { %v2160_v51 = vmax.f32 %v1836_v13, 0.0  ;;  %v1839_v28 = vadd.f32 %v2619_v54, %v1294_v0  ;;  %v3742_v0 = vld [vmem:[%s3949_s2] ss:$0 sm:$0xff] }
 0x220   : > { %2286 = vst [vmem:[%s3470_s22 + $0x1e0] sm:$0xff] %v2158_v62  ;;  %v2159_v35 = vmax.f32 %v1831_v60, 0.0 }
 0x221   : > { %2288 = vst [vmem:[%s3470_s22 + $0x1f0] sm:$0xff] %v2160_v51  ;;  %v2161_v19 = vmax.f32 %v1839_v28, 0.0 }
 0x222   : > { %2287 = vst [vmem:[%s3470_s22 + $0x1e8] sm:$0xff] %v2159_v35  ;;  %v1298_v48 = vpop.f32.mrb[128].mxu0  ;;  %v2622_v25 = vpop.f32.mrb[128].mxu1 }
 0x223   : > { %2289 = vst [vmem:[%s3470_s22 + $0x1f8] sm:$0xff] %v2161_v19  ;;  %v1299_v12 = vadd.f32 %v3444_v2, %v1298_v48  ;;  %v1300_v11 = vpop.f32.mrb[129].mxu0  ;;  %v1843_v63 = vpop.f32.mrb[129].mxu1 }
 0x224   : > { %v1301_v23 = vpop.f32.mrb[130].mxu0  ;;  %v2623_v53 = vpop.f32.mrb[130].mxu1 }
 0x225   : > { %v1844_v55 = vadd.f32 %v1843_v63, %v1299_v12  ;;  %v1302_v46 = vadd.f32 %v3444_v2, %v1301_v23  ;;  %v1303_v61 = vpop.f32.mrb[131].mxu0  ;;  %v1846_v49 = vpop.f32.mrb[131].mxu1 }
 0x227   : > { %v2162_v37 = vmax.f32 %v1844_v55, 0.0  ;;  %v1847_v47 = vadd.f32 %v1846_v49, %v1302_v46 }
 0x229   : > { %2290 = vst [vmem:[%s3470_s22 + $0x200] sm:$0xff] %v2162_v37  ;;  %v2163_v52 = vmax.f32 %v1847_v47, 0.0 }
 0x22a   : > { %v1306_v9 = vpop.f32.mrb[132].mxu0  ;;  %v2626_v7 = vpop.f32.mrb[132].mxu1 }
 0x22b   : > { %2291 = vst [vmem:[%s3470_s22 + $0x208] sm:$0xff] %v2163_v52  ;;  %v1307_v39 = vadd.f32 %v3444_v2, %v1306_v9  ;;  %v1308_v4 = vpop.f32.mrb[133].mxu0  ;;  %v1859_v33 = vpop.f32.mrb[133].mxu1 }
 0x22c   : > { %v1309_v27 = vpop.f32.mrb[134].mxu0  ;;  %v2627_v24 = vpop.f32.mrb[134].mxu1 }
 0x22d   : > { %v1852_v22 = vadd.f32 %v2622_v25, %v1307_v39  ;;  %v1310_v42 = vadd.f32 %v3444_v2, %v1309_v27  ;;  %v1311_v41 = vpop.f32.mrb[135].mxu0  ;;  %v1862_v38 = vpop.f32.mrb[135].mxu1 }
 0x22f   : > { %v2164_v15 = vmax.f32 %v1852_v22, 0.0  ;;  %v1855_v20 = vadd.f32 %v2623_v53, %v1310_v42 }
 0x231   : > { %2292 = vst [vmem:[%s3470_s22 + $0x210] sm:$0xff] %v2164_v15  ;;  %v2165_v34 = vmax.f32 %v1855_v20, 0.0 }
 0x232   : > { %v1314_v45 = vpop.f32.mrb[136].mxu0  ;;  %v2630_v17 = vpop.f32.mrb[136].mxu1 }
 0x233   : > { %2293 = vst [vmem:[%s3470_s22 + $0x218] sm:$0xff] %v2165_v34  ;;  %v1315_v43 = vadd.f32 %v3444_v2, %v1314_v45  ;;  %v1316_v26 = vpop.f32.mrb[137].mxu0  ;;  %v1875_v40 = vpop.f32.mrb[137].mxu1 }
 0x234   : > { %v1317_v21 = vpop.f32.mrb[138].mxu0  ;;  %v2631_v3 = vpop.f32.mrb[138].mxu1 }
 0x235   : > { %v1860_v18 = vadd.f32 %v1859_v33, %v1315_v43  ;;  %v1318_v8 = vadd.f32 %v3444_v2, %v1317_v21  ;;  %v1319_v31 = vpop.f32.mrb[139].mxu0  ;;  %v1878_v59 = vpop.f32.mrb[139].mxu1 }
 0x237   : > { %v2166_v44 = vmax.f32 %v1860_v18, 0.0  ;;  %v1863_v5 = vadd.f32 %v1862_v38, %v1318_v8 }
 0x239   : > { %2294 = vst [vmem:[%s3470_s22 + $0x220] sm:$0xff] %v2166_v44  ;;  %v2167_v57 = vmax.f32 %v1863_v5, 0.0 }
 0x23a   : > { %v1322_v54 = vpop.f32.mrb[140].mxu0  ;;  %v3736_v13 = vpop.f32.mrb[140].mxu1 }
 0x23b   : > { %2295 = vst [vmem:[%s3470_s22 + $0x228] sm:$0xff] %v2167_v57  ;;  %v1323_v29 = vadd.f32 %v3742_v0, %v1322_v54  ;;  %v1324_v2 = vpop.f32.mrb[141].mxu0  ;;  %v1891_v1 = vpop.f32.mrb[141].mxu1 }
 0x23c   : > { %v1325_v62 = vpop.f32.mrb[142].mxu0  ;;  %v3745_v60 = vpop.f32.mrb[142].mxu1 }
 0x23d   : > { %v1868_v51 = vadd.f32 %v2626_v7, %v1323_v29  ;;  %v1326_v28 = vadd.f32 %v3742_v0, %v1325_v62  ;;  %v1327_v35 = vpop.f32.mrb[143].mxu0  ;;  %v1894_v19 = vpop.f32.mrb[143].mxu1 }
 0x23f   : > { %v2168_v48 = vmax.f32 %v1868_v51, 0.0  ;;  %v1871_v25 = vadd.f32 %v2627_v24, %v1326_v28 }
 0x241   : > { %2296 = vst [vmem:[%s3470_s22 + $0x230] sm:$0xff] %v2168_v48  ;;  %v2169_v12 = vmax.f32 %v1871_v25, 0.0 }
 0x242   : > { %v1330_v11 = vpop.f32.mrb[144].mxu0  ;;  %v3749_v63 = vpop.f32.mrb[144].mxu1 }
 0x243   : > { %2297 = vst [vmem:[%s3470_s22 + $0x238] sm:$0xff] %v2169_v12  ;;  %v1331_v23 = vadd.f32 %v3742_v0, %v1330_v11  ;;  %v1332_v53 = vpop.f32.mrb[145].mxu0  ;;  %v3753_v55 = vpop.f32.mrb[145].mxu1 }
 0x244   : > { %v1333_v46 = vpop.f32.mrb[146].mxu0  ;;  %v3755_v61 = vpop.f32.mrb[146].mxu1 }
 0x245   : > { %v1876_v49 = vadd.f32 %v1875_v40, %v1331_v23  ;;  %v1334_v37 = vadd.f32 %v3742_v0, %v1333_v46  ;;  %v1335_v47 = vpop.f32.mrb[147].mxu0  ;;  %v3758_v52 = vpop.f32.mrb[147].mxu1 }
 0x246   : > { %v1427_v47 = vadd.f32 %v3742_v0, %v3165_v10 }
 0x247   : > { %v2170_v9 = vmax.f32 %v1876_v49, 0.0  ;;  %v1879_v7 = vadd.f32 %v1878_v59, %v1334_v37  ;;  %v1435_v49 = vadd.f32 %v3742_v0, %v3183_v30  ;;  %v1430_v30 = vadd.f32 %v3742_v0, %v3169_v16 }
 0x249   : > { %2298 = vst [vmem:[%s3470_s22 + $0x240] sm:$0xff] %v2170_v9  ;;  %v2171_v39 = vmax.f32 %v1879_v7, 0.0 }
 0x24a   : > { %v1338_v4 = vpop.f32.mrb[148].mxu0  ;;  %v3761_v33 = vpop.f32.mrb[148].mxu1 }
 0x24b   : > { %2299 = vst [vmem:[%s3470_s22 + $0x248] sm:$0xff] %v2171_v39  ;;  %v1339_v27 = vadd.f32 %v3742_v0, %v1338_v4  ;;  %v1340_v24 = vpop.f32.mrb[149].mxu0  ;;  %v3765_v22 = vpop.f32.mrb[149].mxu1 }
 0x24c   : > { %v1341_v42 = vpop.f32.mrb[150].mxu0  ;;  %v3767_v41 = vpop.f32.mrb[150].mxu1 }
 0x24d   : > { %v1884_v38 = vadd.f32 %v2630_v17, %v1339_v27  ;;  %v1342_v15 = vadd.f32 %v3742_v0, %v1341_v42  ;;  %v1343_v20 = vpop.f32.mrb[151].mxu0  ;;  %v3770_v34 = vpop.f32.mrb[151].mxu1 }
 0x24f   : > { %v2172_v45 = vmax.f32 %v1884_v38, 0.0  ;;  %v1887_v43 = vadd.f32 %v2631_v3, %v1342_v15 }
 0x251   : > { %2300 = vst [vmem:[%s3470_s22 + $0x250] sm:$0xff] %v2172_v45  ;;  %v2173_v26 = vmax.f32 %v1887_v43, 0.0 }
 0x252   : > { %v1346_v40 = vpop.f32.mrb[152].mxu0  ;;  %v3773_v21 = vpop.f32.mrb[152].mxu1 }
 0x253   : > { %2301 = vst [vmem:[%s3470_s22 + $0x258] sm:$0xff] %v2173_v26  ;;  %v1347_v18 = vadd.f32 %v3742_v0, %v1346_v40  ;;  %v1348_v8 = vpop.f32.mrb[153].mxu0  ;;  %v3777_v31 = vpop.f32.mrb[153].mxu1 }
 0x254   : > { %v1349_v17 = vpop.f32.mrb[154].mxu0  ;;  %v3779_v59 = vpop.f32.mrb[154].mxu1 }
 0x255   : > { %v1892_v44 = vadd.f32 %v1891_v1, %v1347_v18  ;;  %v1350_v5 = vadd.f32 %v3742_v0, %v1349_v17  ;;  %v1351_v3 = vpop.f32.mrb[155].mxu0  ;;  %v3782_v57 = vpop.f32.mrb[155].mxu1 }
 0x257   : > { %v2174_v54 = vmax.f32 %v1892_v44, 0.0  ;;  %v1895_v29 = vadd.f32 %v1894_v19, %v1350_v5  ;;  %v1443_v5 = vadd.f32 %v3742_v0, %v3201_v50 }
 0x259   : > { %2302 = vst [vmem:[%s3470_s22 + $0x260] sm:$0xff] %v2174_v54  ;;  %v2175_v2 = vmax.f32 %v1895_v29, 0.0  ;;  %v1454_v29 = vadd.f32 %v3742_v0, %v3223_v14 }
 0x25a   : > { %v1354_v62 = vpop.f32.mrb[156].mxu0  ;;  %v3785_v51 = vpop.f32.mrb[156].mxu1 }
 0x25b   : > { %2303 = vst [vmem:[%s3470_s22 + $0x268] sm:$0xff] %v2175_v2  ;;  %v1355_v28 = vadd.f32 %v3742_v0, %v1354_v62  ;;  %v1356_v35 = vpop.f32.mrb[157].mxu0  ;;  %v3789_v48 = vpop.f32.mrb[157].mxu1 }
 0x25c   : > { %v1357_v1 = vpop.f32.mrb[158].mxu0  ;;  %v3791_v25 = vpop.f32.mrb[158].mxu1 }
 0x25d   : > { %v1900_v12 = vadd.f32 %v3736_v13, %v1355_v28  ;;  %v1358_v19 = vadd.f32 %v3742_v0, %v1357_v1  ;;  %v1359_v11 = vpop.f32.mrb[159].mxu0  ;;  %v3795_v23 = vpop.f32.mrb[159].mxu1  ;;  %v1438_v13 = vadd.f32 %v3742_v0, %v3187_v36 }
 0x25f   : > { %v2176_v53 = vmax.f32 %v1900_v12, 0.0  ;;  %v1903_v46 = vadd.f32 %v3745_v60, %v1358_v19 }
 0x261   : > { %2304 = vst [vmem:[%s3470_s22 + $0x270] sm:$0xff] %v2176_v53  ;;  %v2177_v37 = vmax.f32 %v1903_v46, 0.0 }
 0x262   : > { %v1362_v9 = vpop.f32.mrb[160].mxu0  ;;  %v2654_v7 = vpop.f32.mrb[160].mxu1 }
 0x263   : > { %2305 = vst [vmem:[%s3470_s22 + $0x278] sm:$0xff] %v2177_v37  ;;  %v1363_v39 = vadd.f32 %v3742_v0, %v1362_v9  ;;  %v1980_v4 = vadd.f32 %v2654_v7, %v1435_v49  ;;  %v1364_v27 = vpop.f32.mrb[161].mxu0  ;;  %v1971_v60 = vpop.f32.mrb[161].mxu1 }
 0x264   : > { %v1972_v24 = vadd.f32 %v1971_v60, %v1427_v47  ;;  %v1365_v42 = vpop.f32.mrb[162].mxu0  ;;  %v2655_v38 = vpop.f32.mrb[162].mxu1  ;;  %v3973_v60 = vld [vmem:[#allocation3_spill] sm:$0xff] }
 0x265   : > { %v1908_v10 = vadd.f32 %v3753_v55, %v1363_v39  ;;  %v2196_v15 = vmax.f32 %v1980_v4, 0.0  ;;  %v1366_v36 = vadd.f32 %v3742_v0, %v1365_v42  ;;  %v1983_v20 = vadd.f32 %v2655_v38, %v1438_v13  ;;  %v1367_v45 = vpop.f32.mrb[163].mxu0  ;;  %v1974_v43 = vpop.f32.mrb[163].mxu1 }
 0x266   : > { %v2194_v26 = vmax.f32 %v1972_v24, 0.0  ;;  %v1975_v40 = vadd.f32 %v1974_v43, %v1430_v30  ;;  %v1451_v55 = vadd.f32 %v3742_v0, %v3219_v6  ;;  %v1446_v6 = vadd.f32 %v3742_v0, %v3205_v56 }
 0x267   : > { %v2178_v18 = vmax.f32 %v1908_v10, 0.0  ;;  %2324 = vst [vmem:[%s3470_s22 + $0x310] sm:$0xff] %v2196_v15  ;;  %v1911_v16 = vadd.f32 %v3758_v52, %v1366_v36  ;;  %v2197_v8 = vmax.f32 %v1983_v20, 0.0  ;;  %v1459_v39 = vadd.f32 %v3742_v0, %v3237_v32 }
 0x268   : > { %2322 = vst [vmem:[%s3470_s22 + $0x300] sm:$0xff] %v2194_v26  ;;  %v2195_v17 = vmax.f32 %v1975_v40, 0.0  ;;  %v1470_v30 = vadd.f32 %v3742_v0, %v3973_v60  ;;  %v3979_v60 = vld [vmem:[#allocation10_spill] sm:$0xff] }
 0x269   : > { %2306 = vst [vmem:[%s3470_s22 + $0x280] sm:$0xff] %v2178_v18  ;;  %v2179_v44 = vmax.f32 %v1911_v16, 0.0  ;;  %2325 = vst [vmem:[%s3470_s22 + $0x318] sm:$0xff] %v2197_v8 }
 0x26a   : > { %2323 = vst [vmem:[%s3470_s22 + $0x308] sm:$0xff] %v2195_v17  ;;  %v1370_v3 = vpop.f32.mrb[164].mxu0  ;;  %v2658_v54 = vpop.f32.mrb[164].mxu1 }
 0x26b   : > { %2307 = vst [vmem:[%s3470_s22 + $0x288] sm:$0xff] %v2179_v44  ;;  %v1371_v52 = vadd.f32 %v3742_v0, %v1370_v3  ;;  %v1996_v2 = vadd.f32 %v2658_v54, %v1451_v55  ;;  %v1372_v62 = vpop.f32.mrb[165].mxu0  ;;  %v1987_v28 = vpop.f32.mrb[165].mxu1  ;;  %v3975_v3 = vld [vmem:[#allocation6_spill] sm:$0xff] }
 0x26c   : > { %v1988_v35 = vadd.f32 %v1987_v28, %v1443_v5  ;;  %v1373_v1 = vpop.f32.mrb[166].mxu0  ;;  %v2659_v50 = vpop.f32.mrb[166].mxu1  ;;  %v3977_v28 = vld [vmem:[#allocation7_spill] sm:$0xff] }
 0x26d   : > { %v1916_v12 = vadd.f32 %v3749_v63, %v1371_v52  ;;  %v2200_v19 = vmax.f32 %v1996_v2, 0.0  ;;  %v1374_v14 = vadd.f32 %v3742_v0, %v1373_v1  ;;  %v1999_v11 = vadd.f32 %v2659_v50, %v1454_v29  ;;  %v1375_v53 = vpop.f32.mrb[167].mxu0  ;;  %v1990_v46 = vpop.f32.mrb[167].mxu1  ;;  %v3976_v29 = vld [vmem:[#allocation4_spill] sm:$0xff] }
 0x26e   : > { %v2198_v49 = vmax.f32 %v1988_v35, 0.0  ;;  %v1991_v37 = vadd.f32 %v1990_v46, %v1446_v6  ;;  %v1467_v63 = vadd.f32 %v3742_v0, %v3255_v58  ;;  %v3974_v58 = vld [vmem:[#allocation2_spill] sm:$0xff]  ;;  %v1475_v52 = vadd.f32 %v3742_v0, %v3976_v29 }
 0x26f   : > { %v2180_v47 = vmax.f32 %v1916_v12, 0.0  ;;  %2328 = vst [vmem:[%s3470_s22 + $0x330] sm:$0xff] %v2200_v19  ;;  %v1919_v56 = vadd.f32 %v3755_v61, %v1374_v14  ;;  %v2201_v9 = vmax.f32 %v1999_v11, 0.0  ;;  %v1462_v10 = vadd.f32 %v3742_v0, %v3974_v58  ;;  %v3978_v12 = vld [vmem:[#allocation5_spill] sm:$0xff]  ;;  %v3981_v58 = vld [vmem:[#allocation11_spill] sm:$0xff] }
 0x270   : > { %2326 = vst [vmem:[%s3470_s22 + $0x320] sm:$0xff] %v2198_v49  ;;  %v2199_v7 = vmax.f32 %v1991_v37, 0.0  ;;  %v1486_v6 = vadd.f32 %v3742_v0, %v3977_v28  ;;  %v1478_v19 = vadd.f32 %v3742_v0, %v3978_v12  ;;  %v3984_v28 = vld [vmem:[#allocation12_spill] sm:$0xff] }
 0x271   : > { %2308 = vst [vmem:[%s3470_s22 + $0x290] sm:$0xff] %v2180_v47  ;;  %v2181_v13 = vmax.f32 %v1919_v56, 0.0  ;;  %2329 = vst [vmem:[%s3470_s22 + $0x338] sm:$0xff] %v2201_v9 }
 0x272   : > { %2327 = vst [vmem:[%s3470_s22 + $0x328] sm:$0xff] %v2199_v7  ;;  %v1378_v4 = vpop.f32.mrb[168].mxu0  ;;  %v2662_v27 = vpop.f32.mrb[168].mxu1 }
 0x273   : > { %2309 = vst [vmem:[%s3470_s22 + $0x298] sm:$0xff] %v2181_v13  ;;  %v1379_v61 = vadd.f32 %v3742_v0, %v1378_v4  ;;  %v2012_v24 = vadd.f32 %v2662_v27, %v1467_v63  ;;  %v1380_v42 = vpop.f32.mrb[169].mxu0  ;;  %v2003_v38 = vpop.f32.mrb[169].mxu1 }
 0x274   : > { %v2004_v15 = vadd.f32 %v2003_v38, %v1459_v39  ;;  %v1381_v36 = vpop.f32.mrb[170].mxu0  ;;  %v2663_v32 = vpop.f32.mrb[170].mxu1 }
 0x275   : > { %v1924_v20 = vadd.f32 %v3765_v22, %v1379_v61  ;;  %v2204_v45 = vmax.f32 %v2012_v24, 0.0  ;;  %v1382_v43 = vadd.f32 %v3742_v0, %v1381_v36  ;;  %v2015_v26 = vadd.f32 %v2663_v32, %v1470_v30  ;;  %v1383_v40 = vpop.f32.mrb[171].mxu0  ;;  %v2006_v18 = vpop.f32.mrb[171].mxu1  ;;  %v3980_v61 = vld [vmem:[#allocation8_spill] sm:$0xff] }
 0x276   : > { %v2202_v16 = vmax.f32 %v2004_v15, 0.0  ;;  %v2007_v8 = vadd.f32 %v2006_v18, %v1462_v10  ;;  %v1483_v22 = vadd.f32 %v3742_v0, %v3975_v3  ;;  %v1491_v24 = vadd.f32 %v3742_v0, %v3980_v61  ;;  %v3987_v61 = vld [vmem:[#allocation18_spill] sm:$0xff] }
 0x277   : > { %v2182_v17 = vmax.f32 %v1924_v20, 0.0  ;;  %2332 = vst [vmem:[%s3470_s22 + $0x350] sm:$0xff] %v2204_v45  ;;  %v1927_v55 = vadd.f32 %v3770_v34, %v1382_v43  ;;  %v2205_v44 = vmax.f32 %v2015_v26, 0.0  ;;  %v1502_v10 = vadd.f32 %v3742_v0, %v3981_v58  ;;  %v3982_v20 = vld [vmem:[#allocation9_spill] sm:$0xff] }
 0x278   : > { %2330 = vst [vmem:[%s3470_s22 + $0x340] sm:$0xff] %v2202_v16  ;;  %v2203_v5 = vmax.f32 %v2007_v8, 0.0  ;;  %v1494_v45 = vadd.f32 %v3742_v0, %v3982_v20 }
 0x279   : > { %2310 = vst [vmem:[%s3470_s22 + $0x2a0] sm:$0xff] %v2182_v17  ;;  %v2183_v54 = vmax.f32 %v1927_v55, 0.0  ;;  %2333 = vst [vmem:[%s3470_s22 + $0x358] sm:$0xff] %v2205_v44 }
 0x27a   : > { %2331 = vst [vmem:[%s3470_s22 + $0x348] sm:$0xff] %v2203_v5  ;;  %v1386_v2 = vpop.f32.mrb[172].mxu0  ;;  %v2666_v62 = vpop.f32.mrb[172].mxu1 }
 0x27b   : > { %2311 = vst [vmem:[%s3470_s22 + $0x2a8] sm:$0xff] %v2183_v54  ;;  %v1387_v34 = vadd.f32 %v3742_v0, %v1386_v2  ;;  %v2028_v35 = vadd.f32 %v2666_v62, %v1483_v22  ;;  %v1388_v1 = vpop.f32.mrb[173].mxu0  ;;  %v2019_v50 = vpop.f32.mrb[173].mxu1  ;;  %v3983_v2 = vld [vmem:[#allocation14_spill] sm:$0xff] }
 0x27c   : > { %v2020_v14 = vadd.f32 %v2019_v50, %v1475_v52  ;;  %v1389_v11 = vpop.f32.mrb[174].mxu0  ;;  %v2667_v53 = vpop.f32.mrb[174].mxu1  ;;  %v3985_v1 = vld [vmem:[#allocation15_spill] sm:$0xff] }
 0x27d   : > { %v1932_v46 = vadd.f32 %v3761_v33, %v1387_v34  ;;  %v2208_v49 = vmax.f32 %v2028_v35, 0.0  ;;  %v1390_v37 = vadd.f32 %v3742_v0, %v1389_v11  ;;  %v2031_v47 = vadd.f32 %v2667_v53, %v1486_v6  ;;  %v1391_v56 = vpop.f32.mrb[175].mxu0  ;;  %v2022_v9 = vpop.f32.mrb[175].mxu1  ;;  %v3986_v11 = vld [vmem:[#allocation13_spill] sm:$0xff] }
 0x27e   : > { %v2206_v7 = vmax.f32 %v2020_v14, 0.0  ;;  %v2023_v63 = vadd.f32 %v2022_v9, %v1478_v19  ;;  %v1499_v33 = vadd.f32 %v3742_v0, %v3979_v60  ;;  %v1507_v6 = vadd.f32 %v3742_v0, %v3984_v28  ;;  %v3992_v28 = vld [vmem:[#allocation20_spill] sm:$0xff] }
 0x27f   : > { %v2184_v13 = vmax.f32 %v1932_v46, 0.0  ;;  %2336 = vst [vmem:[%s3470_s22 + $0x370] sm:$0xff] %v2208_v49  ;;  %v1935_v39 = vadd.f32 %v3767_v41, %v1390_v37  ;;  %v2209_v4 = vmax.f32 %v2031_v47, 0.0  ;;  %v1518_v50 = vadd.f32 %v3742_v0, %v3985_v1  ;;  %v3993_v1 = vld [vmem:[#allocation23_spill] sm:$0xff] }
 0x280   : > { %2334 = vst [vmem:[%s3470_s22 + $0x360] sm:$0xff] %v2206_v7  ;;  %v2207_v27 = vmax.f32 %v2023_v63, 0.0  ;;  %v1510_v53 = vadd.f32 %v3742_v0, %v3986_v11 }
 0x281   : > { %2312 = vst [vmem:[%s3470_s22 + $0x2b0] sm:$0xff] %v2184_v13  ;;  %v2185_v30 = vmax.f32 %v1935_v39, 0.0  ;;  %2337 = vst [vmem:[%s3470_s22 + $0x378] sm:$0xff] %v2209_v4 }
 0x282   : > { %2335 = vst [vmem:[%s3470_s22 + $0x368] sm:$0xff] %v2207_v27  ;;  %v1394_v42 = vpop.f32.mrb[176].mxu0  ;;  %v2670_v38 = vpop.f32.mrb[176].mxu1 }
 0x283   : > { %2313 = vst [vmem:[%s3470_s22 + $0x2b8] sm:$0xff] %v2185_v30  ;;  %v1395_v41 = vadd.f32 %v3742_v0, %v1394_v42  ;;  %v2044_v15 = vadd.f32 %v2670_v38, %v1499_v33  ;;  %v1396_v36 = vpop.f32.mrb[177].mxu0  ;;  %v2035_v32 = vpop.f32.mrb[177].mxu1  ;;  %v3988_v42 = vld [vmem:[#allocation16_spill] sm:$0xff] }
 0x284   : > { %v2036_v43 = vadd.f32 %v2035_v32, %v1491_v24  ;;  %v1397_v26 = vpop.f32.mrb[178].mxu0  ;;  %v2671_v40 = vpop.f32.mrb[178].mxu1  ;;  %v1523_v38 = vadd.f32 %v3742_v0, %v3988_v42 }
 0x285   : > { %v1940_v18 = vadd.f32 %v3777_v31, %v1395_v41  ;;  %v2212_v16 = vmax.f32 %v2044_v15, 0.0  ;;  %v1398_v8 = vadd.f32 %v3742_v0, %v1397_v26  ;;  %v2047_v17 = vadd.f32 %v2671_v40, %v1502_v10  ;;  %v1399_v55 = vpop.f32.mrb[179].mxu0  ;;  %v2038_v44 = vpop.f32.mrb[179].mxu1  ;;  %v3989_v41 = vld [vmem:[#allocation19_spill] sm:$0xff] }
 0x286   : > { %v2210_v5 = vmax.f32 %v2036_v43, 0.0  ;;  %v2039_v3 = vadd.f32 %v2038_v44, %v1494_v45  ;;  %v1515_v31 = vadd.f32 %v3742_v0, %v3983_v2  ;;  %v1534_v15 = vadd.f32 %v3742_v0, %v3989_v41  ;;  %v3990_v45 = vld [vmem:[#allocation17_spill] sm:$0xff] }
 0x287   : > { %v2186_v22 = vmax.f32 %v1940_v18, 0.0  ;;  %2340 = vst [vmem:[%s3470_s22 + $0x390] sm:$0xff] %v2212_v16  ;;  %v1943_v54 = vadd.f32 %v3782_v57, %v1398_v8  ;;  %v2213_v29 = vmax.f32 %v2047_v17, 0.0  ;;  %v1526_v43 = vadd.f32 %v3742_v0, %v3990_v45 }
 0x288   : > { %2338 = vst [vmem:[%s3470_s22 + $0x380] sm:$0xff] %v2210_v5  ;;  %v2211_v52 = vmax.f32 %v2039_v3, 0.0 }
 0x289   : > { %2314 = vst [vmem:[%s3470_s22 + $0x2c0] sm:$0xff] %v2186_v22  ;;  %v2187_v62 = vmax.f32 %v1943_v54, 0.0  ;;  %2341 = vst [vmem:[%s3470_s22 + $0x398] sm:$0xff] %v2213_v29 }
 0x28a   : > { %2339 = vst [vmem:[%s3470_s22 + $0x388] sm:$0xff] %v2211_v52  ;;  %v1402_v34 = vpop.f32.mrb[180].mxu0  ;;  %v2674_v35 = vpop.f32.mrb[180].mxu1 }
 0x28b   : > { %2315 = vst [vmem:[%s3470_s22 + $0x2c8] sm:$0xff] %v2187_v62  ;;  %v1403_v57 = vadd.f32 %v3742_v0, %v1402_v34  ;;  %v2060_v12 = vadd.f32 %v2674_v35, %v1515_v31  ;;  %v1404_v19 = vpop.f32.mrb[181].mxu0  ;;  %v2051_v14 = vpop.f32.mrb[181].mxu1  ;;  %v3991_v31 = vld [vmem:[#allocation22_spill] sm:$0xff] }
 0x28c   : > { %v2052_v46 = vadd.f32 %v2051_v14, %v1507_v6  ;;  %v1405_v49 = vpop.f32.mrb[182].mxu0  ;;  %v2675_v37 = vpop.f32.mrb[182].mxu1  ;;  %v1539_v6 = vadd.f32 %v3742_v0, %v3992_v28  ;;  %v3994_v14 = vld [vmem:[#allocation21_spill] sm:$0xff] }
 0x28d   : > { %v1948_v47 = vadd.f32 %v3773_v21, %v1403_v57  ;;  %v2216_v56 = vmax.f32 %v2060_v12, 0.0  ;;  %v1406_v9 = vadd.f32 %v3742_v0, %v1405_v49  ;;  %v2063_v7 = vadd.f32 %v2675_v37, %v1518_v50  ;;  %v1407_v63 = vpop.f32.mrb[183].mxu0  ;;  %v2054_v13 = vpop.f32.mrb[183].mxu1 }
 0x28e   : > { %v2214_v39 = vmax.f32 %v2052_v46, 0.0  ;;  %v2055_v4 = vadd.f32 %v2054_v13, %v1510_v53  ;;  %v1531_v21 = vadd.f32 %v3742_v0, %v3987_v61  ;;  %v1550_v50 = vadd.f32 %v3742_v0, %v3993_v1 }
 0x28f   : > { %v2188_v27 = vmax.f32 %v1948_v47, 0.0  ;;  %2344 = vst [vmem:[%s3470_s22 + $0x3b0] sm:$0xff] %v2216_v56  ;;  %v1951_v60 = vadd.f32 %v3779_v59, %v1406_v9  ;;  %v2217_v33 = vmax.f32 %v2063_v7, 0.0  ;;  %v1542_v11 = vadd.f32 %v3742_v0, %v3994_v14 }
 0x290   : > { %2342 = vst [vmem:[%s3470_s22 + $0x3a0] sm:$0xff] %v2214_v39  ;;  %v2215_v30 = vmax.f32 %v2055_v4, 0.0 }
 0x291   : > { %2316 = vst [vmem:[%s3470_s22 + $0x2d0] sm:$0xff] %v2188_v27  ;;  %v2189_v24 = vmax.f32 %v1951_v60, 0.0  ;;  %2345 = vst [vmem:[%s3470_s22 + $0x3b8] sm:$0xff] %v2217_v33 }
 0x292   : > { %2343 = vst [vmem:[%s3470_s22 + $0x3a8] sm:$0xff] %v2215_v30  ;;  %v1410_v58 = vpop.f32.mrb[184].mxu0  ;;  %v2678_v10 = vpop.f32.mrb[184].mxu1 }
 0x293   : > { %2317 = vst [vmem:[%s3470_s22 + $0x2d8] sm:$0xff] %v2189_v24  ;;  %v1411_v59 = vadd.f32 %v3742_v0, %v1410_v58  ;;  %v2076_v36 = vadd.f32 %v2678_v10, %v1531_v21  ;;  %v1412_v32 = vpop.f32.mrb[185].mxu0  ;;  %v2067_v20 = vpop.f32.mrb[185].mxu1 }
 0x294   : > { %v2068_v26 = vadd.f32 %v2067_v20, %v1523_v38  ;;  %v1413_v40 = vpop.f32.mrb[186].mxu0  ;;  %v2679_v18 = vpop.f32.mrb[186].mxu1 }
 0x295   : > { %v1956_v16 = vadd.f32 %v3789_v48, %v1411_v59  ;;  %v2220_v8 = vmax.f32 %v2076_v36, 0.0  ;;  %v1414_v17 = vadd.f32 %v3742_v0, %v1413_v40  ;;  %v2079_v55 = vadd.f32 %v2679_v18, %v1534_v15  ;;  %v1415_v44 = vpop.f32.mrb[187].mxu0  ;;  %v2070_v5 = vpop.f32.mrb[187].mxu1 }
 0x296   : > { %v2218_v3 = vmax.f32 %v2068_v26, 0.0  ;;  %v2071_v22 = vadd.f32 %v2070_v5, %v1526_v43  ;;  %v1547_v48 = vadd.f32 %v3742_v0, %v3991_v31 }
 0x297   : > { %v2190_v54 = vmax.f32 %v1956_v16, 0.0  ;;  %2348 = vst [vmem:[%s3470_s22 + $0x3d0] sm:$0xff] %v2220_v8  ;;  %v1959_v29 = vadd.f32 %v3795_v23, %v1414_v17  ;;  %v2221_v52 = vmax.f32 %v2079_v55, 0.0 }
 0x298   : > { %2346 = vst [vmem:[%s3470_s22 + $0x3c0] sm:$0xff] %v2218_v3  ;;  %v2219_v2 = vmax.f32 %v2071_v22, 0.0 }
 0x299   : > { %2318 = vst [vmem:[%s3470_s22 + $0x2e0] sm:$0xff] %v2190_v54  ;;  %v2191_v62 = vmax.f32 %v1959_v29, 0.0  ;;  %2349 = vst [vmem:[%s3470_s22 + $0x3d8] sm:$0xff] %v2221_v52 }
 0x29a   : > { %2347 = vst [vmem:[%s3470_s22 + $0x3c8] sm:$0xff] %v2219_v2  ;;  %v1418_v34 = vpop.f32.mrb[188].mxu0  ;;  %v2682_v35 = vpop.f32.mrb[188].mxu1 }
 0x29b   : > { %2319 = vst [vmem:[%s3470_s22 + $0x2e8] sm:$0xff] %v2191_v62  ;;  %v1419_v23 = vadd.f32 %v3742_v0, %v1418_v34  ;;  %v2092_v57 = vadd.f32 %v2682_v35, %v1547_v48  ;;  %v1420_v12 = vpop.f32.mrb[189].mxu0  ;;  %v2083_v19 = vpop.f32.mrb[189].mxu1 }
 0x29c   : > { %v2084_v53 = vadd.f32 %v2083_v19, %v1539_v6  ;;  %v1421_v46 = vpop.f32.mrb[190].mxu0  ;;  %v2683_v49 = vpop.f32.mrb[190].mxu1 }
 0x29d   : > { %v1964_v37 = vadd.f32 %v3785_v51, %v1419_v23  ;;  %v2224_v47 = vmax.f32 %v2092_v57, 0.0  ;;  %v1422_v56 = vadd.f32 %v3742_v0, %v1421_v46  ;;  %v2095_v9 = vadd.f32 %v2683_v49, %v1550_v50  ;;  %v1423_v7 = vpop.f32.mrb[191].mxu0  ;;  %v2086_v63 = vpop.f32.mrb[191].mxu1 }
 0x29e   : > { %v2222_v13 = vmax.f32 %v2084_v53, 0.0  ;;  %v2087_v39 = vadd.f32 %v2086_v63, %v1542_v11 }
 0x29f   : > { %v2192_v4 = vmax.f32 %v1964_v37, 0.0  ;;  %2352 = vst [vmem:[%s3470_s22 + $0x3f0] sm:$0xff] %v2224_v47  ;;  %v1967_v27 = vadd.f32 %v3791_v25, %v1422_v56  ;;  %v2225_v60 = vmax.f32 %v2095_v9, 0.0 }
 0x2a0   : > { %2350 = vst [vmem:[%s3470_s22 + $0x3e0] sm:$0xff] %v2222_v13  ;;  %v2223_v33 = vmax.f32 %v2087_v39, 0.0 }
 0x2a1   : > { %2320 = vst [vmem:[%s3470_s22 + $0x2f0] sm:$0xff] %v2192_v4  ;;  %v2193_v51 = vmax.f32 %v1967_v27, 0.0  ;;  %2353 = vst [vmem:[%s3470_s22 + $0x3f8] sm:$0xff] %v2225_v60 }
 0x2a2   : > { %2351 = vst [vmem:[%s3470_s22 + $0x3e8] sm:$0xff] %v2223_v33 }
 0x2a3   : > { %2321 = vst [vmem:[%s3470_s22 + $0x2f8] sm:$0xff] %v2193_v51 }
 0x2a4 PF: > { %s13_s12 = sadd.s32 1, %s2733_s12  }
 0x2a5   : > { %p10_p4 = scmp.ge.s32.totalorder %s13_s12, 6  }
 0x2a7   :  { %12 = sbr.rel (!%p10_p4) target bundleno = 1 (0x1), region = 62 }

// kernel: image_decoder_forward.9
= control target key start
LH: loop header
LB: loop body
LE: loop exit
PB: predicated region body
PF: predicated region fallthrough
CT: control target
= control target key end

     0   :  { %s1362_s12 = smov 0   ;;  %s1622_s0 = inlined_call_operand.vmem [shape: f32[16,32,1024], index: 0, kind: input, shape index: {}]   ;;  %s1623_s1 = inlined_call_operand.vmem [shape: f32[3,32], index: 1, kind: input, shape index: {}]   ;;  %s1624_s2 = inlined_call_operand.vmem [shape: f32[3,1], index: 2, kind: input, shape index: {}]   ;;  %s1625_s3 = inlined_call_operand.vmem [shape: f32[16,3,1024], index: 3, kind: output, shape index: {}]  }
   0x1 LB: > { %s1184_s13 = sadd.s32 4294967295, %s1339_s12   ;;  %p1188_p0 = scmp.ge.s32.totalorder %s1339_s12, 1  ;;  %s1339_s12 = sphi %s1362_s12, %s13_s12  }
   0x2   : > { %p139_p1 = scmp.lt.s32.totalorder %s1339_s12, 5 }
   0x4   : > { %p140_p2 = pnand %p1188_p0, %p139_p1 }
   0x5   : > { %s1189_s14 = sshll.u32 (!%p140_p2), %s1184_s13, 2  ;;  %v1341_v0 = vmov (!%p140_p2), 0   ;;  %v182_v1 = vld [vmem:[%s1624_s2] sm:$0x7] (!%p140_p2)  ;;  %vm236_vm0 = vcmask (!%p140_p2), 261120  }
   0x6   : > { %143 = sbr.rel (%p140_p2) target bundleno = 303 (0x12f), region = 32  ;;  %p166_p3 = scmp.lt.s32.totalorder (!%p140_p2), %s1189_s14, 15  ;;  %272 = vmatprep.mubr.bf16.mxu0 (!%p140_p2), %v1341_v0  ;;  %313 = vmatprep.mubr.bf16.mxu1 (!%p140_p2), %v1341_v0  ;;  %v180_v14 = vld [vmem:[%s1623_s1] sm:$0x7] (!%p140_p2) }
   0x7   : > { %1332 = vset.pattern.permute.xlu0 (!%p140_p2), %v1341_v0  ;;  %v1408_v33 = vpack.c.bf16 (!%p140_p2), %v180_v14, %v180_v14 }
   0x8   : > { %233 = vperm.xlu0 (!%p140_p2), %1332, %v182_v1  }
   0xd   : > { %s1627_s14 = smov (!%p166_p3, %s1189_s14), 15 }
   0xe   : > { %s1321_s17 = sshll.u32 %s1627_s14, 8  ;;  %s1322_s23 = sshll.u32 %s1627_s14, 5 }
   0xf   : > { %s1382_s20 = scalar_lea.vmem %s1622_s0, %s1321_s17  ;;  %s1572_s26 = scalar_lea.vmem %s1625_s3, %s1322_s23 }
  0x10   : > { %v184_v2 = vld [vmem:[%s1382_s20 + $0x8] sm:$0xff]  ;;  %v186_v4 = vld [vmem:[%s1382_s20 + $0x18] sm:$0xff]  ;;  %v183_v7 = vld [vmem:[%s1382_s20] sm:$0xff] }
  0x11   : > { %v192_v3 = vld [vmem:[%s1382_s20 + $0x48] sm:$0xff]  ;;  %v194_v6 = vld [vmem:[%s1382_s20 + $0x58] sm:$0xff]  ;;  %v191_v8 = vld [vmem:[%s1382_s20 + $0x40] sm:$0xff] }
  0x12   : > { %v216_v5 = vpack.c.bf16 %v192_v3, %v184_v2  ;;  %v218_v9 = vpack.c.bf16 %v194_v6, %v186_v4  ;;  %v215_v10 = vpack.c.bf16 %v191_v8, %v183_v7  ;;  %v185_v11 = vld [vmem:[%s1382_s20 + $0x10] sm:$0xff]  ;;  %v200_v13 = vld [vmem:[%s1382_s20 + $0x88] sm:$0xff]  ;;  %v202_v17 = vld [vmem:[%s1382_s20 + $0x98] sm:$0xff] }
  0x13   : > { %v193_v12 = vld [vmem:[%s1382_s20 + $0x50] sm:$0xff]  ;;  %v208_v16 = vld [vmem:[%s1382_s20 + $0xc8] sm:$0xff]  ;;  %v210_v18 = vld [vmem:[%s1382_s20 + $0xd8] sm:$0xff] }
  0x14   : > { %240 = vmatprep.subr.bf16.mxu0 %v216_v5  ;;  %v217_v15 = vpack.c.bf16 %v193_v12, %v185_v11  ;;  %281 = vmatprep.subr.bf16.mxu1 %v218_v9  ;;  %v224_v19 = vpack.c.bf16 %v208_v16, %v200_v13  ;;  %v226_v20 = vpack.c.bf16 %v210_v18, %v202_v17  ;;  %v199_v21 = vld [vmem:[%s1382_s20 + $0x80] sm:$0xff]  ;;  %v201_v23 = vld [vmem:[%s1382_s20 + $0x90] sm:$0xff]  ;;  %v188_v26 = vld [vmem:[%s1382_s20 + $0x28] sm:$0xff] }
  0x15   : > { %241 = vmatpush1.bf16.msra.mxu0 %v215_v10  ;;  %v207_v22 = vld [vmem:[%s1382_s20 + $0xc0] sm:$0xff]  ;;  %v209_v25 = vld [vmem:[%s1382_s20 + $0xd0] sm:$0xff]  ;;  %v196_v27 = vld [vmem:[%s1382_s20 + $0x68] sm:$0xff] }
  0x16   : > { %282 = vmatpush1.bf16.msra.mxu1 %v217_v15  ;;  %v223_v24 = vpack.c.bf16 %v207_v22, %v199_v21  ;;  %242 = vmatprep.subr.bf16.mxu0 %v224_v19  ;;  %v225_v28 = vpack.c.bf16 %v209_v25, %v201_v23  ;;  %v220_v29 = vpack.c.bf16 %v196_v27, %v188_v26  ;;  %v190_v30 = vld [vmem:[%s1382_s20 + $0x38] sm:$0xff]  ;;  %v187_v32 = vld [vmem:[%s1382_s20 + $0x20] sm:$0xff]  ;;  %v189_v36 = vld [vmem:[%s1382_s20 + $0x30] sm:$0xff] }
  0x17   : > { %283 = vmatprep.subr.bf16.mxu1 %v226_v20  ;;  %v198_v31 = vld [vmem:[%s1382_s20 + $0x78] sm:$0xff]  ;;  %v195_v35 = vld [vmem:[%s1382_s20 + $0x60] sm:$0xff]  ;;  %v197_v37 = vld [vmem:[%s1382_s20 + $0x70] sm:$0xff] }
  0x18   : > { %v222_v34 = vpack.c.bf16 %v198_v31, %v190_v30  ;;  %v219_v38 = vpack.c.bf16 %v195_v35, %v187_v32  ;;  %v204_v39 = vld [vmem:[%s1382_s20 + $0xa8] sm:$0xff]  ;;  %v206_v41 = vld [vmem:[%s1382_s20 + $0xb8] sm:$0xff]  ;;  %v221_v42 = vpack.c.bf16 %v197_v37, %v189_v36  ;;  %v203_v45 = vld [vmem:[%s1382_s20 + $0xa0] sm:$0xff] }
  0x19   : > { %243 = vmatpush1.bf16.msra.mxu0 %v223_v24  ;;  %v212_v40 = vld [vmem:[%s1382_s20 + $0xe8] sm:$0xff]  ;;  %v214_v44 = vld [vmem:[%s1382_s20 + $0xf8] sm:$0xff]  ;;  %v211_v46 = vld [vmem:[%s1382_s20 + $0xe0] sm:$0xff] }
  0x1a   : > { %284 = vmatpush1.bf16.msra.mxu1 %v225_v28  ;;  %322 = vmatprep.subr.bf16.mxu0 %v220_v29  ;;  %v228_v43 = vpack.c.bf16 %v212_v40, %v204_v39  ;;  %v230_v47 = vpack.c.bf16 %v214_v44, %v206_v41  ;;  %v205_v48 = vld [vmem:[%s1382_s20 + $0xb0] sm:$0xff]  ;;  %v1200_v50 = vld [vmem:[%s1382_s20 + $0x108] sm:$0xff]  ;;  %v1202_v52 = vld [vmem:[%s1382_s20 + $0x118] sm:$0xff]  ;;  %v227_v54 = vpack.c.bf16 %v211_v46, %v203_v45 }
  0x1b   : > { %363 = vmatprep.subr.bf16.mxu1 %v222_v34  ;;  %v213_v49 = vld [vmem:[%s1382_s20 + $0xf0] sm:$0xff]  ;;  %v1208_v51 = vld [vmem:[%s1382_s20 + $0x148] sm:$0xff]  ;;  %v1210_v53 = vld [vmem:[%s1382_s20 + $0x158] sm:$0xff] }
  0x1c   : > { %1195 = vmatmul.mubr.msk.bf16.vlgmr.msra.gmra.mrb[0].mxu0 %vm236_vm0, %v1408_v33  ;;  %v229_v55 = vpack.c.bf16 %v213_v49, %v205_v48  ;;  %v458_v56 = vpack.c.bf16 %v1208_v51, %v1200_v50  ;;  %v1199_v57 = vld [vmem:[%s1382_s20 + $0x100] sm:$0xff]  ;;  %v1201_v59 = vld [vmem:[%s1382_s20 + $0x110] sm:$0xff]  ;;  %v460_v60 = vpack.c.bf16 %v1210_v53, %v1202_v52  ;;  %v1216_v62 = vld [vmem:[%s1382_s20 + $0x188] sm:$0xff] }
  0x1d   : > { %1196 = vmatmul.mubr.msk.bf16.vlgmr.msra.gmra.mrb[0].mxu1 %vm236_vm0, %v1408_v33  ;;  %323 = vmatpush1.bf16.msra.mxu0 %v219_v38  ;;  %v1207_v58 = vld [vmem:[%s1382_s20 + $0x140] sm:$0xff]  ;;  %v1209_v61 = vld [vmem:[%s1382_s20 + $0x150] sm:$0xff]  ;;  %v1224_v63 = vld [vmem:[%s1382_s20 + $0x1c8] sm:$0xff] }
  0x1e   : > { %364 = vmatpush1.bf16.msra.mxu1 %v221_v42  ;;  %324 = vmatprep.subr.bf16.mxu0 %v228_v43  ;;  %v1218_v1 = vld [vmem:[%s1382_s20 + $0x198] sm:$0xff]  ;;  %v457_v3 = vpack.c.bf16 %v1207_v58, %v1199_v57  ;;  %v459_v4 = vpack.c.bf16 %v1209_v61, %v1201_v59  ;;  %v466_v5 = vpack.c.bf16 %v1224_v63, %v1216_v62  ;;  %v1215_v6 = vld [vmem:[%s1382_s20 + $0x180] sm:$0xff]  ;;  %v1217_v8 = vld [vmem:[%s1382_s20 + $0x190] sm:$0xff] }
  0x1f   : > { %365 = vmatprep.subr.bf16.mxu1 %v230_v47  ;;  %354 = vmatprep.mubr.bf16.mxu0 %v1341_v0  ;;  %v1226_v2 = vld [vmem:[%s1382_s20 + $0x1d8] sm:$0xff]  ;;  %v1223_v7 = vld [vmem:[%s1382_s20 + $0x1c0] sm:$0xff]  ;;  %v1225_v10 = vld [vmem:[%s1382_s20 + $0x1d0] sm:$0xff] }
  0x20   : > { %395 = vmatprep.mubr.bf16.mxu1 %v1341_v0  ;;  %v468_v9 = vpack.c.bf16 %v1226_v2, %v1218_v1  ;;  %v1204_v11 = vld [vmem:[%s1382_s20 + $0x128] sm:$0xff]  ;;  %v1206_v13 = vld [vmem:[%s1382_s20 + $0x138] sm:$0xff]  ;;  %v465_v15 = vpack.c.bf16 %v1223_v7, %v1215_v6  ;;  %v467_v16 = vpack.c.bf16 %v1225_v10, %v1217_v8  ;;  %v1203_v18 = vld [vmem:[%s1382_s20 + $0x120] sm:$0xff] }
  0x21   : > { %325 = vmatpush1.bf16.msra.mxu0 %v227_v54  ;;  %v1212_v12 = vld [vmem:[%s1382_s20 + $0x168] sm:$0xff]  ;;  %v1214_v14 = vld [vmem:[%s1382_s20 + $0x178] sm:$0xff]  ;;  %v1211_v19 = vld [vmem:[%s1382_s20 + $0x160] sm:$0xff] }
  0x22   : > { %366 = vmatpush1.bf16.msra.mxu1 %v229_v55  ;;  %473 = vmatprep.subr.bf16.mxu0 %v458_v56  ;;  %v462_v17 = vpack.c.bf16 %v1212_v12, %v1204_v11  ;;  %v1205_v20 = vld [vmem:[%s1382_s20 + $0x130] sm:$0xff]  ;;  %v464_v21 = vpack.c.bf16 %v1214_v14, %v1206_v13  ;;  %v1220_v23 = vld [vmem:[%s1382_s20 + $0x1a8] sm:$0xff]  ;;  %v1222_v25 = vld [vmem:[%s1382_s20 + $0x1b8] sm:$0xff]  ;;  %v461_v27 = vpack.c.bf16 %v1211_v19, %v1203_v18 }
  0x23   : > { %514 = vmatprep.subr.bf16.mxu1 %v460_v60  ;;  %v1213_v22 = vld [vmem:[%s1382_s20 + $0x170] sm:$0xff]  ;;  %v1228_v24 = vld [vmem:[%s1382_s20 + $0x1e8] sm:$0xff]  ;;  %v1230_v26 = vld [vmem:[%s1382_s20 + $0x1f8] sm:$0xff] }
  0x24   : > { %1197 = vmatmul.mubr.msk.bf16.vlgmr.msra.gmra.mrb[4].mxu0 %vm236_vm0, %v1408_v33  ;;  %v463_v28 = vpack.c.bf16 %v1213_v22, %v1205_v20  ;;  %v470_v29 = vpack.c.bf16 %v1228_v24, %v1220_v23  ;;  %v1219_v30 = vld [vmem:[%s1382_s20 + $0x1a0] sm:$0xff]  ;;  %v1221_v32 = vld [vmem:[%s1382_s20 + $0x1b0] sm:$0xff]  ;;  %v472_v34 = vpack.c.bf16 %v1230_v26, %v1222_v25  ;;  %v1240_v36 = vld [vmem:[%s1382_s20 + $0x208] sm:$0xff] }
  0x25   : > { %1198 = vmatmul.mubr.msk.bf16.vlgmr.msra.gmra.mrb[4].mxu1 %vm236_vm0, %v1408_v33  ;;  %474 = vmatpush1.bf16.msra.mxu0 %v457_v3  ;;  %v1227_v31 = vld [vmem:[%s1382_s20 + $0x1e0] sm:$0xff]  ;;  %v1229_v35 = vld [vmem:[%s1382_s20 + $0x1f0] sm:$0xff]  ;;  %v1248_v37 = vld [vmem:[%s1382_s20 + $0x248] sm:$0xff] }
  0x26   : > { %515 = vmatpush1.bf16.msra.mxu1 %v459_v4  ;;  %475 = vmatprep.subr.bf16.mxu0 %v466_v5  ;;  %v1242_v38 = vld [vmem:[%s1382_s20 + $0x218] sm:$0xff]  ;;  %v469_v40 = vpack.c.bf16 %v1227_v31, %v1219_v30  ;;  %v471_v41 = vpack.c.bf16 %v1229_v35, %v1221_v32  ;;  %v692_v42 = vpack.c.bf16 %v1248_v37, %v1240_v36  ;;  %v1239_v43 = vld [vmem:[%s1382_s20 + $0x200] sm:$0xff]  ;;  %v1241_v45 = vld [vmem:[%s1382_s20 + $0x210] sm:$0xff] }
  0x27   : > { %516 = vmatprep.subr.bf16.mxu1 %v468_v9  ;;  %505 = vmatprep.mubr.bf16.mxu0 %v1341_v0  ;;  %v1250_v39 = vld [vmem:[%s1382_s20 + $0x258] sm:$0xff]  ;;  %v1247_v44 = vld [vmem:[%s1382_s20 + $0x240] sm:$0xff]  ;;  %v1249_v47 = vld [vmem:[%s1382_s20 + $0x250] sm:$0xff] }
  0x28   : > { %546 = vmatprep.mubr.bf16.mxu1 %v1341_v0  ;;  %v694_v46 = vpack.c.bf16 %v1250_v39, %v1242_v38  ;;  %v1256_v48 = vld [vmem:[%s1382_s20 + $0x288] sm:$0xff]  ;;  %v1258_v50 = vld [vmem:[%s1382_s20 + $0x298] sm:$0xff]  ;;  %v691_v52 = vpack.c.bf16 %v1247_v44, %v1239_v43  ;;  %v693_v53 = vpack.c.bf16 %v1249_v47, %v1241_v45  ;;  %v1255_v55 = vld [vmem:[%s1382_s20 + $0x280] sm:$0xff] }
  0x29   : > { %476 = vmatpush1.bf16.msra.mxu0 %v465_v15  ;;  %v1264_v49 = vld [vmem:[%s1382_s20 + $0x2c8] sm:$0xff]  ;;  %v1266_v51 = vld [vmem:[%s1382_s20 + $0x2d8] sm:$0xff]  ;;  %v1263_v56 = vld [vmem:[%s1382_s20 + $0x2c0] sm:$0xff] }
  0x2a   : > { %517 = vmatpush1.bf16.msra.mxu1 %v467_v16  ;;  %555 = vmatprep.subr.bf16.mxu0 %v462_v17  ;;  %v700_v54 = vpack.c.bf16 %v1264_v49, %v1256_v48  ;;  %v1257_v57 = vld [vmem:[%s1382_s20 + $0x290] sm:$0xff]  ;;  %v702_v58 = vpack.c.bf16 %v1266_v51, %v1258_v50  ;;  %v1244_v60 = vld [vmem:[%s1382_s20 + $0x228] sm:$0xff]  ;;  %v1246_v62 = vld [vmem:[%s1382_s20 + $0x238] sm:$0xff]  ;;  %v699_v1 = vpack.c.bf16 %v1263_v56, %v1255_v55 }
  0x2b   : > { %596 = vmatprep.subr.bf16.mxu1 %v464_v21  ;;  %v1265_v59 = vld [vmem:[%s1382_s20 + $0x2d0] sm:$0xff]  ;;  %v1252_v61 = vld [vmem:[%s1382_s20 + $0x268] sm:$0xff]  ;;  %v1254_v63 = vld [vmem:[%s1382_s20 + $0x278] sm:$0xff] }
  0x2c   : > { %1231 = vmatmul.mubr.msk.bf16.vlgmr.msra.gmra.mrb[8].mxu0 %vm236_vm0, %v1408_v33  ;;  %v701_v2 = vpack.c.bf16 %v1265_v59, %v1257_v57  ;;  %v696_v3 = vpack.c.bf16 %v1252_v61, %v1244_v60  ;;  %v1243_v4 = vld [vmem:[%s1382_s20 + $0x220] sm:$0xff]  ;;  %v1245_v6 = vld [vmem:[%s1382_s20 + $0x230] sm:$0xff]  ;;  %v698_v7 = vpack.c.bf16 %v1254_v63, %v1246_v62  ;;  %v1260_v9 = vld [vmem:[%s1382_s20 + $0x2a8] sm:$0xff] }
  0x2d   : > { %1232 = vmatmul.mubr.msk.bf16.vlgmr.msra.gmra.mrb[8].mxu1 %vm236_vm0, %v1408_v33  ;;  %556 = vmatpush1.bf16.msra.mxu0 %v461_v27  ;;  %v1251_v5 = vld [vmem:[%s1382_s20 + $0x260] sm:$0xff]  ;;  %v1253_v8 = vld [vmem:[%s1382_s20 + $0x270] sm:$0xff]  ;;  %v1268_v10 = vld [vmem:[%s1382_s20 + $0x2e8] sm:$0xff] }
  0x2e   : > { %597 = vmatpush1.bf16.msra.mxu1 %v463_v28  ;;  %557 = vmatprep.subr.bf16.mxu0 %v470_v29  ;;  %v1262_v11 = vld [vmem:[%s1382_s20 + $0x2b8] sm:$0xff]  ;;  %v695_v13 = vpack.c.bf16 %v1251_v5, %v1243_v4  ;;  %v697_v14 = vpack.c.bf16 %v1253_v8, %v1245_v6  ;;  %v704_v15 = vpack.c.bf16 %v1268_v10, %v1260_v9  ;;  %v1259_v16 = vld [vmem:[%s1382_s20 + $0x2a0] sm:$0xff]  ;;  %v1261_v18 = vld [vmem:[%s1382_s20 + $0x2b0] sm:$0xff] }
  0x2f   : > { %598 = vmatprep.subr.bf16.mxu1 %v472_v34  ;;  %587 = vmatprep.mubr.bf16.mxu0 %v1341_v0  ;;  %v1270_v12 = vld [vmem:[%s1382_s20 + $0x2f8] sm:$0xff]  ;;  %v1267_v17 = vld [vmem:[%s1382_s20 + $0x2e0] sm:$0xff]  ;;  %v1269_v20 = vld [vmem:[%s1382_s20 + $0x2f0] sm:$0xff] }
  0x30   : > { %628 = vmatprep.mubr.bf16.mxu1 %v1341_v0  ;;  %v706_v19 = vpack.c.bf16 %v1270_v12, %v1262_v11  ;;  %v1280_v21 = vld [vmem:[%s1382_s20 + $0x308] sm:$0xff]  ;;  %v1282_v23 = vld [vmem:[%s1382_s20 + $0x318] sm:$0xff]  ;;  %v703_v25 = vpack.c.bf16 %v1267_v17, %v1259_v16  ;;  %v705_v26 = vpack.c.bf16 %v1269_v20, %v1261_v18  ;;  %v1279_v28 = vld [vmem:[%s1382_s20 + $0x300] sm:$0xff] }
  0x31   : > { %558 = vmatpush1.bf16.msra.mxu0 %v469_v40  ;;  %v1288_v22 = vld [vmem:[%s1382_s20 + $0x348] sm:$0xff]  ;;  %v1290_v24 = vld [vmem:[%s1382_s20 + $0x358] sm:$0xff]  ;;  %v1287_v29 = vld [vmem:[%s1382_s20 + $0x340] sm:$0xff] }
  0x32   : > { %599 = vmatpush1.bf16.msra.mxu1 %v471_v41  ;;  %707 = vmatprep.subr.bf16.mxu0 %v692_v42  ;;  %v926_v27 = vpack.c.bf16 %v1288_v22, %v1280_v21  ;;  %v1281_v30 = vld [vmem:[%s1382_s20 + $0x310] sm:$0xff]  ;;  %v928_v31 = vpack.c.bf16 %v1290_v24, %v1282_v23  ;;  %v1296_v34 = vld [vmem:[%s1382_s20 + $0x388] sm:$0xff]  ;;  %v1298_v36 = vld [vmem:[%s1382_s20 + $0x398] sm:$0xff]  ;;  %v925_v38 = vpack.c.bf16 %v1287_v29, %v1279_v28 }
  0x33   : > { %748 = vmatprep.subr.bf16.mxu1 %v694_v46  ;;  %v1289_v32 = vld [vmem:[%s1382_s20 + $0x350] sm:$0xff]  ;;  %v1304_v35 = vld [vmem:[%s1382_s20 + $0x3c8] sm:$0xff]  ;;  %v1306_v37 = vld [vmem:[%s1382_s20 + $0x3d8] sm:$0xff] }
  0x34   : > { %1233 = vmatmul.mubr.msk.bf16.vlgmr.msra.gmra.mrb[12].mxu0 %vm236_vm0, %v1408_v33  ;;  %v927_v39 = vpack.c.bf16 %v1289_v32, %v1281_v30  ;;  %v934_v40 = vpack.c.bf16 %v1304_v35, %v1296_v34  ;;  %v1295_v41 = vld [vmem:[%s1382_s20 + $0x380] sm:$0xff]  ;;  %v1297_v43 = vld [vmem:[%s1382_s20 + $0x390] sm:$0xff]  ;;  %v936_v44 = vpack.c.bf16 %v1306_v37, %v1298_v36  ;;  %v1284_v46 = vld [vmem:[%s1382_s20 + $0x328] sm:$0xff] }
  0x35   : > { %1234 = vmatmul.mubr.msk.bf16.vlgmr.msra.gmra.mrb[12].mxu1 %vm236_vm0, %v1408_v33  ;;  %708 = vmatpush1.bf16.msra.mxu0 %v691_v52  ;;  %v1303_v42 = vld [vmem:[%s1382_s20 + $0x3c0] sm:$0xff]  ;;  %v1305_v45 = vld [vmem:[%s1382_s20 + $0x3d0] sm:$0xff]  ;;  %v1292_v47 = vld [vmem:[%s1382_s20 + $0x368] sm:$0xff] }
  0x36   : > { %749 = vmatpush1.bf16.msra.mxu1 %v693_v53  ;;  %709 = vmatprep.subr.bf16.mxu0 %v700_v54  ;;  %v1286_v48 = vld [vmem:[%s1382_s20 + $0x338] sm:$0xff]  ;;  %v933_v50 = vpack.c.bf16 %v1303_v42, %v1295_v41  ;;  %v935_v51 = vpack.c.bf16 %v1305_v45, %v1297_v43  ;;  %v930_v52 = vpack.c.bf16 %v1292_v47, %v1284_v46  ;;  %v1283_v53 = vld [vmem:[%s1382_s20 + $0x320] sm:$0xff]  ;;  %v1285_v55 = vld [vmem:[%s1382_s20 + $0x330] sm:$0xff] }
  0x37   : > { %750 = vmatprep.subr.bf16.mxu1 %v702_v58  ;;  %739 = vmatprep.mubr.bf16.mxu0 %v1341_v0  ;;  %v1294_v49 = vld [vmem:[%s1382_s20 + $0x378] sm:$0xff]  ;;  %v1291_v54 = vld [vmem:[%s1382_s20 + $0x360] sm:$0xff]  ;;  %v1293_v57 = vld [vmem:[%s1382_s20 + $0x370] sm:$0xff] }
  0x38   : > { %780 = vmatprep.mubr.bf16.mxu1 %v1341_v0  ;;  %v932_v56 = vpack.c.bf16 %v1294_v49, %v1286_v48  ;;  %v1300_v58 = vld [vmem:[%s1382_s20 + $0x3a8] sm:$0xff]  ;;  %v1302_v60 = vld [vmem:[%s1382_s20 + $0x3b8] sm:$0xff]  ;;  %v929_v62 = vpack.c.bf16 %v1291_v54, %v1283_v53  ;;  %v931_v63 = vpack.c.bf16 %v1293_v57, %v1285_v55  ;;  %v1301_v5 = vld [vmem:[%s1382_s20 + $0x3b0] sm:$0xff] }
  0x39   : > { %710 = vmatpush1.bf16.msra.mxu0 %v699_v1  ;;  %v1308_v59 = vld [vmem:[%s1382_s20 + $0x3e8] sm:$0xff]  ;;  %v1310_v61 = vld [vmem:[%s1382_s20 + $0x3f8] sm:$0xff]  ;;  %v1309_v6 = vld [vmem:[%s1382_s20 + $0x3f0] sm:$0xff] }
  0x3a   : > { %751 = vmatpush1.bf16.msra.mxu1 %v701_v2  ;;  %789 = vmatprep.subr.bf16.mxu0 %v696_v3  ;;  %v938_v1 = vpack.c.bf16 %v1308_v59, %v1300_v58  ;;  %v1299_v2 = vld [vmem:[%s1382_s20 + $0x3a0] sm:$0xff]  ;;  %v940_v4 = vpack.c.bf16 %v1310_v61, %v1302_v60  ;;  %v939_v8 = vpack.c.bf16 %v1309_v6, %v1301_v5 }
  0x3b   : > { %830 = vmatprep.subr.bf16.mxu1 %v698_v7  ;;  %v1307_v3 = vld [vmem:[%s1382_s20 + $0x3e0] sm:$0xff] }
  0x3c   : > { %1271 = vmatmul.mubr.msk.bf16.vlgmr.msra.gmra.mrb[16].mxu0 %vm236_vm0, %v1408_v33  ;;  %v937_v7 = vpack.c.bf16 %v1307_v3, %v1299_v2 }
  0x3d   : > { %1272 = vmatmul.mubr.msk.bf16.vlgmr.msra.gmra.mrb[16].mxu1 %vm236_vm0, %v1408_v33  ;;  %790 = vmatpush1.bf16.msra.mxu0 %v695_v13 }
  0x3e   : > { %831 = vmatpush1.bf16.msra.mxu1 %v697_v14  ;;  %791 = vmatprep.subr.bf16.mxu0 %v704_v15 }
  0x3f   : > { %832 = vmatprep.subr.bf16.mxu1 %v706_v19  ;;  %821 = vmatprep.mubr.bf16.mxu0 %v1341_v0 }
  0x40   : > { %862 = vmatprep.mubr.bf16.mxu1 %v1341_v0 }
  0x41   : > { %792 = vmatpush1.bf16.msra.mxu0 %v703_v25 }
  0x42   : > { %833 = vmatpush1.bf16.msra.mxu1 %v705_v26  ;;  %941 = vmatprep.subr.bf16.mxu0 %v926_v27 }
  0x43   : > { %982 = vmatprep.subr.bf16.mxu1 %v928_v31 }
  0x44   : > { %1273 = vmatmul.mubr.msk.bf16.vlgmr.msra.gmra.mrb[20].mxu0 %vm236_vm0, %v1408_v33 }
  0x45   : > { %1274 = vmatmul.mubr.msk.bf16.vlgmr.msra.gmra.mrb[20].mxu1 %vm236_vm0, %v1408_v33  ;;  %942 = vmatpush1.bf16.msra.mxu0 %v925_v38 }
  0x46   : > { %983 = vmatpush1.bf16.msra.mxu1 %v927_v39  ;;  %943 = vmatprep.subr.bf16.mxu0 %v934_v40 }
  0x47   : > { %984 = vmatprep.subr.bf16.mxu1 %v936_v44  ;;  %973 = vmatprep.mubr.bf16.mxu0 %v1341_v0 }
  0x48   : > { %1014 = vmatprep.mubr.bf16.mxu1 %v1341_v0 }
  0x49   : > { %944 = vmatpush1.bf16.msra.mxu0 %v933_v50 }
  0x4a   : > { %985 = vmatpush1.bf16.msra.mxu1 %v935_v51  ;;  %1023 = vmatprep.subr.bf16.mxu0 %v930_v52 }
  0x4b   : > { %1064 = vmatprep.subr.bf16.mxu1 %v932_v56 }
  0x4c   : > { %1311 = vmatmul.mubr.msk.bf16.vlgmr.msra.gmra.mrb[24].mxu0 %vm236_vm0, %v1408_v33 }
  0x4d   : > { %1312 = vmatmul.mubr.msk.bf16.vlgmr.msra.gmra.mrb[24].mxu1 %vm236_vm0, %v1408_v33  ;;  %1024 = vmatpush1.bf16.msra.mxu0 %v929_v62 }
  0x4e   : > { %1065 = vmatpush1.bf16.msra.mxu1 %v931_v63  ;;  %1025 = vmatprep.subr.bf16.mxu0 %v938_v1 }
  0x4f   : > { %1066 = vmatprep.subr.bf16.mxu1 %v940_v4  ;;  %1055 = vmatprep.mubr.bf16.mxu0 %v1341_v0 }
  0x50   : > { %1096 = vmatprep.mubr.bf16.mxu1 %v1341_v0 }
  0x51   : > { %1026 = vmatpush1.bf16.msra.mxu0 %v937_v7 }
  0x52   : > { %1067 = vmatpush1.bf16.msra.mxu1 %v939_v8 }
  0x54   : > { %1313 = vmatmul.mubr.msk.bf16.vlgmr.msra.gmra.mrb[28].mxu0 %vm236_vm0, %v1408_v33 }
  0x55   : > { %1314 = vmatmul.mubr.msk.bf16.vlgmr.msra.gmra.mrb[28].mxu1 %vm236_vm0, %v1408_v33 }
  0x87   : > { %v1563_v9 = vpop.permute.xlu0 %233 }
  0xef   : > { %v274_v10 = vpop.f32.mrb[0].mxu0 }
  0xf0   : > { %v315_v11 = vpop.f32.mrb[0].mxu1  ;;  %v275_v12 = vadd.f32 %v274_v10, %v1563_v9  ;;  %v276_v13 = vpop.f32.mrb[1].mxu0 }
  0xf1   : > { %v277_v14 = vadd.f32 %v276_v13, %v1563_v9  ;;  %v316_v0 = vadd.f32 %v315_v11, %v1563_v9  ;;  %v317_v15 = vpop.f32.mrb[1].mxu1  ;;  %v278_v16 = vpop.f32.mrb[2].mxu0 }
  0xf2   : > { %v318_v33 = vadd.f32 %v317_v15, %v1563_v9  ;;  %v319_v17 = vpop.f32.mrb[2].mxu1  ;;  %v279_v18 = vpop.f32.mrb[3].mxu0 }
  0xf3   : > { %v412_v19 = vcombine.low %v275_v12, %v277_v14  ;;  %v320_v20 = vpop.f32.mrb[3].mxu1 }
  0xf4   : > { %v413_v21 = vcombine.low %v316_v0, %v318_v33 }
  0xf5   : > { %420 = vst [vmem:[%s1572_s26] sm:$0x77] %v412_v19 }
  0xf6   : > { %421 = vst [vmem:[%s1572_s26 + $0x8] sm:$0x77] %v413_v21 }
  0xf7   : > { %v356_v22 = vpop.f32.mrb[4].mxu0 }
  0xf8   : > { %v357_v23 = vadd.f32 %v356_v22, %v1563_v9  ;;  %v397_v24 = vpop.f32.mrb[4].mxu1  ;;  %v358_v25 = vpop.f32.mrb[5].mxu0 }
  0xf9   : > { %v398_v26 = vadd.f32 %v397_v24, %v1563_v9  ;;  %v359_v27 = vadd.f32 %v358_v25, %v1563_v9  ;;  %v399_v28 = vpop.f32.mrb[5].mxu1  ;;  %v360_v29 = vpop.f32.mrb[6].mxu0 }
  0xfa   : > { %v400_v30 = vadd.f32 %v399_v28, %v1563_v9  ;;  %v401_v31 = vpop.f32.mrb[6].mxu1  ;;  %v361_v32 = vpop.f32.mrb[7].mxu0 }
  0xfb   : > { %v414_v34 = vcombine.low %v357_v23, %v359_v27  ;;  %v402_v35 = vpop.f32.mrb[7].mxu1 }
  0xfc   : > { %v415_v36 = vcombine.low %v398_v26, %v400_v30 }
  0xfd   : > { %422 = vst [vmem:[%s1572_s26 + $0x10] sm:$0x77] %v414_v34 }
  0xfe   : > { %423 = vst [vmem:[%s1572_s26 + $0x18] sm:$0x77] %v415_v36 }
  0xff   : > { %v507_v37 = vpop.f32.mrb[8].mxu0 }
 0x100   : > { %v508_v38 = vadd.f32 %v507_v37, %v1563_v9  ;;  %v548_v39 = vpop.f32.mrb[8].mxu1  ;;  %v509_v40 = vpop.f32.mrb[9].mxu0 }
 0x101   : > { %v549_v41 = vadd.f32 %v548_v39, %v1563_v9  ;;  %v510_v42 = vadd.f32 %v509_v40, %v1563_v9  ;;  %v550_v43 = vpop.f32.mrb[9].mxu1  ;;  %v511_v44 = vpop.f32.mrb[10].mxu0 }
 0x102   : > { %v551_v45 = vadd.f32 %v550_v43, %v1563_v9  ;;  %v552_v46 = vpop.f32.mrb[10].mxu1  ;;  %v512_v47 = vpop.f32.mrb[11].mxu0 }
 0x103   : > { %v645_v48 = vcombine.low %v508_v38, %v510_v42  ;;  %v553_v49 = vpop.f32.mrb[11].mxu1 }
 0x104   : > { %v646_v50 = vcombine.low %v549_v41, %v551_v45 }
 0x105   : > { %1235 = vst [vmem:[%s1572_s26 + $0x20] sm:$0x77] %v645_v48 }
 0x106   : > { %1236 = vst [vmem:[%s1572_s26 + $0x28] sm:$0x77] %v646_v50 }
 0x107   : > { %v589_v51 = vpop.f32.mrb[12].mxu0 }
 0x108   : > { %v590_v52 = vadd.f32 %v589_v51, %v1563_v9  ;;  %v630_v53 = vpop.f32.mrb[12].mxu1  ;;  %v591_v54 = vpop.f32.mrb[13].mxu0 }
 0x109   : > { %v631_v55 = vadd.f32 %v630_v53, %v1563_v9  ;;  %v592_v56 = vadd.f32 %v591_v54, %v1563_v9  ;;  %v632_v57 = vpop.f32.mrb[13].mxu1  ;;  %v593_v58 = vpop.f32.mrb[14].mxu0 }
 0x10a   : > { %v633_v59 = vadd.f32 %v632_v57, %v1563_v9  ;;  %v634_v60 = vpop.f32.mrb[14].mxu1  ;;  %v594_v61 = vpop.f32.mrb[15].mxu0 }
 0x10b   : > { %v647_v62 = vcombine.low %v590_v52, %v592_v56  ;;  %v635_v63 = vpop.f32.mrb[15].mxu1 }
 0x10c   : > { %v648_v1 = vcombine.low %v631_v55, %v633_v59 }
 0x10d   : > { %1237 = vst [vmem:[%s1572_s26 + $0x30] sm:$0x77] %v647_v62 }
 0x10e   : > { %1238 = vst [vmem:[%s1572_s26 + $0x38] sm:$0x77] %v648_v1 }
 0x10f   : > { %v741_v2 = vpop.f32.mrb[16].mxu0 }
 0x110   : > { %v742_v3 = vadd.f32 %v741_v2, %v1563_v9  ;;  %v782_v4 = vpop.f32.mrb[16].mxu1  ;;  %v743_v5 = vpop.f32.mrb[17].mxu0 }
 0x111   : > { %v783_v6 = vadd.f32 %v782_v4, %v1563_v9  ;;  %v744_v7 = vadd.f32 %v743_v5, %v1563_v9  ;;  %v784_v8 = vpop.f32.mrb[17].mxu1  ;;  %v745_v10 = vpop.f32.mrb[18].mxu0 }
 0x112   : > { %v785_v11 = vadd.f32 %v784_v8, %v1563_v9  ;;  %v786_v12 = vpop.f32.mrb[18].mxu1  ;;  %v746_v13 = vpop.f32.mrb[19].mxu0 }
 0x113   : > { %v879_v14 = vcombine.low %v742_v3, %v744_v7  ;;  %v787_v0 = vpop.f32.mrb[19].mxu1 }
 0x114   : > { %v880_v15 = vcombine.low %v783_v6, %v785_v11 }
 0x115   : > { %1275 = vst [vmem:[%s1572_s26 + $0x40] sm:$0x77] %v879_v14 }
 0x116   : > { %1276 = vst [vmem:[%s1572_s26 + $0x48] sm:$0x77] %v880_v15 }
 0x117   : > { %v823_v16 = vpop.f32.mrb[20].mxu0 }
 0x118   : > { %v824_v33 = vadd.f32 %v823_v16, %v1563_v9  ;;  %v864_v17 = vpop.f32.mrb[20].mxu1  ;;  %v825_v18 = vpop.f32.mrb[21].mxu0 }
 0x119   : > { %v865_v19 = vadd.f32 %v864_v17, %v1563_v9  ;;  %v826_v20 = vadd.f32 %v825_v18, %v1563_v9  ;;  %v866_v21 = vpop.f32.mrb[21].mxu1  ;;  %v827_v22 = vpop.f32.mrb[22].mxu0 }
 0x11a   : > { %v867_v23 = vadd.f32 %v866_v21, %v1563_v9  ;;  %v868_v24 = vpop.f32.mrb[22].mxu1  ;;  %v828_v25 = vpop.f32.mrb[23].mxu0 }
 0x11b   : > { %v881_v26 = vcombine.low %v824_v33, %v826_v20  ;;  %v869_v27 = vpop.f32.mrb[23].mxu1 }
 0x11c   : > { %v882_v28 = vcombine.low %v865_v19, %v867_v23 }
 0x11d   : > { %1277 = vst [vmem:[%s1572_s26 + $0x50] sm:$0x77] %v881_v26 }
 0x11e   : > { %1278 = vst [vmem:[%s1572_s26 + $0x58] sm:$0x77] %v882_v28 }
 0x11f   : > { %v975_v29 = vpop.f32.mrb[24].mxu0 }
 0x120   : > { %v976_v30 = vadd.f32 %v975_v29, %v1563_v9  ;;  %v1016_v31 = vpop.f32.mrb[24].mxu1  ;;  %v977_v32 = vpop.f32.mrb[25].mxu0 }
 0x121   : > { %v1017_v34 = vadd.f32 %v1016_v31, %v1563_v9  ;;  %v978_v35 = vadd.f32 %v977_v32, %v1563_v9  ;;  %v1018_v36 = vpop.f32.mrb[25].mxu1  ;;  %v979_v37 = vpop.f32.mrb[26].mxu0 }
 0x122   : > { %v1019_v38 = vadd.f32 %v1018_v36, %v1563_v9  ;;  %v1020_v39 = vpop.f32.mrb[26].mxu1  ;;  %v980_v40 = vpop.f32.mrb[27].mxu0 }
 0x123   : > { %v1113_v41 = vcombine.low %v976_v30, %v978_v35  ;;  %v1021_v42 = vpop.f32.mrb[27].mxu1 }
 0x124   : > { %v1114_v43 = vcombine.low %v1017_v34, %v1019_v38 }
 0x125   : > { %1315 = vst [vmem:[%s1572_s26 + $0x60] sm:$0x77] %v1113_v41 }
 0x126   : > { %1316 = vst [vmem:[%s1572_s26 + $0x68] sm:$0x77] %v1114_v43 }
 0x127   : > { %v1057_v44 = vpop.f32.mrb[28].mxu0 }
 0x128   : > { %v1058_v45 = vadd.f32 %v1057_v44, %v1563_v9  ;;  %v1098_v46 = vpop.f32.mrb[28].mxu1  ;;  %v1059_v47 = vpop.f32.mrb[29].mxu0 }
 0x129   : > { %v1099_v48 = vadd.f32 %v1098_v46, %v1563_v9  ;;  %v1060_v49 = vadd.f32 %v1059_v47, %v1563_v9  ;;  %v1100_v50 = vpop.f32.mrb[29].mxu1  ;;  %v1061_v51 = vpop.f32.mrb[30].mxu0 }
 0x12a   : > { %v1101_v52 = vadd.f32 %v1100_v50, %v1563_v9  ;;  %v1102_v53 = vpop.f32.mrb[30].mxu1  ;;  %v1062_v54 = vpop.f32.mrb[31].mxu0 }
 0x12b   : > { %v1115_v55 = vcombine.low %v1058_v45, %v1060_v49  ;;  %v1103_v56 = vpop.f32.mrb[31].mxu1 }
 0x12c   : > { %v1116_v57 = vcombine.low %v1099_v48, %v1101_v52 }
 0x12d   : > { %1317 = vst [vmem:[%s1572_s26 + $0x70] sm:$0x77] %v1115_v55 }
 0x12e   : > { %1318 = vst [vmem:[%s1572_s26 + $0x78] sm:$0x77] %v1116_v57 }
 0x12f PF: > { %s13_s12 = sadd.s32 1, %s1339_s12  }
 0x130   : > { %p10_p4 = scmp.ge.s32.totalorder %s13_s12, 6  }
 0x132   :  { %12 = sbr.rel (!%p10_p4) target bundleno = 1 (0x1), region = 68 }

</bundles_post_ra>
